<compile_context>
chip_gen: v6e
topology: v6e:2x2x1
jax: 0.10.0
libtpu: 0.0.40
codegen_flags: <defaults>
</compile_context>

<pallas_src>
import functools

import jax
import jax.numpy as jnp
from jax import lax
from jax.experimental import pallas as pl
from jax.experimental.pallas import tpu as pltpu


# ----------------------------------------------------------------------------- #
# Config (small, lane-friendly sizes; real VGG would use 512 / 4096)
# ----------------------------------------------------------------------------- #
C1 = 128          # channels after base.C1 conv
CM = 128          # channels after class-specific conv
CF = 128          # channels of base_feat (128 -> every RoI bin is one clean vreg row)
HIDDEN = 256      # top MLP width (stand-in for 4096)
NUM_CLASSES = 5
POOLED = 7
SPATIAL_SCALE = 1.0 / 16.0
ROI_BLOCK = 64    # ROIs per grid step (fc1 MXU M-rows; fits vregs comfortably)
BAND = 16         # image rows per backbone grid step == one row of the /16 map


# ----------------------------------------------------------------------------- #
# Fused backbone: conv1x1+ReLU -> 4x4 maxpool -> cls conv -> conv1x1+ReLU -> 4x4
# maxpool.  One grid step = one 16-row image band = one output feature row.
# ----------------------------------------------------------------------------- #
def _backbone_kernel(x_ref, w1_ref, b1_ref, wc_ref, bc_ref, w3_ref, b3_ref,
                     o_ref, *, w):
    cin = x_ref.shape[1]
    c1 = w1_ref.shape[1]
    cf = w3_ref.shape[1]

    x = x_ref[...]                                     # (BAND*w, cin) f32
    w1 = w1_ref[...]                                   # (cin, C1)    f32
    # base.C1: 1x1 conv as cin broadcast-FMAs on the VPU (K=3 is too small for MXU)
    x0 = x[:, 0:1] * w1[0:1, :]
    for c in range(1, cin):
        x0 = x0 + x[:, c:c + 1] * w1[c:c + 1, :]
    x0 = jnp.maximum(x0 + b1_ref[...], 0.0)            # (BAND*w, C1)

    # base.C1 pooling: 4x4 max-pool, factorized H then W via reshape+reduce
    h4 = jnp.max(x0.reshape(BAND // 4, 4, w, c1), axis=1)          # (4, w, C1)
    p1 = jnp.max(h4.reshape(BAND // 4, w // 4, 4, c1), axis=2)     # (4, w//4, C1)
    p1 = p1.reshape((BAND // 4) * (w // 4), c1).astype(jnp.bfloat16)

    # base.forward_specific_feat: class-specific 1x1 conv + ReLU (bf16 MXU, f32 acc)
    f1 = jnp.dot(p1, wc_ref[...], preferred_element_type=jnp.float32) + bc_ref[...]
    f1 = jnp.maximum(f1, 0.0)
    # base.C3: 1x1 conv + ReLU
    f2 = jnp.dot(f1.astype(jnp.bfloat16), w3_ref[...],
                 preferred_element_type=jnp.float32) + b3_ref[...]
    f2 = jnp.maximum(f2, 0.0)                                       # (4*(w//4), CF)

    # base.C3 pooling: second 4x4 max-pool -> one dense output row of the /16 map
    h4b = jnp.max(f2.reshape(BAND // 4, w // 4, cf), axis=0)        # (w//4, CF)
    row = jnp.max(h4b.reshape(w // 16, 4, cf), axis=1)              # (w//16, CF)
    o_ref[...] = row.reshape(1, w // 16, cf)


def backbone_forward(x_pix, w1, b1, wc, bc, w3, b3, *, h, w):
    """x_pix: (h*w, Cin) pixel rows (channels on the lane dim)."""
    assert h % 16 == 0 and w % 16 == 0
    hw, cin = x_pix.shape
    cf = w3.shape[1]
    hf, wf = h // 16, w // 16
    kernel = functools.partial(_backbone_kernel, w=w)
    return pl.pallas_call(
        kernel,
        out_shape=jax.ShapeDtypeStruct((hf, wf, cf), jnp.float32),
        grid_spec=pltpu.PrefetchScalarGridSpec(
            num_scalar_prefetch=0,
            grid=(h // BAND,),
            in_specs=[
                pl.BlockSpec((BAND * w, cin), lambda i: (i, 0)),
                pl.BlockSpec(w1.shape, lambda i: (0, 0)),
                pl.BlockSpec(b1.shape, lambda i: (0, 0)),
                pl.BlockSpec(wc.shape, lambda i: (0, 0)),
                pl.BlockSpec(bc.shape, lambda i: (0, 0)),
                pl.BlockSpec(w3.shape, lambda i: (0, 0)),
                pl.BlockSpec(b3.shape, lambda i: (0, 0)),
            ],
            out_specs=pl.BlockSpec((1, wf, cf), lambda i: (i, 0, 0)),
        ),
        compiler_params=pltpu.CompilerParams(dimension_semantics=("parallel",)),
    )(x_pix, w1, b1, wc, bc, w3, b3)


# ----------------------------------------------------------------------------- #
# Fused RoI max-pool (7x7, 1/16) + top MLP + det head.
# ----------------------------------------------------------------------------- #
def _roi_mlp_kernel(rois_ref, feat_ref, w1_ref, b1_ref, w2_ref, b2_ref,
                    w3_ref, b3_ref, out_ref, rf_ref, *,
                    pooled_h, pooled_w, roi_block, n_real):
    hf, wf, cf = feat_ref.shape
    hidden = w2_ref.shape[1]
    feat = feat_ref[...]                               # resident for the whole block
    neg = jnp.finfo(jnp.float32).min
    first = pl.program_id(0) * roi_block

    # iotas shared by every ROI of the block
    ph_i = lax.broadcasted_iota(jnp.int32, (pooled_h, 1), 0).astype(jnp.float32)
    pw_i = lax.broadcasted_iota(jnp.int32, (pooled_w, 1), 0).astype(jnp.float32)
    hi = lax.broadcasted_iota(jnp.int32, (pooled_h, hf), 1)
    wi = lax.broadcasted_iota(jnp.int32, (pooled_w, wf), 1)

    @pl.loop(0, roi_block)
    def _(r):
        g = first + r

        @pl.when(g < n_real)
        def _():
            # ROI corners were pre-rounded to int feature-grid coords in the wrapper.
            x1 = rois_ref[1, g]
            y1 = rois_ref[2, g]
            x2 = rois_ref[3, g]
            y2 = rois_ref[4, g]
            roi_w = jnp.maximum(x2 - x1 + 1, 1)
            roi_h = jnp.maximum(y2 - y1 + 1, 1)
            bin_h = roi_h.astype(jnp.float32) * (1.0 / pooled_h)
            bin_w = roi_w.astype(jnp.float32) * (1.0 / pooled_w)
            hstart = jnp.clip(jnp.floor(ph_i * bin_h).astype(jnp.int32) + y1, 0, hf)
            hend = jnp.clip(jnp.ceil((ph_i + 1.0) * bin_h).astype(jnp.int32) + y1, 0, hf)
            wstart = jnp.clip(jnp.floor(pw_i * bin_w).astype(jnp.int32) + x1, 0, wf)
            wend = jnp.clip(jnp.ceil((pw_i + 1.0) * bin_w).astype(jnp.int32) + x1, 0, wf)
            hmask = (hi >= hstart) & (hi < hend)                       # (ph, hf)
            wmask = (wi >= wstart) & (wi < wend)                       # (pw, wf)
            # two batched mask+max reductions: H bands, then W bins
            bands = jnp.max(jnp.where(hmask[:, :, None, None], feat[None], neg),
                            axis=1)                                    # (ph, wf, cf)
            bins = jnp.max(jnp.where(wmask[None, :, :, None],
                                     bands[:, None, :, :], neg),
                           axis=2)                                     # (ph, pw, cf)
            empty = (hend <= hstart)[:, None, :] | (wend <= wstart)[None, :, :]
            rf_ref[r] = jnp.where(empty, 0.0, bins)   # one dense (7,7,cf) slab / ROI

        @pl.when(g >= n_real)
        def _():
            rf_ref[r] = jnp.zeros((pooled_h, pooled_w, cf), jnp.float32)

    # fc1 factorized over the 49 bins: acc += rf[:, bin] @ W1[bin]  (bf16 MXU, f32 acc)
    # -> avoids any (49, cf) -> (49*cf) sublane->lane relayout of the pooled features.
    acc = jnp.zeros((roi_block, hidden), jnp.float32)
    for ph in range(pooled_h):
        for pw in range(pooled_w):
            blk = rf_ref[:, ph, pw, :].astype(jnp.bfloat16)            # (roi_block, cf)
            acc = acc + jnp.dot(blk, w1_ref[ph, pw],
                                preferred_element_type=jnp.float32)
    h1 = jnp.maximum(acc + b1_ref[...], 0.0)
    h2 = jnp.dot(h1.astype(jnp.bfloat16), w2_ref[...],
                 preferred_element_type=jnp.float32)
    h2 = jnp.maximum(h2 + b2_ref[...], 0.0)
    out_ref[...] = jnp.dot(h2.astype(jnp.bfloat16), w3_ref[...],
                           preferred_element_type=jnp.float32) + b3_ref[...]


def roi_pool_top_det(base_feat, rois_feat, n_real, w1, b1, w2, b2, w3, b3, *,
                     pooled=POOLED, roi_block=ROI_BLOCK):
    """base_feat: (Hf, Wf, CF); rois_feat: (5, Npad) int32; returns (n_real,) logits."""
    hf, wf, cf = base_feat.shape
    n_pad = rois_feat.shape[1]
    assert n_pad % roi_block == 0
    kernel = functools.partial(_roi_mlp_kernel, pooled_h=pooled, pooled_w=pooled,
                               roi_block=roi_block, n_real=n_real)
    out = pl.pallas_call(
        kernel,
        out_shape=jax.ShapeDtypeStruct((n_pad, 128), jnp.float32),
        grid_spec=pltpu.PrefetchScalarGridSpec(
            num_scalar_prefetch=1,                       # int ROI coords -> SMEM
            grid=(n_pad // roi_block,),
            in_specs=[
                pl.BlockSpec((hf, wf, cf), lambda i, r: (0, 0, 0)),
                pl.BlockSpec(w1.shape, lambda i, r: (0, 0, 0, 0)),
                pl.BlockSpec(b1.shape, lambda i, r: (0, 0)),
                pl.BlockSpec(w2.shape, lambda i, r: (0, 0)),
                pl.BlockSpec(b2.shape, lambda i, r: (0, 0)),
                pl.BlockSpec(w3.shape, lambda i, r: (0, 0)),
                pl.BlockSpec(b3.shape, lambda i, r: (0, 0)),
            ],
            out_specs=pl.BlockSpec((roi_block, 128), lambda i, r: (i, 0)),
            scratch_shapes=[
                pltpu.VMEM((roi_block, pooled, pooled, cf), jnp.float32),
            ],
        ),
        compiler_params=pltpu.CompilerParams(dimension_semantics=("parallel",)),
    )(rois_feat, base_feat, w1, b1, w2, b2, w3, b3)
    return out[:n_real, 0]


# ----------------------------------------------------------------------------- #
# Parameters (deterministic synthetic init; mirrors the module's _init_weights)
# ----------------------------------------------------------------------------- #
def init_params(key, *, c_in=3, c1=C1, c_mid=CM, c_feat=CF, hidden=HIDDEN,
                num_classes=NUM_CLASSES, pooled=POOLED):
    ks = jax.random.split(key, 6)
    p = {}
    # TODO(synk): synthetic stand-in for the external pretrained VGG16 base.
    p["c1_w"] = 0.1 * jax.random.normal(ks[0], (c_in, c1), jnp.float32)
    p["c1_b"] = jnp.zeros((1, c1), jnp.float32)
    p["cls_w"] = (0.1 * jax.random.normal(ks[1], (num_classes, c1, c_mid),
                                          jnp.float32)).astype(jnp.bfloat16)
    p["cls_b"] = jnp.zeros((num_classes, 1, c_mid), jnp.float32)
    p["c3_w"] = (0.1 * jax.random.normal(ks[2], (c_mid, c_feat),
                                         jnp.float32)).astype(jnp.bfloat16)
    p["c3_b"] = jnp.zeros((1, c_feat), jnp.float32)
    # top / det: normal(0, 0.01), zero bias.  fc1 is stored (7,7,CF,HIDDEN) ==
    # bin-major/channel-minor (NHWC-flatten) permutation of the reference weight;
    # a real NCHW checkpoint would be permuted once at load (zero runtime cost).
    p["top1_w"] = (0.01 * jax.random.normal(ks[3], (pooled, pooled, c_feat, hidden),
                                            jnp.float32)).astype(jnp.bfloat16)
    p["top1_b"] = jnp.zeros((1, hidden), jnp.float32)
    p["top2_w"] = (0.01 * jax.random.normal(ks[4], (hidden, hidden),
                                            jnp.float32)).astype(jnp.bfloat16)
    p["top2_b"] = jnp.zeros((1, hidden), jnp.float32)
    det_w = 0.01 * jax.random.normal(ks[5], (hidden, 1), jnp.float32)
    # det head padded to 128 output lanes -> lane-dense output block
    p["det_w"] = jnp.pad(det_w, ((0, 0), (0, 127))).astype(jnp.bfloat16)
    p["det_b"] = jnp.zeros((1, 128), jnp.float32)
    return p


# ----------------------------------------------------------------------------- #
# Forward (mirrors DC_VGG16_DET.forward)
# ----------------------------------------------------------------------------- #
def dc_vgg16_det_forward(params, im_data, target_cls, rois, gt_labels=None,
                         roi_block=ROI_BLOCK):
    b, c_in, h, w = im_data.shape
    assert b == 1
    # NCHW -> (H*W, C) pixel rows (channels on the TPU lane dim)
    x_pix = jnp.transpose(im_data, (0, 2, 3, 1)).reshape(h * w, c_in).astype(jnp.float32)

    base_feat = backbone_forward(
        x_pix,
        params["c1_w"], params["c1_b"],
        params["cls_w"][target_cls], params["cls_b"][target_cls],
        params["c3_w"], params["c3_b"],
        h=h, w=w)                                           # (h/16, w/16, CF)

    n = rois.shape[0]
    zero_padded_rois = jnp.concatenate(
        [jnp.zeros((n, 1), jnp.float32), rois.astype(jnp.float32)], axis=1)  # (n, 5)
    # quantize ROI corners to the /16 feature grid (floor(x+0.5) == CUDA round for x>=0)
    rois_q = jnp.floor(zero_padded_rois * SPATIAL_SCALE + 0.5).astype(jnp.int32)
    n_pad = ((n + roi_block - 1) // roi_block) * roi_block
    rois_q = jnp.pad(rois_q, ((0, n_pad - n), (0, 0)))
    rois_q = rois_q.T                                       # (5, Npad): long axis last

    logits = roi_pool_top_det(base_feat, rois_q, n,
                              params["top1_w"], params["top1_b"],
                              params["top2_w"], params["top2_b"],
                              params["det_w"], params["det_b"],
                              roi_block=roi_block)          # (n,)

    if gt_labels is None:
        return jax.nn.sigmoid(logits)                       # F.sigmoid(det_score).view(-1)
    z = logits
    y = gt_labels.astype(jnp.float32)
    # binary_cross_entropy_with_logits, mean reduction
    return jnp.mean(jnp.maximum(z, 0.0) - z * y + jnp.log1p(jnp.exp(-jnp.abs(z))))


# ----------------------------------------------------------------------------- #
if __name__ == "__main__":
    key = jax.random.PRNGKey(0)
    k_params, k_im, k_xy, k_wh = jax.random.split(key, 4)

    params = init_params(k_params)

    # small deterministic inputs
    im_data = jax.random.normal(k_im, (1, 3, 64, 64), jnp.float32)        # NCHW
    n = 100                                                               # -> 2 grid steps
    xy1 = jax.random.uniform(k_xy, (n, 2), jnp.float32, 0.0, 40.0)
    wh = jax.random.uniform(k_wh, (n, 2), jnp.float32, 8.0, 24.0)
    xy2 = jnp.clip(xy1 + wh, 0.0, 63.0)
    rois = jnp.concatenate([xy1[:, 0:1], xy1[:, 1:2],
                            xy2[:, 0:1], xy2[:, 1:2]], axis=1)            # (n, 4)
    target_cls = 2

    scores = dc_vgg16_det_forward(params, im_data, target_cls, rois, gt_labels=None)
    scores = jax.block_until_ready(scores)
    assert scores.shape == (n,)
    assert bool(jnp.all(jnp.isfinite(scores)))
    print("KERNEL_OK")
</pallas_src>

<mosaic_0001>
module attributes {stable_mosaic.version = 11 : i64} {
  func.func @_backbone_kernel(%arg0: i32, %arg1: memref<1024x3xf32, #tpu.memory_space<vmem>>, %arg2: memref<3x128xf32, #tpu.memory_space<vmem>>, %arg3: memref<1x128xf32, #tpu.memory_space<vmem>>, %arg4: memref<128x128xbf16, #tpu.memory_space<vmem>>, %arg5: memref<1x128xf32, #tpu.memory_space<vmem>>, %arg6: memref<128x128xbf16, #tpu.memory_space<vmem>>, %arg7: memref<1x128xf32, #tpu.memory_space<vmem>>, %arg8: memref<1x4x128xf32, #tpu.memory_space<vmem>>) attributes {dimension_semantics = [#tpu.dimension_semantics<parallel>], iteration_bounds = array<i64: 4>, scalar_prefetch = 0 : i64, scratch_operands = 0 : i64, tpu.core_type = #tpu.core_type<tc>, window_params = [{transform_indices = @transform_0, window_bounds = array<i64: 1024, 3>}, {pipeline_mode = #tpu.pipeline_mode<synchronous>, transform_indices = @transform_1, window_bounds = array<i64: 3, 128>}, {pipeline_mode = #tpu.pipeline_mode<synchronous>, transform_indices = @transform_2, window_bounds = array<i64: 1, 128>}, {pipeline_mode = #tpu.pipeline_mode<synchronous>, transform_indices = @transform_3, window_bounds = array<i64: 128, 128>}, {pipeline_mode = #tpu.pipeline_mode<synchronous>, transform_indices = @transform_4, window_bounds = array<i64: 1, 128>}, {pipeline_mode = #tpu.pipeline_mode<synchronous>, transform_indices = @transform_5, window_bounds = array<i64: 128, 128>}, {pipeline_mode = #tpu.pipeline_mode<synchronous>, transform_indices = @transform_6, window_bounds = array<i64: 1, 128>}, {transform_indices = @transform_7, window_bounds = array<i64: 1, 4, 128>}]} {
    %c0 = arith.constant 0 : index
    %c0_0 = arith.constant 0 : index
    %0 = vector.load %arg1[%c0, %c0_0] : memref<1024x3xf32, #tpu.memory_space<vmem>>, vector<1024x3xf32>
    %c0_1 = arith.constant 0 : index
    %c0_2 = arith.constant 0 : index
    %1 = vector.load %arg2[%c0_1, %c0_2] : memref<3x128xf32, #tpu.memory_space<vmem>>, vector<3x128xf32>
    %2 = vector.extract_strided_slice %0 {offsets = [0, 0], sizes = [1024, 1], strides = [1, 1]} : vector<1024x3xf32> to vector<1024x1xf32>
    %3 = vector.extract_strided_slice %1 {offsets = [0, 0], sizes = [1, 128], strides = [1, 1]} : vector<3x128xf32> to vector<1x128xf32>
    %4 = vector.broadcast %2 : vector<1024x1xf32> to vector<1024x128xf32>
    %5 = vector.broadcast %3 : vector<1x128xf32> to vector<1024x128xf32>
    %6 = arith.mulf %4, %5 : vector<1024x128xf32>
    %7 = vector.extract_strided_slice %0 {offsets = [0, 1], sizes = [1024, 1], strides = [1, 1]} : vector<1024x3xf32> to vector<1024x1xf32>
    %8 = vector.extract_strided_slice %1 {offsets = [1, 0], sizes = [1, 128], strides = [1, 1]} : vector<3x128xf32> to vector<1x128xf32>
    %9 = vector.broadcast %7 : vector<1024x1xf32> to vector<1024x128xf32>
    %10 = vector.broadcast %8 : vector<1x128xf32> to vector<1024x128xf32>
    %11 = arith.mulf %9, %10 : vector<1024x128xf32>
    %12 = arith.addf %6, %11 : vector<1024x128xf32>
    %13 = vector.extract_strided_slice %0 {offsets = [0, 2], sizes = [1024, 1], strides = [1, 1]} : vector<1024x3xf32> to vector<1024x1xf32>
    %14 = vector.extract_strided_slice %1 {offsets = [2, 0], sizes = [1, 128], strides = [1, 1]} : vector<3x128xf32> to vector<1x128xf32>
    %15 = vector.broadcast %13 : vector<1024x1xf32> to vector<1024x128xf32>
    %16 = vector.broadcast %14 : vector<1x128xf32> to vector<1024x128xf32>
    %17 = arith.mulf %15, %16 : vector<1024x128xf32>
    %18 = arith.addf %12, %17 : vector<1024x128xf32>
    %c0_3 = arith.constant 0 : index
    %c0_4 = arith.constant 0 : index
    %19 = vector.load %arg3[%c0_3, %c0_4] : memref<1x128xf32, #tpu.memory_space<vmem>>, vector<1x128xf32>
    %20 = vector.broadcast %19 : vector<1x128xf32> to vector<1024x128xf32>
    %21 = arith.addf %18, %20 : vector<1024x128xf32>
    %cst = arith.constant 0.000000e+00 : f32
    %22 = vector.broadcast %cst : f32 to vector<1024x128xf32>
    %23 = arith.maximumf %21, %22 : vector<1024x128xf32>
    %24 = vector.shape_cast %23 : vector<1024x128xf32> to vector<4x4x64x128xf32>
    %cst_5 = arith.constant dense<0xFF800000> : vector<4x64x128xf32>
    %25 = vector.multi_reduction <maximumf>, %24, %cst_5 [1] : vector<4x4x64x128xf32> to vector<4x64x128xf32>
    %26 = vector.shape_cast %25 : vector<4x64x128xf32> to vector<4x16x4x128xf32>
    %cst_6 = arith.constant dense<0xFF800000> : vector<4x16x128xf32>
    %27 = vector.multi_reduction <maximumf>, %26, %cst_6 [2] : vector<4x16x4x128xf32> to vector<4x16x128xf32>
    %28 = vector.shape_cast %27 : vector<4x16x128xf32> to vector<64x128xf32>
    %29 = arith.truncf %28 : vector<64x128xf32> to vector<64x128xbf16>
    %c0_7 = arith.constant 0 : index
    %c0_8 = arith.constant 0 : index
    %30 = vector.load %arg4[%c0_7, %c0_8] : memref<128x128xbf16, #tpu.memory_space<vmem>>, vector<128x128xbf16>
    %cst_9 = arith.constant dense<0.000000e+00> : vector<64x128xf32>
    %31 = tpu.matmul %29, %30, %cst_9 {dimension_numbers = #tpu.dot_dimension_numbers<[1], [0], [0], [1], [0, 0, 1, 1], [], []>} : vector<64x128xbf16>, vector<128x128xbf16>, vector<64x128xf32> -> vector<64x128xf32>
    %c0_10 = arith.constant 0 : index
    %c0_11 = arith.constant 0 : index
    %32 = vector.load %arg5[%c0_10, %c0_11] : memref<1x128xf32, #tpu.memory_space<vmem>>, vector<1x128xf32>
    %33 = vector.broadcast %32 : vector<1x128xf32> to vector<64x128xf32>
    %34 = arith.addf %31, %33 : vector<64x128xf32>
    %cst_12 = arith.constant 0.000000e+00 : f32
    %35 = vector.broadcast %cst_12 : f32 to vector<64x128xf32>
    %36 = arith.maximumf %34, %35 : vector<64x128xf32>
    %37 = arith.truncf %36 : vector<64x128xf32> to vector<64x128xbf16>
    %c0_13 = arith.constant 0 : index
    %c0_14 = arith.constant 0 : index
    %38 = vector.load %arg6[%c0_13, %c0_14] : memref<128x128xbf16, #tpu.memory_space<vmem>>, vector<128x128xbf16>
    %cst_15 = arith.constant dense<0.000000e+00> : vector<64x128xf32>
    %39 = tpu.matmul %37, %38, %cst_15 {dimension_numbers = #tpu.dot_dimension_numbers<[1], [0], [0], [1], [0, 0, 1, 1], [], []>} : vector<64x128xbf16>, vector<128x128xbf16>, vector<64x128xf32> -> vector<64x128xf32>
    %c0_16 = arith.constant 0 : index
    %c0_17 = arith.constant 0 : index
    %40 = vector.load %arg7[%c0_16, %c0_17] : memref<1x128xf32, #tpu.memory_space<vmem>>, vector<1x128xf32>
    %41 = vector.broadcast %40 : vector<1x128xf32> to vector<64x128xf32>
    %42 = arith.addf %39, %41 : vector<64x128xf32>
    %cst_18 = arith.constant 0.000000e+00 : f32
    %43 = vector.broadcast %cst_18 : f32 to vector<64x128xf32>
    %44 = arith.maximumf %42, %43 : vector<64x128xf32>
    %45 = vector.shape_cast %44 : vector<64x128xf32> to vector<4x16x128xf32>
    %cst_19 = arith.constant dense<0xFF800000> : vector<16x128xf32>
    %46 = vector.multi_reduction <maximumf>, %45, %cst_19 [0] : vector<4x16x128xf32> to vector<16x128xf32>
    %47 = vector.shape_cast %46 : vector<16x128xf32> to vector<4x4x128xf32>
    %cst_20 = arith.constant dense<0xFF800000> : vector<4x128xf32>
    %48 = vector.multi_reduction <maximumf>, %47, %cst_20 [1] : vector<4x4x128xf32> to vector<4x128xf32>
    %49 = vector.shape_cast %48 : vector<4x128xf32> to vector<1x4x128xf32>
    %c0_21 = arith.constant 0 : index
    %c0_22 = arith.constant 0 : index
    %c0_23 = arith.constant 0 : index
    %50 = vector.load %arg8[%c0_21, %c0_22, %c0_23] : memref<1x4x128xf32, #tpu.memory_space<vmem>>, vector<1x4x128xf32>
    tpu.vector_store %arg8[%c0_21, %c0_22, %c0_23], %49 {strides = array<i32>} : memref<1x4x128xf32, #tpu.memory_space<vmem>>, vector<1x4x128xf32>,
    return
  }
  func.func @transform_0(%arg0: i32) -> (i32, i32) {
    %c0_i32 = arith.constant 0 : i32
    %c0_i32_0 = arith.constant 0 : i32
    return %arg0, %c0_i32 : i32, i32
  }
  func.func @transform_1(%arg0: i32) -> (i32, i32) {
    %c0_i32 = arith.constant 0 : i32
    %c0_i32_0 = arith.constant 0 : i32
    %c0_i32_1 = arith.constant 0 : i32
    return %c0_i32, %c0_i32_0 : i32, i32
  }
  func.func @transform_2(%arg0: i32) -> (i32, i32) {
    %c0_i32 = arith.constant 0 : i32
    %c0_i32_0 = arith.constant 0 : i32
    %c0_i32_1 = arith.constant 0 : i32
    return %c0_i32, %c0_i32_0 : i32, i32
  }
  func.func @transform_3(%arg0: i32) -> (i32, i32) {
    %c0_i32 = arith.constant 0 : i32
    %c0_i32_0 = arith.constant 0 : i32
    %c0_i32_1 = arith.constant 0 : i32
    return %c0_i32, %c0_i32_0 : i32, i32
  }
  func.func @transform_4(%arg0: i32) -> (i32, i32) {
    %c0_i32 = arith.constant 0 : i32
    %c0_i32_0 = arith.constant 0 : i32
    %c0_i32_1 = arith.constant 0 : i32
    return %c0_i32, %c0_i32_0 : i32, i32
  }
  func.func @transform_5(%arg0: i32) -> (i32, i32) {
    %c0_i32 = arith.constant 0 : i32
    %c0_i32_0 = arith.constant 0 : i32
    %c0_i32_1 = arith.constant 0 : i32
    return %c0_i32, %c0_i32_0 : i32, i32
  }
  func.func @transform_6(%arg0: i32) -> (i32, i32) {
    %c0_i32 = arith.constant 0 : i32
    %c0_i32_0 = arith.constant 0 : i32
    %c0_i32_1 = arith.constant 0 : i32
    return %c0_i32, %c0_i32_0 : i32, i32
  }
  func.func @transform_7(%arg0: i32) -> (i32, i32, i32) {
    %c0_i32 = arith.constant 0 : i32
    %c0_i32_0 = arith.constant 0 : i32
    %c0_i32_1 = arith.constant 0 : i32
    return %arg0, %c0_i32, %c0_i32_0 : i32, i32, i32
  }
}

</mosaic_0001>

<bundles_post_ra>
// kernel: tpu_custom_call.1
= control target key start
LH: loop header
LB: loop body
LE: loop exit
PB: predicated region body
PF: predicated region fallthrough
CT: control target
= control target key end

     0   :  { %12 = vsyncpa [#allocation3], 0  ;;  %s8477_s0 = inlined_call_operand.vmem [shape: f32[4096,3], index: 0, kind: input, shape index: {}]   ;;  %s8478_s1 = inlined_call_operand.vmem [shape: f32[3,128], index: 1, kind: input, shape index: {}]   ;;  %s8479_s2 = inlined_call_operand.vmem [shape: f32[1,128], index: 2, kind: input, shape index: {}]   ;;  %s8480_s3 = inlined_call_operand.vmem [shape: bf16[128,128], index: 3, kind: input, shape index: {}]   ;;  %s8481_s4 = inlined_call_operand.vmem [shape: f32[1,128], index: 4, kind: input, shape index: {}]   ;;  %s8482_s5 = inlined_call_operand.vmem [shape: bf16[128,128], index: 5, kind: input, shape index: {}]   ;;  %s8483_s6 = inlined_call_operand.vmem [shape: f32[1,128], index: 6, kind: input, shape index: {}]   ;;  %s8484_s7 = inlined_call_operand.hbm [shape: f32[4,4,128], index: 7, kind: output, shape index: {}]  }
   0x1   :  { %14 = vsyncpa [#allocation3 + $0x1], 0  ;;  %s4713_s24 = smov 0   ;;  %s4715_s25 = smov 0  }
   0x2   :  { %s4717_s26 = smov 0   ;;  %s4719_s27 = smov 0  }
   0x3 LB: > { %s4734_s28 = sadd.s32 4294967295, %s4667_s27   ;;  %s4306_s29 = sadd.s32 4294967294, %s4667_s27   ;;  %s4667_s27 = sphi %s4719_s27, %s9541_s27   ;;  %s4663_s26 = sphi %s4717_s26, %s9540_s26   ;;  %s4659_s25 = sphi %s4715_s25, %s9539_s25   ;;  %s4655_s24 = sphi %s4713_s24, %s9538_s24  }
   0x4   : > { %s4738_s30 = sadd.s32 1, %s4667_s27   ;;  %s179_s8 = sadd.s32 1, %s4663_s26 }
   0x5   : > { %s176_s9 = ssub.s32 %s4667_s27, %s4738_s30  ;;  %p189_p0 = scmp.ne.s32.totalorder %s4663_s26, %s4659_s25 }
   0x6   : > { %p177_p1 = scmp.eq.s32.totalorder %s176_s9, 0  ;;  %p190_p2 = scmp.eq.s32.totalorder %s4734_s28, 3 }
   0x7   : > { %p195_p3 = scmp.ne.s32.totalorder %s4659_s25, %s4655_s24  ;;  %p196_p4 = scmp.eq.s32.totalorder %s4306_s29, 3 }
   0x8   : > { %s4749_s10 = scalar_select %p177_p1, %s4663_s26, %s179_s8  }
   0x9   : > { %p4751_p5 = por %p190_p2, %p189_p0  ;;  %p4755_p6 = por %p196_p4, %p195_p3 }
   0xa   : > { %p4309_p7 = scmp.ge.s32.totalorder %s4667_s27, 1  ;;  %p241_p8 = scmp.lt.s32.totalorder %s4667_s27, 5 }
   0xc   : > { %p242_p9 = pnand %p4309_p7, %p241_p8 }
   0xe   : > { %245 = sbr.rel (%p242_p9) target bundleno = 1503 (0x5df), region = 48 }
  0x13   : > { %s4311_s13 = sshll.u32 %s4734_s28, 7  ;;  %v4669_v0 = vmov 0   ;;  %vm3180_vm0 = vcmask 1043456   ;;  %vm3844_vm1 = vcmask 1041409   ;;  %vm3846_vm2 = vcmask 1042434   ;;  %s270_s21 = sand.u32 1, %s4659_s25  }
  0x14   : > { %4451 = vset.pattern.permute.xlu1 %v4669_v0  ;;  %4450 = vset.pattern.permute.xlu0 %v4669_v0  ;;  %p274_p10 = scmp.lt.s32.totalorder %s4311_s13, 511  ;;  %vm3848_vm3 = vcmask 1043459   ;;  %vm3850_vm4 = vcmask 1044484   ;;  %vm3852_vm5 = vcmask 1045509   ;;  %vm3854_vm6 = vcmask 1046534   ;;  %s4310_s22 = sshll.u32 %s270_s21, 2 }
  0x15   : > { %vm3856_vm7 = vcmask 1047559   ;;  %s4333_s23 = sshll.u32 %s4734_s28, 6  ;;  %s272_s29 = scalar_lea.vmem [#allocation2], %s4310_s22 }
  0x16   : > { %s9543_s13 = smov (!%p274_p10, %s4311_s13), 511  ;;  %s4247_s8 = sshll.u32 %s272_s29, 4  ;;  %s4248_s8 = int_to_ptr.vmem [resolvable:$true] %s4247_s8 }
  0x17   : > { %s4312_s14 = sshll.u32 %s9543_s13, 3  ;;  %s8441_s13 = scalar_lea.hbm %s8484_s7, %s4333_s23 }
  0x18   : > { %s4765_s17 = scalar_lea.vmem %s8477_s0, %s4312_s14  ;;  %s4234_s14 = scalar_lea.sflag [#allocation3], %s270_s21 }
  0x19   : > { %v4768_v1 = vld [vmem:[%s4765_s17 + $0x10] sm:$0xff]  ;;  %v4771_v2 = vld [vmem:[%s4765_s17] sm:$0xff]  ;;  %v4776_v3 = vld [vmem:[%s4765_s17 + $0x18] sm:$0xff]  ;;  %s4607_s15 = scalar_lea.vmem %s4248_s8, 64  ;;  %s4672_s28 = smov [#allocation2]  }
  0x1a   : > { %421 = vperm.xlu1 %4451, %v4768_v1   ;;  %411 = vperm.xlu0 %4450, %v4771_v2   ;;  %v4779_v4 = vld [vmem:[%s4765_s17 + $0x8] sm:$0xff]  ;;  %v4787_v6 = vld [vmem:[%s4765_s17 + $0x20] sm:$0xff]  ;;  %v4792_v7 = vld [vmem:[%s4765_s17 + $0x38] sm:$0xff]  ;;  %p4608_p11 = scmp.ne.s32.totalorder %s4248_s8, %s4607_s15  ;;  %s4611_s16 = sshll.u32 %s4672_s28, 4  ;;  %s4612_s16 = int_to_ptr.vmem [resolvable:$false] %s4611_s16 }
  0x1b   : > { %v4784_v5 = vld [vmem:[%s4765_s17 + $0x28] sm:$0xff]  ;;  %v4795_v8 = vld [vmem:[%s4765_s17 + $0x30] sm:$0xff]  ;;  %v4803_v10 = vld [vmem:[%s4765_s17 + $0x40] sm:$0xff]  ;;  %s4613_s18 = scalar_lea.vmem %s4612_s16, 128  ;;  %p4614_p0 = scmp.lt.s32.totalorder %s4248_s8, %s4612_s16 }
  0x1c   : > { %v4800_v9 = vld [vmem:[%s4765_s17 + $0x48] sm:$0xff]  ;;  %v4808_v11 = vld [vmem:[%s4765_s17 + $0x58] sm:$0xff]  ;;  %v4811_v12 = vld [vmem:[%s4765_s17 + $0x50] sm:$0xff]  ;;  %p4609_p12 = pnand %p4608_p11, %p4751_p5  ;;  %p4615_p1 = scmp.lt.s32.totalorder %s4613_s18, %s4607_s15 }
  0x1d   : > { %v4816_v13 = vld [vmem:[%s4765_s17 + $0x68] sm:$0xff]  ;;  %v4819_v14 = vld [vmem:[%s4765_s17 + $0x60] sm:$0xff]  ;;  %v4824_v15 = vld [vmem:[%s4765_s17 + $0x78] sm:$0xff] }
  0x1e   : > { %426 = vperm.xlu1 %4451, %v4776_v3   ;;  %416 = vperm.xlu0 %4450, %v4779_v4   ;;  %v4827_v16 = vld [vmem:[%s4765_s17 + $0x70] sm:$0xff]  ;;  %v4830_v17 = vld [vmem:[%s4765_s17 + $0x88] sm:$0xff]  ;;  %v4833_v18 = vld [vmem:[%s4765_s17 + $0x80] sm:$0xff]  ;;  %p4610_p13 = pneg %p4609_p12  ;;  %p4616_p2 = por %p4615_p1, %p4614_p0 }
  0x1f   : > { %v4840_v19 = vld [vmem:[%s4765_s17 + $0x98] sm:$0xff]  ;;  %v4843_v20 = vld [vmem:[%s4765_s17 + $0x90] sm:$0xff]  ;;  %v4848_v21 = vld [vmem:[%s4765_s17 + $0xa8] sm:$0xff] }
  0x20   : > { %v4851_v22 = vld [vmem:[%s4765_s17 + $0xa0] sm:$0xff]  ;;  %v4856_v23 = vld [vmem:[%s4765_s17 + $0xb8] sm:$0xff]  ;;  %v4859_v24 = vld [vmem:[%s4765_s17 + $0xb0] sm:$0xff]  ;;  %p4617_p3 = pnand %p4616_p2, %p4610_p13 }
  0x21   : > { %v4864_v25 = vld [vmem:[%s4765_s17 + $0xc8] sm:$0xff]  ;;  %v4867_v26 = vld [vmem:[%s4765_s17 + $0xc0] sm:$0xff]  ;;  %v4872_v27 = vld [vmem:[%s4765_s17 + $0xd8] sm:$0xff] }
  0x22   : > { %436 = vperm.xlu1 %4451, %v4784_v5   ;;  %431 = vperm.xlu0 %4450, %v4787_v6   ;;  %v4875_v28 = vld [vmem:[%s4765_s17 + $0xd0] sm:$0xff]  ;;  %v4880_v29 = vld [vmem:[%s4765_s17 + $0xe8] sm:$0xff]  ;;  %v4883_v30 = vld [vmem:[%s4765_s17 + $0xe0] sm:$0xff] }
  0x23   : > { %v4888_v31 = vld [vmem:[%s4765_s17 + $0xf8] sm:$0xff]  ;;  %v4891_v32 = vld [vmem:[%s4765_s17 + $0xf0] sm:$0xff]  ;;  %v4896_v33 = vld [vmem:[%s4765_s17 + $0x108] sm:$0xff] }
  0x24   : > { %v4899_v34 = vld [vmem:[%s4765_s17 + $0x100] sm:$0xff]  ;;  %v4904_v35 = vld [vmem:[%s4765_s17 + $0x118] sm:$0xff]  ;;  %v4907_v36 = vld [vmem:[%s4765_s17 + $0x110] sm:$0xff] }
  0x25   : > { %v4912_v37 = vld [vmem:[%s4765_s17 + $0x128] sm:$0xff]  ;;  %v4915_v38 = vld [vmem:[%s4765_s17 + $0x120] sm:$0xff]  ;;  %v4920_v39 = vld [vmem:[%s4765_s17 + $0x138] sm:$0xff] }
  0x26   : > { %446 = vperm.xlu1 %4451, %v4792_v7   ;;  %441 = vperm.xlu0 %4450, %v4795_v8   ;;  %v4923_v40 = vld [vmem:[%s4765_s17 + $0x130] sm:$0xff]  ;;  %v4928_v41 = vld [vmem:[%s4765_s17 + $0x148] sm:$0xff]  ;;  %v4931_v42 = vld [vmem:[%s4765_s17 + $0x140] sm:$0xff] }
  0x27   : > { %v4936_v43 = vld [vmem:[%s4765_s17 + $0x158] sm:$0xff]  ;;  %v4939_v44 = vld [vmem:[%s4765_s17 + $0x150] sm:$0xff]  ;;  %v4944_v45 = vld [vmem:[%s4765_s17 + $0x168] sm:$0xff] }
  0x28   : > { %v4947_v46 = vld [vmem:[%s4765_s17 + $0x160] sm:$0xff]  ;;  %v4952_v47 = vld [vmem:[%s4765_s17 + $0x178] sm:$0xff]  ;;  %v4955_v48 = vld [vmem:[%s4765_s17 + $0x170] sm:$0xff] }
  0x29   : > { %v4960_v49 = vld [vmem:[%s4765_s17 + $0x188] sm:$0xff]  ;;  %v4963_v50 = vld [vmem:[%s4765_s17 + $0x180] sm:$0xff]  ;;  %v4968_v51 = vld [vmem:[%s4765_s17 + $0x198] sm:$0xff] }
  0x2a   : > { %456 = vperm.xlu1 %4451, %v4800_v9   ;;  %451 = vperm.xlu0 %4450, %v4803_v10   ;;  %v4971_v52 = vld [vmem:[%s4765_s17 + $0x190] sm:$0xff]  ;;  %v4976_v53 = vld [vmem:[%s4765_s17 + $0x1a8] sm:$0xff]  ;;  %v4979_v54 = vld [vmem:[%s4765_s17 + $0x1a0] sm:$0xff] }
  0x2b   : > { %8568 = vst [vmem:[#allocation5_spill] sm:$0xff] %v4976_v53  ;;  %8569 = vst [vmem:[#allocation6_spill] sm:$0xff] %v4979_v54  ;;  %v4984_v55 = vld [vmem:[%s4765_s17 + $0x1b8] sm:$0xff]  ;;  %v4987_v56 = vld [vmem:[%s4765_s17 + $0x1b0] sm:$0xff] }
  0x2c   : > { %8570 = vst [vmem:[#allocation7_spill] sm:$0xff] %v4984_v55  ;;  %8571 = vst [vmem:[#allocation8_spill] sm:$0xff] %v4987_v56  ;;  %v4992_v57 = vld [vmem:[%s4765_s17 + $0x1c8] sm:$0xff]  ;;  %v4995_v58 = vld [vmem:[%s4765_s17 + $0x1c0] sm:$0xff] }
  0x2d   : > { %8572 = vst [vmem:[#allocation9_spill] sm:$0xff] %v4992_v57  ;;  %8573 = vst [vmem:[#allocation10_spill] sm:$0xff] %v4995_v58  ;;  %v5000_v59 = vld [vmem:[%s4765_s17 + $0x1d8] sm:$0xff]  ;;  %v5003_v60 = vld [vmem:[%s4765_s17 + $0x1d0] sm:$0xff] }
  0x2e   : > { %466 = vperm.xlu1 %4451, %v4808_v11   ;;  %461 = vperm.xlu0 %4450, %v4811_v12   ;;  %8574 = vst [vmem:[#allocation11_spill] sm:$0xff] %v5000_v59  ;;  %8575 = vst [vmem:[#allocation12_spill] sm:$0xff] %v5003_v60  ;;  %v5008_v61 = vld [vmem:[%s4765_s17 + $0x1e8] sm:$0xff]  ;;  %v5011_v62 = vld [vmem:[%s4765_s17 + $0x1e0] sm:$0xff] }
  0x2f   : > { %8576 = vst [vmem:[#allocation13_spill] sm:$0xff] %v5008_v61  ;;  %8577 = vst [vmem:[#allocation14_spill] sm:$0xff] %v5011_v62  ;;  %v5016_v63 = vld [vmem:[%s4765_s17 + $0x1f8] sm:$0xff]  ;;  %v5019_v0 = vld [vmem:[%s4765_s17 + $0x1f0] sm:$0xff] }
  0x30   : > { %8578 = vst [vmem:[#allocation15_spill] sm:$0xff] %v5016_v63  ;;  %8579 = vst [vmem:[#allocation16_spill] sm:$0xff] %v5019_v0 }
  0x32   : > { %476 = vperm.xlu1 %4451, %v4816_v13   ;;  %471 = vperm.xlu0 %4450, %v4819_v14  }
  0x36   : > { %486 = vperm.xlu1 %4451, %v4824_v15   ;;  %481 = vperm.xlu0 %4450, %v4827_v16  }
  0x3a   : > { %496 = vperm.xlu1 %4451, %v4830_v17   ;;  %491 = vperm.xlu0 %4450, %v4833_v18  }
  0x3e   : > { %506 = vperm.xlu1 %4451, %v4840_v19   ;;  %501 = vperm.xlu0 %4450, %v4843_v20  }
  0x42   : > { %516 = vperm.xlu1 %4451, %v4848_v21   ;;  %511 = vperm.xlu0 %4450, %v4851_v22  }
  0x46   : > { %526 = vperm.xlu1 %4451, %v4856_v23   ;;  %521 = vperm.xlu0 %4450, %v4859_v24  }
  0x4a   : > { %536 = vperm.xlu1 %4451, %v4864_v25   ;;  %531 = vperm.xlu0 %4450, %v4867_v26  }
  0x4e   : > { %546 = vperm.xlu1 %4451, %v4872_v27   ;;  %541 = vperm.xlu0 %4450, %v4875_v28  }
  0x52   : > { %556 = vperm.xlu1 %4451, %v4880_v29   ;;  %551 = vperm.xlu0 %4450, %v4883_v30  }
  0x56   : > { %566 = vperm.xlu1 %4451, %v4888_v31   ;;  %561 = vperm.xlu0 %4450, %v4891_v32  }
  0x5a   : > { %576 = vperm.xlu1 %4451, %v4896_v33   ;;  %571 = vperm.xlu0 %4450, %v4899_v34  }
  0x5e   : > { %586 = vperm.xlu1 %4451, %v4904_v35   ;;  %581 = vperm.xlu0 %4450, %v4907_v36  }
  0x62   : > { %596 = vperm.xlu1 %4451, %v4912_v37   ;;  %591 = vperm.xlu0 %4450, %v4915_v38  }
  0x66   : > { %606 = vperm.xlu1 %4451, %v4920_v39   ;;  %601 = vperm.xlu0 %4450, %v4923_v40  }
  0x6a   : > { %616 = vperm.xlu1 %4451, %v4928_v41   ;;  %611 = vperm.xlu0 %4450, %v4931_v42  }
  0x6e   : > { %626 = vperm.xlu1 %4451, %v4936_v43   ;;  %621 = vperm.xlu0 %4450, %v4939_v44  }
  0x72   : > { %636 = vperm.xlu1 %4451, %v4944_v45   ;;  %631 = vperm.xlu0 %4450, %v4947_v46  }
  0x76   : > { %646 = vperm.xlu1 %4451, %v4952_v47   ;;  %641 = vperm.xlu0 %4450, %v4955_v48  }
  0x7a   : > { %656 = vperm.xlu1 %4451, %v4960_v49   ;;  %651 = vperm.xlu0 %4450, %v4963_v50  }
  0x7e   : > { %666 = vperm.xlu1 %4451, %v4968_v51   ;;  %661 = vperm.xlu0 %4450, %v4971_v52  }
  0x82   : > { %676 = vperm.xlu1 %4451, %v4976_v53   ;;  %671 = vperm.xlu0 %4450, %v4979_v54  }
  0x86   : > { %686 = vperm.xlu1 %4451, %v4984_v55   ;;  %681 = vperm.xlu0 %4450, %v4987_v56   ;;  %v404_v55 = vld [vmem:[%s4765_s17 + $0x3e0] sm:$0xff] }
  0x8a   : > { %696 = vperm.xlu1 %4451, %v4992_v57   ;;  %691 = vperm.xlu0 %4450, %v4995_v58   ;;  %v5031_v58 = vld [vmem:[%s4765_s17 + $0x200] sm:$0xff] }
  0x8b   : > { %8583 = vst [vmem:[#allocation20_spill] sm:$0xff] %v5031_v58 }
  0x8e   : > { %706 = vperm.xlu1 %4451, %v5000_v59   ;;  %701 = vperm.xlu0 %4450, %v5003_v60   ;;  %v5028_v60 = vld [vmem:[%s4765_s17 + $0x208] sm:$0xff] }
  0x8f   : > { %8582 = vst [vmem:[#allocation19_spill] sm:$0xff] %v5028_v60 }
  0x92   : > { %716 = vperm.xlu1 %4451, %v5008_v61   ;;  %711 = vperm.xlu0 %4450, %v5011_v62  }
  0x95   : > { %v5021_v57 = vpop.permute.xlu1 %421  ;;  %v5023_v59 = vpop.permute.xlu0 %411 }
  0x96   : > { %8580 = vst [vmem:[#allocation17_spill] sm:$0xff] %v5021_v57  ;;  %8581 = vst [vmem:[#allocation18_spill] sm:$0xff] %v5023_v59  ;;  %726 = vperm.xlu1 %4451, %v5016_v63   ;;  %721 = vperm.xlu0 %4450, %v5019_v0   ;;  %v5040_v59 = vld [vmem:[%s4765_s17 + $0x218] sm:$0xff]  ;;  %v5043_v57 = vld [vmem:[%s4765_s17 + $0x210] sm:$0xff] }
  0x97   : > { %8586 = vst [vmem:[#allocation23_spill] sm:$0xff] %v5040_v59  ;;  %8587 = vst [vmem:[#allocation24_spill] sm:$0xff] %v5043_v57 }
  0x99   : > { %v5033_v61 = vpop.permute.xlu1 %426  ;;  %v5035_v62 = vpop.permute.xlu0 %416 }
  0x9a   : > { %8584 = vst [vmem:[#allocation21_spill] sm:$0xff] %v5033_v61  ;;  %8585 = vst [vmem:[#allocation22_spill] sm:$0xff] %v5035_v62  ;;  %736 = vperm.xlu1 %4451, %v5028_v60   ;;  %731 = vperm.xlu0 %4450, %v5031_v58   ;;  %v5052_v62 = vld [vmem:[%s4765_s17 + $0x228] sm:$0xff]  ;;  %v5055_v61 = vld [vmem:[%s4765_s17 + $0x220] sm:$0xff] }
  0x9b   : > { %8590 = vst [vmem:[#allocation27_spill] sm:$0xff] %v5052_v62  ;;  %8591 = vst [vmem:[#allocation28_spill] sm:$0xff] %v5055_v61 }
  0x9d   : > { %v5045_v63 = vpop.permute.xlu1 %436  ;;  %v5047_v0 = vpop.permute.xlu0 %431 }
  0x9e   : > { %8588 = vst [vmem:[#allocation25_spill] sm:$0xff] %v5045_v63  ;;  %8589 = vst [vmem:[#allocation26_spill] sm:$0xff] %v5047_v0  ;;  %746 = vperm.xlu1 %4451, %v5040_v59   ;;  %741 = vperm.xlu0 %4450, %v5043_v57   ;;  %v5064_v0 = vld [vmem:[%s4765_s17 + $0x238] sm:$0xff]  ;;  %v5067_v63 = vld [vmem:[%s4765_s17 + $0x230] sm:$0xff] }
  0x9f   : > { %8594 = vst [vmem:[#allocation31_spill] sm:$0xff] %v5064_v0  ;;  %8595 = vst [vmem:[#allocation32_spill] sm:$0xff] %v5067_v63 }
  0xa1   : > { %v5057_v60 = vpop.permute.xlu1 %446  ;;  %v5059_v58 = vpop.permute.xlu0 %441 }
  0xa2   : > { %8592 = vst [vmem:[#allocation29_spill] sm:$0xff] %v5057_v60  ;;  %8593 = vst [vmem:[#allocation30_spill] sm:$0xff] %v5059_v58  ;;  %756 = vperm.xlu1 %4451, %v5052_v62   ;;  %751 = vperm.xlu0 %4450, %v5055_v61   ;;  %v5076_v58 = vld [vmem:[%s4765_s17 + $0x248] sm:$0xff]  ;;  %v5079_v60 = vld [vmem:[%s4765_s17 + $0x240] sm:$0xff] }
  0xa3   : > { %8598 = vst [vmem:[#allocation35_spill] sm:$0xff] %v5076_v58  ;;  %8599 = vst [vmem:[#allocation36_spill] sm:$0xff] %v5079_v60 }
  0xa5   : > { %v5069_v59 = vpop.permute.xlu1 %456  ;;  %v5071_v57 = vpop.permute.xlu0 %451 }
  0xa6   : > { %8596 = vst [vmem:[#allocation33_spill] sm:$0xff] %v5069_v59  ;;  %8597 = vst [vmem:[#allocation34_spill] sm:$0xff] %v5071_v57  ;;  %766 = vperm.xlu1 %4451, %v5064_v0   ;;  %761 = vperm.xlu0 %4450, %v5067_v63   ;;  %v5088_v57 = vld [vmem:[%s4765_s17 + $0x258] sm:$0xff]  ;;  %v5091_v59 = vld [vmem:[%s4765_s17 + $0x250] sm:$0xff] }
  0xa7   : > { %8602 = vst [vmem:[#allocation39_spill] sm:$0xff] %v5088_v57  ;;  %8603 = vst [vmem:[#allocation40_spill] sm:$0xff] %v5091_v59 }
  0xa9   : > { %v5081_v62 = vpop.permute.xlu1 %466  ;;  %v5083_v61 = vpop.permute.xlu0 %461 }
  0xaa   : > { %8600 = vst [vmem:[#allocation37_spill] sm:$0xff] %v5081_v62  ;;  %8601 = vst [vmem:[#allocation38_spill] sm:$0xff] %v5083_v61  ;;  %776 = vperm.xlu1 %4451, %v5076_v58   ;;  %771 = vperm.xlu0 %4450, %v5079_v60   ;;  %v5100_v61 = vld [vmem:[%s4765_s17 + $0x268] sm:$0xff]  ;;  %v5103_v62 = vld [vmem:[%s4765_s17 + $0x260] sm:$0xff] }
  0xab   : > { %8606 = vst [vmem:[#allocation43_spill] sm:$0xff] %v5100_v61  ;;  %8607 = vst [vmem:[#allocation44_spill] sm:$0xff] %v5103_v62 }
  0xad   : > { %v5093_v0 = vpop.permute.xlu1 %476  ;;  %v5095_v63 = vpop.permute.xlu0 %471 }
  0xae   : > { %8604 = vst [vmem:[#allocation41_spill] sm:$0xff] %v5093_v0  ;;  %8605 = vst [vmem:[#allocation42_spill] sm:$0xff] %v5095_v63  ;;  %786 = vperm.xlu1 %4451, %v5088_v57   ;;  %781 = vperm.xlu0 %4450, %v5091_v59   ;;  %v5112_v63 = vld [vmem:[%s4765_s17 + $0x278] sm:$0xff]  ;;  %v5115_v0 = vld [vmem:[%s4765_s17 + $0x270] sm:$0xff] }
  0xaf   : > { %8610 = vst [vmem:[#allocation47_spill] sm:$0xff] %v5112_v63  ;;  %8611 = vst [vmem:[#allocation48_spill] sm:$0xff] %v5115_v0 }
  0xb1   : > { %v5105_v58 = vpop.permute.xlu1 %486  ;;  %v5107_v60 = vpop.permute.xlu0 %481 }
  0xb2   : > { %8608 = vst [vmem:[#allocation45_spill] sm:$0xff] %v5105_v58  ;;  %8609 = vst [vmem:[#allocation46_spill] sm:$0xff] %v5107_v60  ;;  %796 = vperm.xlu1 %4451, %v5100_v61   ;;  %791 = vperm.xlu0 %4450, %v5103_v62   ;;  %v5124_v60 = vld [vmem:[%s4765_s17 + $0x288] sm:$0xff]  ;;  %v5127_v58 = vld [vmem:[%s4765_s17 + $0x280] sm:$0xff] }
  0xb3   : > { %8614 = vst [vmem:[#allocation51_spill] sm:$0xff] %v5124_v60  ;;  %8615 = vst [vmem:[#allocation52_spill] sm:$0xff] %v5127_v58 }
  0xb5   : > { %v5117_v57 = vpop.permute.xlu1 %496  ;;  %v5119_v59 = vpop.permute.xlu0 %491 }
  0xb6   : > { %8612 = vst [vmem:[#allocation49_spill] sm:$0xff] %v5117_v57  ;;  %8613 = vst [vmem:[#allocation50_spill] sm:$0xff] %v5119_v59  ;;  %806 = vperm.xlu1 %4451, %v5112_v63   ;;  %801 = vperm.xlu0 %4450, %v5115_v0   ;;  %v5136_v59 = vld [vmem:[%s4765_s17 + $0x298] sm:$0xff]  ;;  %v5139_v57 = vld [vmem:[%s4765_s17 + $0x290] sm:$0xff] }
  0xb7   : > { %8618 = vst [vmem:[#allocation55_spill] sm:$0xff] %v5136_v59  ;;  %8619 = vst [vmem:[#allocation56_spill] sm:$0xff] %v5139_v57 }
  0xb9   : > { %v5129_v61 = vpop.permute.xlu1 %506  ;;  %v5131_v62 = vpop.permute.xlu0 %501 }
  0xba   : > { %8616 = vst [vmem:[#allocation53_spill] sm:$0xff] %v5129_v61  ;;  %8617 = vst [vmem:[#allocation54_spill] sm:$0xff] %v5131_v62  ;;  %816 = vperm.xlu1 %4451, %v5124_v60   ;;  %811 = vperm.xlu0 %4450, %v5127_v58   ;;  %v5148_v62 = vld [vmem:[%s4765_s17 + $0x2a8] sm:$0xff]  ;;  %v5151_v61 = vld [vmem:[%s4765_s17 + $0x2a0] sm:$0xff] }
  0xbb   : > { %8622 = vst [vmem:[#allocation59_spill] sm:$0xff] %v5148_v62  ;;  %8623 = vst [vmem:[#allocation60_spill] sm:$0xff] %v5151_v61 }
  0xbd   : > { %v5141_v63 = vpop.permute.xlu1 %516  ;;  %v5143_v0 = vpop.permute.xlu0 %511 }
  0xbe   : > { %8620 = vst [vmem:[#allocation57_spill] sm:$0xff] %v5141_v63  ;;  %8621 = vst [vmem:[#allocation58_spill] sm:$0xff] %v5143_v0  ;;  %826 = vperm.xlu1 %4451, %v5136_v59   ;;  %821 = vperm.xlu0 %4450, %v5139_v57   ;;  %v5160_v0 = vld [vmem:[%s4765_s17 + $0x2b8] sm:$0xff]  ;;  %v5163_v63 = vld [vmem:[%s4765_s17 + $0x2b0] sm:$0xff] }
  0xbf   : > { %8626 = vst [vmem:[#allocation63_spill] sm:$0xff] %v5160_v0  ;;  %8627 = vst [vmem:[#allocation64_spill] sm:$0xff] %v5163_v63 }
  0xc1   : > { %v5153_v60 = vpop.permute.xlu1 %526  ;;  %v5155_v58 = vpop.permute.xlu0 %521 }
  0xc2   : > { %8624 = vst [vmem:[#allocation61_spill] sm:$0xff] %v5153_v60  ;;  %8625 = vst [vmem:[#allocation62_spill] sm:$0xff] %v5155_v58  ;;  %836 = vperm.xlu1 %4451, %v5148_v62   ;;  %831 = vperm.xlu0 %4450, %v5151_v61   ;;  %v5172_v58 = vld [vmem:[%s4765_s17 + $0x2c8] sm:$0xff]  ;;  %v5175_v60 = vld [vmem:[%s4765_s17 + $0x2c0] sm:$0xff] }
  0xc3   : > { %8630 = vst [vmem:[#allocation67_spill] sm:$0xff] %v5172_v58  ;;  %8631 = vst [vmem:[#allocation68_spill] sm:$0xff] %v5175_v60 }
  0xc5   : > { %v5165_v59 = vpop.permute.xlu1 %536  ;;  %v5167_v57 = vpop.permute.xlu0 %531 }
  0xc6   : > { %8628 = vst [vmem:[#allocation65_spill] sm:$0xff] %v5165_v59  ;;  %8629 = vst [vmem:[#allocation66_spill] sm:$0xff] %v5167_v57  ;;  %846 = vperm.xlu1 %4451, %v5160_v0   ;;  %841 = vperm.xlu0 %4450, %v5163_v63   ;;  %v5184_v57 = vld [vmem:[%s4765_s17 + $0x2d8] sm:$0xff]  ;;  %v5187_v59 = vld [vmem:[%s4765_s17 + $0x2d0] sm:$0xff] }
  0xc7   : > { %8634 = vst [vmem:[#allocation71_spill] sm:$0xff] %v5184_v57  ;;  %8635 = vst [vmem:[#allocation72_spill] sm:$0xff] %v5187_v59 }
  0xc9   : > { %v5177_v62 = vpop.permute.xlu1 %546  ;;  %v5179_v61 = vpop.permute.xlu0 %541 }
  0xca   : > { %8632 = vst [vmem:[#allocation69_spill] sm:$0xff] %v5177_v62  ;;  %8633 = vst [vmem:[#allocation70_spill] sm:$0xff] %v5179_v61  ;;  %856 = vperm.xlu1 %4451, %v5172_v58   ;;  %851 = vperm.xlu0 %4450, %v5175_v60   ;;  %v5196_v61 = vld [vmem:[%s4765_s17 + $0x2e8] sm:$0xff]  ;;  %v5199_v62 = vld [vmem:[%s4765_s17 + $0x2e0] sm:$0xff] }
  0xcb   : > { %8638 = vst [vmem:[#allocation75_spill] sm:$0xff] %v5196_v61  ;;  %8639 = vst [vmem:[#allocation76_spill] sm:$0xff] %v5199_v62 }
  0xcd   : > { %v5189_v0 = vpop.permute.xlu1 %556  ;;  %v5191_v63 = vpop.permute.xlu0 %551 }
  0xce   : > { %8636 = vst [vmem:[#allocation73_spill] sm:$0xff] %v5189_v0  ;;  %8637 = vst [vmem:[#allocation74_spill] sm:$0xff] %v5191_v63  ;;  %866 = vperm.xlu1 %4451, %v5184_v57   ;;  %861 = vperm.xlu0 %4450, %v5187_v59   ;;  %v5208_v63 = vld [vmem:[%s4765_s17 + $0x2f8] sm:$0xff]  ;;  %v5211_v0 = vld [vmem:[%s4765_s17 + $0x2f0] sm:$0xff] }
  0xcf   : > { %8642 = vst [vmem:[#allocation79_spill] sm:$0xff] %v5208_v63  ;;  %8643 = vst [vmem:[#allocation80_spill] sm:$0xff] %v5211_v0 }
  0xd1   : > { %v5201_v58 = vpop.permute.xlu1 %566  ;;  %v5203_v60 = vpop.permute.xlu0 %561 }
  0xd2   : > { %8640 = vst [vmem:[#allocation77_spill] sm:$0xff] %v5201_v58  ;;  %8641 = vst [vmem:[#allocation78_spill] sm:$0xff] %v5203_v60  ;;  %876 = vperm.xlu1 %4451, %v5196_v61   ;;  %871 = vperm.xlu0 %4450, %v5199_v62   ;;  %v5220_v60 = vld [vmem:[%s4765_s17 + $0x308] sm:$0xff]  ;;  %v5223_v58 = vld [vmem:[%s4765_s17 + $0x300] sm:$0xff] }
  0xd3   : > { %8646 = vst [vmem:[#allocation83_spill] sm:$0xff] %v5220_v60  ;;  %8647 = vst [vmem:[#allocation84_spill] sm:$0xff] %v5223_v58 }
  0xd5   : > { %v5213_v57 = vpop.permute.xlu1 %576  ;;  %v5215_v59 = vpop.permute.xlu0 %571 }
  0xd6   : > { %8644 = vst [vmem:[#allocation81_spill] sm:$0xff] %v5213_v57  ;;  %8645 = vst [vmem:[#allocation82_spill] sm:$0xff] %v5215_v59  ;;  %886 = vperm.xlu1 %4451, %v5208_v63   ;;  %881 = vperm.xlu0 %4450, %v5211_v0   ;;  %v5232_v59 = vld [vmem:[%s4765_s17 + $0x318] sm:$0xff]  ;;  %v5235_v57 = vld [vmem:[%s4765_s17 + $0x310] sm:$0xff] }
  0xd7   : > { %8650 = vst [vmem:[#allocation87_spill] sm:$0xff] %v5232_v59  ;;  %8651 = vst [vmem:[#allocation88_spill] sm:$0xff] %v5235_v57 }
  0xd9   : > { %v5225_v61 = vpop.permute.xlu1 %586  ;;  %v5227_v62 = vpop.permute.xlu0 %581 }
  0xda   : > { %8648 = vst [vmem:[#allocation85_spill] sm:$0xff] %v5225_v61  ;;  %8649 = vst [vmem:[#allocation86_spill] sm:$0xff] %v5227_v62  ;;  %896 = vperm.xlu1 %4451, %v5220_v60   ;;  %891 = vperm.xlu0 %4450, %v5223_v58   ;;  %v5244_v62 = vld [vmem:[%s4765_s17 + $0x328] sm:$0xff]  ;;  %v5247_v61 = vld [vmem:[%s4765_s17 + $0x320] sm:$0xff] }
  0xdb   : > { %8654 = vst [vmem:[#allocation91_spill] sm:$0xff] %v5244_v62  ;;  %8655 = vst [vmem:[#allocation92_spill] sm:$0xff] %v5247_v61 }
  0xdd   : > { %v5237_v63 = vpop.permute.xlu1 %596  ;;  %v5239_v0 = vpop.permute.xlu0 %591 }
  0xde   : > { %8652 = vst [vmem:[#allocation89_spill] sm:$0xff] %v5237_v63  ;;  %8653 = vst [vmem:[#allocation90_spill] sm:$0xff] %v5239_v0  ;;  %906 = vperm.xlu1 %4451, %v5232_v59   ;;  %901 = vperm.xlu0 %4450, %v5235_v57   ;;  %v5256_v0 = vld [vmem:[%s4765_s17 + $0x338] sm:$0xff]  ;;  %v5259_v63 = vld [vmem:[%s4765_s17 + $0x330] sm:$0xff] }
  0xdf   : > { %8658 = vst [vmem:[#allocation95_spill] sm:$0xff] %v5256_v0  ;;  %8659 = vst [vmem:[#allocation96_spill] sm:$0xff] %v5259_v63 }
  0xe1   : > { %v5249_v60 = vpop.permute.xlu1 %606  ;;  %v5251_v58 = vpop.permute.xlu0 %601 }
  0xe2   : > { %8656 = vst [vmem:[#allocation93_spill] sm:$0xff] %v5249_v60  ;;  %8657 = vst [vmem:[#allocation94_spill] sm:$0xff] %v5251_v58  ;;  %916 = vperm.xlu1 %4451, %v5244_v62   ;;  %911 = vperm.xlu0 %4450, %v5247_v61   ;;  %v5268_v58 = vld [vmem:[%s4765_s17 + $0x348] sm:$0xff]  ;;  %v5271_v60 = vld [vmem:[%s4765_s17 + $0x340] sm:$0xff] }
  0xe3   : > { %8662 = vst [vmem:[#allocation99_spill] sm:$0xff] %v5268_v58  ;;  %8663 = vst [vmem:[#allocation100_spill] sm:$0xff] %v5271_v60 }
  0xe5   : > { %v5261_v59 = vpop.permute.xlu1 %616  ;;  %v5263_v57 = vpop.permute.xlu0 %611 }
  0xe6   : > { %8660 = vst [vmem:[#allocation97_spill] sm:$0xff] %v5261_v59  ;;  %8661 = vst [vmem:[#allocation98_spill] sm:$0xff] %v5263_v57  ;;  %926 = vperm.xlu1 %4451, %v5256_v0   ;;  %921 = vperm.xlu0 %4450, %v5259_v63   ;;  %v5280_v57 = vld [vmem:[%s4765_s17 + $0x358] sm:$0xff]  ;;  %v5283_v59 = vld [vmem:[%s4765_s17 + $0x350] sm:$0xff] }
  0xe7   : > { %8666 = vst [vmem:[#allocation103_spill] sm:$0xff] %v5280_v57  ;;  %8667 = vst [vmem:[#allocation104_spill] sm:$0xff] %v5283_v59 }
  0xe9   : > { %v5273_v62 = vpop.permute.xlu1 %626  ;;  %v5275_v61 = vpop.permute.xlu0 %621 }
  0xea   : > { %8664 = vst [vmem:[#allocation101_spill] sm:$0xff] %v5273_v62  ;;  %8665 = vst [vmem:[#allocation102_spill] sm:$0xff] %v5275_v61  ;;  %936 = vperm.xlu1 %4451, %v5268_v58   ;;  %931 = vperm.xlu0 %4450, %v5271_v60   ;;  %v5292_v61 = vld [vmem:[%s4765_s17 + $0x368] sm:$0xff]  ;;  %v5295_v62 = vld [vmem:[%s4765_s17 + $0x360] sm:$0xff] }
  0xeb   : > { %8670 = vst [vmem:[#allocation107_spill] sm:$0xff] %v5292_v61  ;;  %8671 = vst [vmem:[#allocation108_spill] sm:$0xff] %v5295_v62 }
  0xed   : > { %v5285_v0 = vpop.permute.xlu1 %636  ;;  %v5287_v63 = vpop.permute.xlu0 %631 }
  0xee   : > { %8668 = vst [vmem:[#allocation105_spill] sm:$0xff] %v5285_v0  ;;  %8669 = vst [vmem:[#allocation106_spill] sm:$0xff] %v5287_v63  ;;  %946 = vperm.xlu1 %4451, %v5280_v57   ;;  %941 = vperm.xlu0 %4450, %v5283_v59   ;;  %v5304_v63 = vld [vmem:[%s4765_s17 + $0x378] sm:$0xff]  ;;  %v5307_v0 = vld [vmem:[%s4765_s17 + $0x370] sm:$0xff] }
  0xef   : > { %8674 = vst [vmem:[#allocation111_spill] sm:$0xff] %v5304_v63  ;;  %8675 = vst [vmem:[#allocation112_spill] sm:$0xff] %v5307_v0 }
  0xf1   : > { %v5297_v58 = vpop.permute.xlu1 %646  ;;  %v5299_v60 = vpop.permute.xlu0 %641 }
  0xf2   : > { %8672 = vst [vmem:[#allocation109_spill] sm:$0xff] %v5297_v58  ;;  %8673 = vst [vmem:[#allocation110_spill] sm:$0xff] %v5299_v60  ;;  %956 = vperm.xlu1 %4451, %v5292_v61   ;;  %951 = vperm.xlu0 %4450, %v5295_v62   ;;  %v5316_v60 = vld [vmem:[%s4765_s17 + $0x388] sm:$0xff]  ;;  %v5319_v58 = vld [vmem:[%s4765_s17 + $0x380] sm:$0xff] }
  0xf3   : > { %8678 = vst [vmem:[#allocation115_spill] sm:$0xff] %v5316_v60  ;;  %8679 = vst [vmem:[#allocation116_spill] sm:$0xff] %v5319_v58 }
  0xf5   : > { %v5309_v57 = vpop.permute.xlu1 %656  ;;  %v5311_v59 = vpop.permute.xlu0 %651 }
  0xf6   : > { %8676 = vst [vmem:[#allocation113_spill] sm:$0xff] %v5309_v57  ;;  %8677 = vst [vmem:[#allocation114_spill] sm:$0xff] %v5311_v59  ;;  %966 = vperm.xlu1 %4451, %v5304_v63   ;;  %961 = vperm.xlu0 %4450, %v5307_v0   ;;  %v5328_v59 = vld [vmem:[%s4765_s17 + $0x398] sm:$0xff]  ;;  %v5331_v57 = vld [vmem:[%s4765_s17 + $0x390] sm:$0xff] }
  0xf7   : > { %8682 = vst [vmem:[#allocation119_spill] sm:$0xff] %v5328_v59  ;;  %8683 = vst [vmem:[#allocation120_spill] sm:$0xff] %v5331_v57 }
  0xf9   : > { %v5321_v61 = vpop.permute.xlu1 %666  ;;  %v5323_v62 = vpop.permute.xlu0 %661 }
  0xfa   : > { %8680 = vst [vmem:[#allocation117_spill] sm:$0xff] %v5321_v61  ;;  %8681 = vst [vmem:[#allocation118_spill] sm:$0xff] %v5323_v62  ;;  %976 = vperm.xlu1 %4451, %v5316_v60   ;;  %971 = vperm.xlu0 %4450, %v5319_v58   ;;  %v5340_v62 = vld [vmem:[%s4765_s17 + $0x3a8] sm:$0xff]  ;;  %v5343_v61 = vld [vmem:[%s4765_s17 + $0x3a0] sm:$0xff] }
  0xfb   : > { %8686 = vst [vmem:[#allocation123_spill] sm:$0xff] %v5340_v62  ;;  %8687 = vst [vmem:[#allocation124_spill] sm:$0xff] %v5343_v61 }
  0xfd   : > { %v5333_v63 = vpop.permute.xlu1 %676  ;;  %v5335_v0 = vpop.permute.xlu0 %671 }
  0xfe   : > { %8684 = vst [vmem:[#allocation121_spill] sm:$0xff] %v5333_v63  ;;  %8685 = vst [vmem:[#allocation122_spill] sm:$0xff] %v5335_v0  ;;  %986 = vperm.xlu1 %4451, %v5328_v59   ;;  %981 = vperm.xlu0 %4450, %v5331_v57   ;;  %v5352_v0 = vld [vmem:[%s4765_s17 + $0x3b8] sm:$0xff]  ;;  %v5355_v63 = vld [vmem:[%s4765_s17 + $0x3b0] sm:$0xff] }
  0xff   : > { %8690 = vst [vmem:[#allocation127_spill] sm:$0xff] %v5352_v0  ;;  %8691 = vst [vmem:[#allocation128_spill] sm:$0xff] %v5355_v63 }
 0x101   : > { %v5345_v60 = vpop.permute.xlu1 %686  ;;  %v5347_v58 = vpop.permute.xlu0 %681 }
 0x102   : > { %8688 = vst [vmem:[#allocation125_spill] sm:$0xff] %v5345_v60  ;;  %8689 = vst [vmem:[#allocation126_spill] sm:$0xff] %v5347_v58  ;;  %996 = vperm.xlu1 %4451, %v5340_v62   ;;  %991 = vperm.xlu0 %4450, %v5343_v61   ;;  %v5364_v58 = vld [vmem:[%s4765_s17 + $0x3c8] sm:$0xff]  ;;  %v5367_v60 = vld [vmem:[%s4765_s17 + $0x3c0] sm:$0xff] }
 0x103   : > { %8694 = vst [vmem:[#allocation131_spill] sm:$0xff] %v5364_v58  ;;  %8695 = vst [vmem:[#allocation132_spill] sm:$0xff] %v5367_v60 }
 0x105   : > { %v5357_v59 = vpop.permute.xlu1 %696  ;;  %v5359_v57 = vpop.permute.xlu0 %691 }
 0x106   : > { %8692 = vst [vmem:[#allocation129_spill] sm:$0xff] %v5357_v59  ;;  %8693 = vst [vmem:[#allocation130_spill] sm:$0xff] %v5359_v57  ;;  %1006 = vperm.xlu1 %4451, %v5352_v0   ;;  %1001 = vperm.xlu0 %4450, %v5355_v63   ;;  %v5376_v57 = vld [vmem:[%s4765_s17 + $0x3d8] sm:$0xff]  ;;  %v5379_v59 = vld [vmem:[%s4765_s17 + $0x3d0] sm:$0xff] }
 0x107   : > { %8698 = vst [vmem:[#allocation135_spill] sm:$0xff] %v5376_v57 }
 0x109   : > { %v5369_v62 = vpop.permute.xlu1 %706  ;;  %v5371_v61 = vpop.permute.xlu0 %701 }
 0x10a   : > { %8696 = vst [vmem:[#allocation133_spill] sm:$0xff] %v5369_v62  ;;  %8697 = vst [vmem:[#allocation134_spill] sm:$0xff] %v5371_v61  ;;  %1016 = vperm.xlu1 %4451, %v5364_v58   ;;  %1011 = vperm.xlu0 %4450, %v5367_v60   ;;  %v405_v62 = vld [vmem:[%s4765_s17 + $0x3e8] sm:$0xff]  ;;  %v407_v58 = vld [vmem:[%s4765_s17 + $0x3f8] sm:$0xff] }
 0x10b   : > { %v406_v60 = vld [vmem:[%s4765_s17 + $0x3f0] sm:$0xff] }
 0x10d   : > { %v5381_v0 = vpop.permute.xlu1 %716  ;;  %v5383_v63 = vpop.permute.xlu0 %711 }
 0x10e   : > { %8699 = vst [vmem:[#allocation136_spill] sm:$0xff] %v5381_v0  ;;  %8700 = vst [vmem:[#allocation137_spill] sm:$0xff] %v5383_v63  ;;  %1026 = vperm.xlu1 %4451, %v5376_v57   ;;  %1021 = vperm.xlu0 %4450, %v5379_v59   ;;  %v8557_v57 = vmov 1  }
 0x111   : > { %v5389_v61 = vpop.permute.xlu1 %726  ;;  %v5391_v56 = vpop.permute.xlu0 %721 }
 0x112   : > { %1036 = vperm.xlu1 %4451, %v405_v62   ;;  %1031 = vperm.xlu0 %4450, %v404_v55  }
 0x115   : > { %v5395_v53 = vpop.permute.xlu1 %736  ;;  %v5397_v54 = vpop.permute.xlu0 %731 }
 0x116   : > { %1046 = vperm.xlu1 %4451, %v407_v58   ;;  %1041 = vperm.xlu0 %4450, %v406_v60  }
 0x119   : > { %v5399_v63 = vpop.permute.xlu1 %746  ;;  %v5401_v0 = vpop.permute.xlu0 %741 }
 0x11a   : > { %4453 = vset.pattern.permute.xlu1 %v8557_v57  ;;  %4452 = vset.pattern.permute.xlu0 %v8557_v57 }
 0x11b   : > { %1186 = vperm.xlu1 %4453, %v4779_v4   ;;  %1182 = vperm.xlu0 %4452, %v4771_v2  }
 0x11d   : > { %v5407_v55 = vpop.permute.xlu1 %756  ;;  %v5409_v62 = vpop.permute.xlu0 %751 }
 0x11f   : > { %1190 = vperm.xlu1 %4453, %v4768_v1   ;;  %1194 = vperm.xlu0 %4452, %v4776_v3  }
 0x121   : > { %v5413_v58 = vpop.permute.xlu1 %766  ;;  %v5415_v60 = vpop.permute.xlu0 %761 }
 0x123   : > { %1198 = vperm.xlu1 %4453, %v4787_v6   ;;  %1202 = vperm.xlu0 %4452, %v4784_v5  }
 0x125   : > { %v5419_v57 = vpop.permute.xlu1 %776  ;;  %v5421_v4 = vpop.permute.xlu0 %771 }
 0x127   : > { %1206 = vperm.xlu1 %4453, %v4795_v8   ;;  %1210 = vperm.xlu0 %4452, %v4792_v7  }
 0x129   : > { %v5425_v2 = vpop.permute.xlu1 %786  ;;  %v5427_v1 = vpop.permute.xlu0 %781 }
 0x12b   : > { %1214 = vperm.xlu1 %4453, %v4803_v10   ;;  %1218 = vperm.xlu0 %4452, %v4800_v9  }
 0x12d   : > { %v5431_v3 = vpop.permute.xlu1 %796  ;;  %v5433_v6 = vpop.permute.xlu0 %791 }
 0x12f   : > { %1222 = vperm.xlu1 %4453, %v4811_v12   ;;  %1226 = vperm.xlu0 %4452, %v4808_v11  }
 0x131   : > { %v5437_v5 = vpop.permute.xlu1 %806  ;;  %v5439_v8 = vpop.permute.xlu0 %801 }
 0x133   : > { %1230 = vperm.xlu1 %4453, %v4819_v14   ;;  %1234 = vperm.xlu0 %4452, %v4816_v13  }
 0x135   : > { %v5443_v7 = vpop.permute.xlu1 %816  ;;  %v5445_v10 = vpop.permute.xlu0 %811 }
 0x137   : > { %1238 = vperm.xlu1 %4453, %v4827_v16   ;;  %1242 = vperm.xlu0 %4452, %v4824_v15  }
 0x139   : > { %v5449_v9 = vpop.permute.xlu1 %826  ;;  %v5451_v12 = vpop.permute.xlu0 %821 }
 0x13b   : > { %1246 = vperm.xlu1 %4453, %v4833_v18   ;;  %1250 = vperm.xlu0 %4452, %v4830_v17  }
 0x13d   : > { %v5455_v11 = vpop.permute.xlu1 %836  ;;  %v5457_v14 = vpop.permute.xlu0 %831 }
 0x13f   : > { %1254 = vperm.xlu1 %4453, %v4843_v20   ;;  %1258 = vperm.xlu0 %4452, %v4840_v19  }
 0x141   : > { %v5461_v13 = vpop.permute.xlu1 %846  ;;  %v5463_v16 = vpop.permute.xlu0 %841 }
 0x143   : > { %1262 = vperm.xlu1 %4453, %v4851_v22   ;;  %1266 = vperm.xlu0 %4452, %v4848_v21  }
 0x145   : > { %v5467_v15 = vpop.permute.xlu1 %856  ;;  %v5469_v18 = vpop.permute.xlu0 %851 }
 0x147   : > { %1270 = vperm.xlu1 %4453, %v4859_v24   ;;  %1274 = vperm.xlu0 %4452, %v4856_v23  }
 0x149   : > { %v5473_v17 = vpop.permute.xlu1 %866  ;;  %v5475_v20 = vpop.permute.xlu0 %861 }
 0x14b   : > { %1278 = vperm.xlu1 %4453, %v4867_v26   ;;  %1282 = vperm.xlu0 %4452, %v4864_v25  }
 0x14d   : > { %v5479_v19 = vpop.permute.xlu1 %876  ;;  %v5481_v22 = vpop.permute.xlu0 %871 }
 0x14f   : > { %1286 = vperm.xlu1 %4453, %v4875_v28   ;;  %1290 = vperm.xlu0 %4452, %v4872_v27  }
 0x151   : > { %v5485_v21 = vpop.permute.xlu1 %886  ;;  %v5487_v24 = vpop.permute.xlu0 %881 }
 0x153   : > { %1294 = vperm.xlu1 %4453, %v4883_v30   ;;  %1298 = vperm.xlu0 %4452, %v4880_v29  }
 0x155   : > { %v5491_v23 = vpop.permute.xlu1 %896  ;;  %v5493_v26 = vpop.permute.xlu0 %891 }
 0x157   : > { %1302 = vperm.xlu1 %4453, %v4891_v32   ;;  %1306 = vperm.xlu0 %4452, %v4888_v31  }
 0x159   : > { %v5497_v25 = vpop.permute.xlu1 %906  ;;  %v5499_v28 = vpop.permute.xlu0 %901 }
 0x15b   : > { %1310 = vperm.xlu1 %4453, %v4899_v34   ;;  %1314 = vperm.xlu0 %4452, %v4896_v33  }
 0x15d   : > { %v5503_v27 = vpop.permute.xlu1 %916  ;;  %v5505_v30 = vpop.permute.xlu0 %911 }
 0x15f   : > { %1318 = vperm.xlu1 %4453, %v4907_v36   ;;  %1322 = vperm.xlu0 %4452, %v4904_v35  }
 0x161   : > { %v5509_v29 = vpop.permute.xlu1 %926  ;;  %v5511_v32 = vpop.permute.xlu0 %921 }
 0x162   : > { %8701 = vst [vmem:[#allocation138_spill] sm:$0xff] %v5511_v32 }
 0x163   : > { %1326 = vperm.xlu1 %4453, %v4915_v38   ;;  %1330 = vperm.xlu0 %4452, %v4912_v37  }
 0x165   : > { %v5515_v31 = vpop.permute.xlu1 %936  ;;  %v5517_v34 = vpop.permute.xlu0 %931 }
 0x167   : > { %1334 = vperm.xlu1 %4453, %v4923_v40   ;;  %1338 = vperm.xlu0 %4452, %v4920_v39  }
 0x169   : > { %v5521_v33 = vpop.permute.xlu1 %946  ;;  %v5523_v36 = vpop.permute.xlu0 %941 }
 0x16b   : > { %1342 = vperm.xlu1 %4453, %v4931_v42   ;;  %1346 = vperm.xlu0 %4452, %v4928_v41  }
 0x16d   : > { %v5527_v35 = vpop.permute.xlu1 %956  ;;  %v5529_v32 = vpop.permute.xlu0 %951 }
 0x16f   : > { %1350 = vperm.xlu1 %4453, %v4939_v44   ;;  %1354 = vperm.xlu0 %4452, %v4936_v43  }
 0x171   : > { %v5533_v37 = vpop.permute.xlu1 %966  ;;  %v5535_v40 = vpop.permute.xlu0 %961 }
 0x172   : > { %8702 = vst [vmem:[#allocation139_spill] sm:$0xff] %v5535_v40 }
 0x173   : > { %1358 = vperm.xlu1 %4453, %v4947_v46   ;;  %1362 = vperm.xlu0 %4452, %v4944_v45  }
 0x175   : > { %v5539_v39 = vpop.permute.xlu1 %976  ;;  %v5541_v42 = vpop.permute.xlu0 %971 }
 0x176   : > { %8703 = vst [vmem:[#allocation140_spill] sm:$0xff] %v5541_v42 }
 0x177   : > { %1366 = vperm.xlu1 %4453, %v4955_v48   ;;  %1370 = vperm.xlu0 %4452, %v4952_v47   ;;  %v8710_v47 = vld [vmem:[#allocation6_spill] sm:$0xff] }
 0x179   : > { %v5545_v41 = vpop.permute.xlu1 %986  ;;  %v5547_v44 = vpop.permute.xlu0 %981 }
 0x17a   : > { %8704 = vst [vmem:[#allocation141_spill] sm:$0xff] %v5545_v41  ;;  %8705 = vst [vmem:[#allocation142_spill] sm:$0xff] %v5547_v44  ;;  %v8711_v41 = vld [vmem:[#allocation5_spill] sm:$0xff] }
 0x17b   : > { %1374 = vperm.xlu1 %4453, %v4963_v50   ;;  %1378 = vperm.xlu0 %4452, %v4960_v49   ;;  %v8714_v49 = vld [vmem:[#allocation8_spill] sm:$0xff] }
 0x17d   : > { %v5551_v43 = vpop.permute.xlu1 %996  ;;  %v5553_v40 = vpop.permute.xlu0 %991 }
 0x17e   : > { %8706 = vst [vmem:[#allocation143_spill] sm:$0xff] %v5551_v43  ;;  %8707 = vst [vmem:[#allocation144_spill] sm:$0xff] %v5553_v40  ;;  %v8715_v43 = vld [vmem:[#allocation7_spill] sm:$0xff] }
 0x17f   : > { %1382 = vperm.xlu1 %4453, %v4971_v52   ;;  %1386 = vperm.xlu0 %4452, %v4968_v51   ;;  %v8718_v51 = vld [vmem:[#allocation10_spill] sm:$0xff] }
 0x181   : > { %v5557_v45 = vpop.permute.xlu1 %1006  ;;  %v5559_v48 = vpop.permute.xlu0 %1001 }
 0x182   : > { %8708 = vst [vmem:[#allocation145_spill] sm:$0xff] %v5557_v45  ;;  %8709 = vst [vmem:[#allocation146_spill] sm:$0xff] %v5559_v48  ;;  %v8719_v45 = vld [vmem:[#allocation9_spill] sm:$0xff] }
 0x183   : > { %1390 = vperm.xlu1 %4453, %v8710_v47   ;;  %1394 = vperm.xlu0 %4452, %v8711_v41   ;;  %v8722_v41 = vld [vmem:[#allocation12_spill] sm:$0xff] }
 0x185   : > { %v5563_v44 = vpop.permute.xlu1 %1016  ;;  %v5565_v50 = vpop.permute.xlu0 %1011 }
 0x186   : > { %8712 = vst [vmem:[#allocation6_spill] sm:$0xff] %v5563_v44  ;;  %8713 = vst [vmem:[#allocation5_spill] sm:$0xff] %v5565_v50  ;;  %v8723_v44 = vld [vmem:[#allocation11_spill] sm:$0xff] }
 0x187   : > { %1398 = vperm.xlu1 %4453, %v8714_v49   ;;  %1402 = vperm.xlu0 %4452, %v8715_v43   ;;  %v8726_v43 = vld [vmem:[#allocation14_spill] sm:$0xff] }
 0x189   : > { %v5569_v40 = vpop.permute.xlu1 %1026  ;;  %v5571_v52 = vpop.permute.xlu0 %1021 }
 0x18a   : > { %8716 = vst [vmem:[#allocation8_spill] sm:$0xff] %v5569_v40  ;;  %8717 = vst [vmem:[#allocation7_spill] sm:$0xff] %v5571_v52  ;;  %v8727_v40 = vld [vmem:[#allocation13_spill] sm:$0xff] }
 0x18b   : > { %1406 = vperm.xlu1 %4453, %v8718_v51   ;;  %1410 = vperm.xlu0 %4452, %v8719_v45   ;;  %v8730_v45 = vld [vmem:[#allocation16_spill] sm:$0xff] }
 0x18d   : > { %v5575_v48 = vpop.permute.xlu1 %1036  ;;  %v5577_v42 = vpop.permute.xlu0 %1031 }
 0x18e   : > { %8720 = vst [vmem:[#allocation10_spill] sm:$0xff] %v5575_v48  ;;  %8721 = vst [vmem:[#allocation9_spill] sm:$0xff] %v5577_v42  ;;  %v8731_v48 = vld [vmem:[#allocation15_spill] sm:$0xff] }
 0x18f   : > { %1414 = vperm.xlu1 %4453, %v8722_v41   ;;  %1418 = vperm.xlu0 %4452, %v8723_v44   ;;  %v8734_v44 = vld [vmem:[#allocation20_spill] sm:$0xff] }
 0x191   : > { %v5581_v50 = vpop.permute.xlu1 %1046  ;;  %v5583_v49 = vpop.permute.xlu0 %1041 }
 0x192   : > { %8724 = vst [vmem:[#allocation12_spill] sm:$0xff] %v5581_v50  ;;  %8725 = vst [vmem:[#allocation11_spill] sm:$0xff] %v5583_v49  ;;  %v8735_v50 = vld [vmem:[#allocation19_spill] sm:$0xff] }
 0x193   : > { %1422 = vperm.xlu1 %4453, %v8726_v43   ;;  %1426 = vperm.xlu0 %4452, %v8727_v40   ;;  %v8738_v40 = vld [vmem:[#allocation24_spill] sm:$0xff] }
 0x196   : > { %v5587_v52 = vpop.permute.xlu1 %1186  ;;  %v5589_v51 = vpop.permute.xlu0 %1182 }
 0x197   : > { %8728 = vst [vmem:[#allocation14_spill] sm:$0xff] %v5587_v52  ;;  %8729 = vst [vmem:[#allocation13_spill] sm:$0xff] %v5589_v51  ;;  %1430 = vperm.xlu1 %4453, %v8730_v45   ;;  %1434 = vperm.xlu0 %4452, %v8731_v48   ;;  %v8739_v52 = vld [vmem:[#allocation23_spill] sm:$0xff]  ;;  %v8742_v48 = vld [vmem:[#allocation28_spill] sm:$0xff] }
 0x19a   : > { %v5593_v42 = vpop.permute.xlu1 %1190  ;;  %v5595_v41 = vpop.permute.xlu0 %1194 }
 0x19b   : > { %8732 = vst [vmem:[#allocation16_spill] sm:$0xff] %v5593_v42  ;;  %8733 = vst [vmem:[#allocation15_spill] sm:$0xff] %v5595_v41  ;;  %1438 = vperm.xlu1 %4453, %v8734_v44   ;;  %1442 = vperm.xlu0 %4452, %v8735_v50   ;;  %v8743_v42 = vld [vmem:[#allocation27_spill] sm:$0xff]  ;;  %v8746_v50 = vld [vmem:[#allocation32_spill] sm:$0xff] }
 0x19e   : > { %v5599_v49 = vpop.permute.xlu1 %1198  ;;  %v5601_v43 = vpop.permute.xlu0 %1202 }
 0x19f   : > { %8736 = vst [vmem:[#allocation20_spill] sm:$0xff] %v5599_v49  ;;  %8737 = vst [vmem:[#allocation19_spill] sm:$0xff] %v5601_v43  ;;  %1446 = vperm.xlu1 %4453, %v8738_v40   ;;  %1450 = vperm.xlu0 %4452, %v8739_v52   ;;  %v8747_v49 = vld [vmem:[#allocation31_spill] sm:$0xff]  ;;  %v8750_v52 = vld [vmem:[#allocation36_spill] sm:$0xff] }
 0x1a2   : > { %v5605_v51 = vpop.permute.xlu1 %1206  ;;  %v5607_v45 = vpop.permute.xlu0 %1210 }
 0x1a3   : > { %8740 = vst [vmem:[#allocation24_spill] sm:$0xff] %v5605_v51  ;;  %8741 = vst [vmem:[#allocation23_spill] sm:$0xff] %v5607_v45  ;;  %1454 = vperm.xlu1 %4453, %v8742_v48   ;;  %1458 = vperm.xlu0 %4452, %v8743_v42   ;;  %v8751_v51 = vld [vmem:[#allocation35_spill] sm:$0xff]  ;;  %v8754_v42 = vld [vmem:[#allocation40_spill] sm:$0xff] }
 0x1a6   : > { %v5611_v41 = vpop.permute.xlu1 %1214  ;;  %v5613_v44 = vpop.permute.xlu0 %1218 }
 0x1a7   : > { %8744 = vst [vmem:[#allocation28_spill] sm:$0xff] %v5611_v41  ;;  %8745 = vst [vmem:[#allocation27_spill] sm:$0xff] %v5613_v44  ;;  %1462 = vperm.xlu1 %4453, %v8746_v50   ;;  %1466 = vperm.xlu0 %4452, %v8747_v49   ;;  %v8755_v41 = vld [vmem:[#allocation39_spill] sm:$0xff]  ;;  %v8758_v49 = vld [vmem:[#allocation44_spill] sm:$0xff] }
 0x1aa   : > { %v5617_v43 = vpop.permute.xlu1 %1222  ;;  %v5619_v40 = vpop.permute.xlu0 %1226 }
 0x1ab   : > { %8748 = vst [vmem:[#allocation32_spill] sm:$0xff] %v5617_v43  ;;  %8749 = vst [vmem:[#allocation31_spill] sm:$0xff] %v5619_v40  ;;  %1470 = vperm.xlu1 %4453, %v8750_v52   ;;  %1474 = vperm.xlu0 %4452, %v8751_v51   ;;  %v8759_v43 = vld [vmem:[#allocation43_spill] sm:$0xff]  ;;  %v8762_v51 = vld [vmem:[#allocation48_spill] sm:$0xff] }
 0x1ae   : > { %v5623_v45 = vpop.permute.xlu1 %1230  ;;  %v5625_v48 = vpop.permute.xlu0 %1234 }
 0x1af   : > { %8752 = vst [vmem:[#allocation36_spill] sm:$0xff] %v5623_v45  ;;  %8753 = vst [vmem:[#allocation35_spill] sm:$0xff] %v5625_v48  ;;  %1478 = vperm.xlu1 %4453, %v8754_v42   ;;  %1482 = vperm.xlu0 %4452, %v8755_v41   ;;  %v8763_v45 = vld [vmem:[#allocation47_spill] sm:$0xff]  ;;  %v8766_v41 = vld [vmem:[#allocation52_spill] sm:$0xff] }
 0x1b2   : > { %v5629_v44 = vpop.permute.xlu1 %1238  ;;  %v5631_v50 = vpop.permute.xlu0 %1242 }
 0x1b3   : > { %8756 = vst [vmem:[#allocation40_spill] sm:$0xff] %v5629_v44  ;;  %8757 = vst [vmem:[#allocation39_spill] sm:$0xff] %v5631_v50  ;;  %1486 = vperm.xlu1 %4453, %v8758_v49   ;;  %1490 = vperm.xlu0 %4452, %v8759_v43   ;;  %v8767_v44 = vld [vmem:[#allocation51_spill] sm:$0xff]  ;;  %v8770_v43 = vld [vmem:[#allocation56_spill] sm:$0xff] }
 0x1b6   : > { %v5635_v40 = vpop.permute.xlu1 %1246  ;;  %v5637_v52 = vpop.permute.xlu0 %1250 }
 0x1b7   : > { %8760 = vst [vmem:[#allocation44_spill] sm:$0xff] %v5635_v40  ;;  %8761 = vst [vmem:[#allocation43_spill] sm:$0xff] %v5637_v52  ;;  %1494 = vperm.xlu1 %4453, %v8762_v51   ;;  %1498 = vperm.xlu0 %4452, %v8763_v45   ;;  %v8771_v40 = vld [vmem:[#allocation55_spill] sm:$0xff]  ;;  %v8774_v45 = vld [vmem:[#allocation60_spill] sm:$0xff] }
 0x1ba   : > { %v5641_v48 = vpop.permute.xlu1 %1254  ;;  %v5643_v42 = vpop.permute.xlu0 %1258 }
 0x1bb   : > { %8764 = vst [vmem:[#allocation48_spill] sm:$0xff] %v5641_v48  ;;  %8765 = vst [vmem:[#allocation47_spill] sm:$0xff] %v5643_v42  ;;  %1502 = vperm.xlu1 %4453, %v8766_v41   ;;  %1506 = vperm.xlu0 %4452, %v8767_v44   ;;  %v8775_v48 = vld [vmem:[#allocation59_spill] sm:$0xff]  ;;  %v8778_v44 = vld [vmem:[#allocation64_spill] sm:$0xff] }
 0x1be   : > { %v5647_v50 = vpop.permute.xlu1 %1262  ;;  %v5649_v49 = vpop.permute.xlu0 %1266 }
 0x1bf   : > { %8768 = vst [vmem:[#allocation52_spill] sm:$0xff] %v5647_v50  ;;  %8769 = vst [vmem:[#allocation51_spill] sm:$0xff] %v5649_v49  ;;  %1510 = vperm.xlu1 %4453, %v8770_v43   ;;  %1514 = vperm.xlu0 %4452, %v8771_v40   ;;  %v8779_v50 = vld [vmem:[#allocation63_spill] sm:$0xff]  ;;  %v8782_v40 = vld [vmem:[#allocation68_spill] sm:$0xff] }
 0x1c2   : > { %v5653_v52 = vpop.permute.xlu1 %1270  ;;  %v5655_v51 = vpop.permute.xlu0 %1274 }
 0x1c3   : > { %8772 = vst [vmem:[#allocation56_spill] sm:$0xff] %v5653_v52  ;;  %8773 = vst [vmem:[#allocation55_spill] sm:$0xff] %v5655_v51  ;;  %1518 = vperm.xlu1 %4453, %v8774_v45   ;;  %1522 = vperm.xlu0 %4452, %v8775_v48   ;;  %v8783_v52 = vld [vmem:[#allocation67_spill] sm:$0xff]  ;;  %v8786_v48 = vld [vmem:[#allocation72_spill] sm:$0xff] }
 0x1c6   : > { %v5659_v42 = vpop.permute.xlu1 %1278  ;;  %v5661_v41 = vpop.permute.xlu0 %1282 }
 0x1c7   : > { %8776 = vst [vmem:[#allocation60_spill] sm:$0xff] %v5659_v42  ;;  %8777 = vst [vmem:[#allocation59_spill] sm:$0xff] %v5661_v41  ;;  %1526 = vperm.xlu1 %4453, %v8778_v44   ;;  %1530 = vperm.xlu0 %4452, %v8779_v50   ;;  %v8787_v42 = vld [vmem:[#allocation71_spill] sm:$0xff]  ;;  %v8790_v50 = vld [vmem:[#allocation76_spill] sm:$0xff] }
 0x1ca   : > { %v5665_v49 = vpop.permute.xlu1 %1286  ;;  %v5667_v43 = vpop.permute.xlu0 %1290 }
 0x1cb   : > { %8780 = vst [vmem:[#allocation64_spill] sm:$0xff] %v5665_v49  ;;  %8781 = vst [vmem:[#allocation63_spill] sm:$0xff] %v5667_v43  ;;  %1534 = vperm.xlu1 %4453, %v8782_v40   ;;  %1538 = vperm.xlu0 %4452, %v8783_v52   ;;  %v8791_v49 = vld [vmem:[#allocation75_spill] sm:$0xff]  ;;  %v8794_v52 = vld [vmem:[#allocation80_spill] sm:$0xff] }
 0x1ce   : > { %v5671_v51 = vpop.permute.xlu1 %1294  ;;  %v5673_v45 = vpop.permute.xlu0 %1298 }
 0x1cf   : > { %8784 = vst [vmem:[#allocation68_spill] sm:$0xff] %v5671_v51  ;;  %8785 = vst [vmem:[#allocation67_spill] sm:$0xff] %v5673_v45  ;;  %1542 = vperm.xlu1 %4453, %v8786_v48   ;;  %1546 = vperm.xlu0 %4452, %v8787_v42   ;;  %v8795_v51 = vld [vmem:[#allocation79_spill] sm:$0xff]  ;;  %v8798_v42 = vld [vmem:[#allocation84_spill] sm:$0xff] }
 0x1d2   : > { %v5677_v41 = vpop.permute.xlu1 %1302  ;;  %v5679_v44 = vpop.permute.xlu0 %1306 }
 0x1d3   : > { %8788 = vst [vmem:[#allocation72_spill] sm:$0xff] %v5677_v41  ;;  %8789 = vst [vmem:[#allocation71_spill] sm:$0xff] %v5679_v44  ;;  %1550 = vperm.xlu1 %4453, %v8790_v50   ;;  %1554 = vperm.xlu0 %4452, %v8791_v49   ;;  %v8799_v41 = vld [vmem:[#allocation83_spill] sm:$0xff]  ;;  %v8802_v49 = vld [vmem:[#allocation88_spill] sm:$0xff] }
 0x1d6   : > { %v5683_v43 = vpop.permute.xlu1 %1310  ;;  %v5685_v40 = vpop.permute.xlu0 %1314 }
 0x1d7   : > { %8792 = vst [vmem:[#allocation76_spill] sm:$0xff] %v5683_v43  ;;  %8793 = vst [vmem:[#allocation75_spill] sm:$0xff] %v5685_v40  ;;  %1558 = vperm.xlu1 %4453, %v8794_v52   ;;  %1562 = vperm.xlu0 %4452, %v8795_v51   ;;  %v8803_v43 = vld [vmem:[#allocation87_spill] sm:$0xff]  ;;  %v8806_v51 = vld [vmem:[#allocation92_spill] sm:$0xff] }
 0x1da   : > { %v5689_v45 = vpop.permute.xlu1 %1318  ;;  %v5691_v48 = vpop.permute.xlu0 %1322 }
 0x1db   : > { %8796 = vst [vmem:[#allocation80_spill] sm:$0xff] %v5689_v45  ;;  %8797 = vst [vmem:[#allocation79_spill] sm:$0xff] %v5691_v48  ;;  %1566 = vperm.xlu1 %4453, %v8798_v42   ;;  %1570 = vperm.xlu0 %4452, %v8799_v41   ;;  %v8807_v45 = vld [vmem:[#allocation91_spill] sm:$0xff]  ;;  %v8810_v41 = vld [vmem:[#allocation96_spill] sm:$0xff] }
 0x1de   : > { %v5695_v44 = vpop.permute.xlu1 %1326  ;;  %v5697_v50 = vpop.permute.xlu0 %1330 }
 0x1df   : > { %8800 = vst [vmem:[#allocation84_spill] sm:$0xff] %v5695_v44  ;;  %8801 = vst [vmem:[#allocation83_spill] sm:$0xff] %v5697_v50  ;;  %1574 = vperm.xlu1 %4453, %v8802_v49   ;;  %1578 = vperm.xlu0 %4452, %v8803_v43   ;;  %v8811_v44 = vld [vmem:[#allocation95_spill] sm:$0xff]  ;;  %v8814_v43 = vld [vmem:[#allocation100_spill] sm:$0xff] }
 0x1e2   : > { %v5701_v40 = vpop.permute.xlu1 %1334  ;;  %v5703_v52 = vpop.permute.xlu0 %1338 }
 0x1e3   : > { %8804 = vst [vmem:[#allocation88_spill] sm:$0xff] %v5701_v40  ;;  %8805 = vst [vmem:[#allocation87_spill] sm:$0xff] %v5703_v52  ;;  %1582 = vperm.xlu1 %4453, %v8806_v51   ;;  %1586 = vperm.xlu0 %4452, %v8807_v45   ;;  %v8815_v40 = vld [vmem:[#allocation99_spill] sm:$0xff]  ;;  %v8818_v45 = vld [vmem:[#allocation104_spill] sm:$0xff] }
 0x1e6   : > { %v5707_v48 = vpop.permute.xlu1 %1342  ;;  %v5709_v42 = vpop.permute.xlu0 %1346 }
 0x1e7   : > { %8808 = vst [vmem:[#allocation92_spill] sm:$0xff] %v5707_v48  ;;  %8809 = vst [vmem:[#allocation91_spill] sm:$0xff] %v5709_v42  ;;  %1590 = vperm.xlu1 %4453, %v8810_v41   ;;  %1594 = vperm.xlu0 %4452, %v8811_v44   ;;  %v8819_v48 = vld [vmem:[#allocation103_spill] sm:$0xff]  ;;  %v8822_v44 = vld [vmem:[#allocation108_spill] sm:$0xff] }
 0x1ea   : > { %v5713_v50 = vpop.permute.xlu1 %1350  ;;  %v5715_v49 = vpop.permute.xlu0 %1354 }
 0x1eb   : > { %8812 = vst [vmem:[#allocation96_spill] sm:$0xff] %v5713_v50  ;;  %8813 = vst [vmem:[#allocation95_spill] sm:$0xff] %v5715_v49  ;;  %1598 = vperm.xlu1 %4453, %v8814_v43   ;;  %1602 = vperm.xlu0 %4452, %v8815_v40   ;;  %v8823_v50 = vld [vmem:[#allocation107_spill] sm:$0xff]  ;;  %v8826_v40 = vld [vmem:[#allocation112_spill] sm:$0xff] }
 0x1ee   : > { %v5719_v52 = vpop.permute.xlu1 %1358  ;;  %v5721_v51 = vpop.permute.xlu0 %1362 }
 0x1ef   : > { %8816 = vst [vmem:[#allocation100_spill] sm:$0xff] %v5719_v52  ;;  %8817 = vst [vmem:[#allocation99_spill] sm:$0xff] %v5721_v51  ;;  %1606 = vperm.xlu1 %4453, %v8818_v45   ;;  %1610 = vperm.xlu0 %4452, %v8819_v48   ;;  %v8827_v52 = vld [vmem:[#allocation111_spill] sm:$0xff]  ;;  %v8830_v48 = vld [vmem:[#allocation116_spill] sm:$0xff] }
 0x1f2   : > { %v5725_v42 = vpop.permute.xlu1 %1366  ;;  %v5727_v41 = vpop.permute.xlu0 %1370 }
 0x1f3   : > { %8820 = vst [vmem:[#allocation104_spill] sm:$0xff] %v5725_v42  ;;  %8821 = vst [vmem:[#allocation103_spill] sm:$0xff] %v5727_v41  ;;  %1614 = vperm.xlu1 %4453, %v8822_v44   ;;  %1618 = vperm.xlu0 %4452, %v8823_v50   ;;  %v8831_v42 = vld [vmem:[#allocation115_spill] sm:$0xff]  ;;  %v8834_v50 = vld [vmem:[#allocation120_spill] sm:$0xff] }
 0x1f6   : > { %v5731_v49 = vpop.permute.xlu1 %1374  ;;  %v5733_v43 = vpop.permute.xlu0 %1378 }
 0x1f7   : > { %8824 = vst [vmem:[#allocation108_spill] sm:$0xff] %v5731_v49  ;;  %8825 = vst [vmem:[#allocation107_spill] sm:$0xff] %v5733_v43  ;;  %1622 = vperm.xlu1 %4453, %v8826_v40   ;;  %1626 = vperm.xlu0 %4452, %v8827_v52   ;;  %v8835_v43 = vld [vmem:[#allocation119_spill] sm:$0xff]  ;;  %v8890_v49 = vld [vmem:[#allocation26_spill] sm:$0xff] }
 0x1fa   : > { %v5737_v51 = vpop.permute.xlu1 %1382  ;;  %v5739_v45 = vpop.permute.xlu0 %1386 }
 0x1fb   : > { %8828 = vst [vmem:[#allocation112_spill] sm:$0xff] %v5737_v51  ;;  %8829 = vst [vmem:[#allocation111_spill] sm:$0xff] %v5739_v45  ;;  %1630 = vperm.xlu1 %4453, %v8830_v48   ;;  %1634 = vperm.xlu0 %4452, %v8831_v42   ;;  %v8838_v51 = vld [vmem:[#allocation124_spill] sm:$0xff]  ;;  %v8839_v45 = vld [vmem:[#allocation123_spill] sm:$0xff] }
 0x1fe   : > { %v5743_v41 = vpop.permute.xlu1 %1390  ;;  %v5745_v44 = vpop.permute.xlu0 %1394 }
 0x1ff   : > { %8832 = vst [vmem:[#allocation116_spill] sm:$0xff] %v5743_v41  ;;  %8833 = vst [vmem:[#allocation115_spill] sm:$0xff] %v5745_v44  ;;  %1638 = vperm.xlu1 %4453, %v8834_v50   ;;  %1642 = vperm.xlu0 %4452, %v8835_v43   ;;  %v8842_v41 = vld [vmem:[#allocation128_spill] sm:$0xff]  ;;  %v8843_v44 = vld [vmem:[#allocation127_spill] sm:$0xff] }
 0x202   : > { %v5749_v40 = vpop.permute.xlu1 %1398  ;;  %v5751_v52 = vpop.permute.xlu0 %1402 }
 0x203   : > { %8836 = vst [vmem:[#allocation120_spill] sm:$0xff] %v5749_v40  ;;  %8837 = vst [vmem:[#allocation119_spill] sm:$0xff] %v5751_v52  ;;  %1646 = vperm.xlu1 %4453, %v8838_v51   ;;  %1650 = vperm.xlu0 %4452, %v8839_v45   ;;  %v8559_v40 = vmov 2   ;;  %v8846_v51 = vld [vmem:[#allocation132_spill] sm:$0xff] }
 0x204   : > { %v4480_v52 = vld [vmem:[%s4765_s17] sm:$0xff] }
 0x206   : > { %v5755_v48 = vpop.permute.xlu1 %1406  ;;  %v5757_v42 = vpop.permute.xlu0 %1410 }
 0x207   : > { %8840 = vst [vmem:[#allocation124_spill] sm:$0xff] %v5755_v48  ;;  %8841 = vst [vmem:[#allocation123_spill] sm:$0xff] %v5757_v42  ;;  %1654 = vperm.xlu1 %4453, %v8842_v41   ;;  %1658 = vperm.xlu0 %4452, %v8843_v44   ;;  %v8849_v42 = vld [vmem:[#allocation131_spill] sm:$0xff]  ;;  %v4481_v41 = vld [vmem:[%s4765_s17 + $0x40] sm:$0xff] }
 0x20a   : > { %v5761_v50 = vpop.permute.xlu1 %1414  ;;  %v5763_v43 = vpop.permute.xlu0 %1418 }
 0x20b   : > { %8844 = vst [vmem:[#allocation128_spill] sm:$0xff] %v5761_v50  ;;  %8845 = vst [vmem:[#allocation127_spill] sm:$0xff] %v5763_v43  ;;  %4454 = vset.pattern.permute.xlu1 %v8559_v40  ;;  %1662 = vperm.xlu0 %4452, %v8846_v51   ;;  %v4482_v40 = vld [vmem:[%s4765_s17 + $0x60] sm:$0xff] }
 0x20c   : > { %1954 = vperm.xlu1 %4454, %v4480_v52  }
 0x20e   : > { %v5768_v45 = vpop.permute.xlu1 %1422  ;;  %v5770_v48 = vpop.permute.xlu0 %1426 }
 0x20f   : > { %8847 = vst [vmem:[#allocation132_spill] sm:$0xff] %v5768_v45  ;;  %8848 = vst [vmem:[#allocation147_spill] sm:$0xff] %v5770_v48  ;;  %1666 = vperm.xlu0 %4452, %v8849_v42   ;;  %v8854_v48 = vld [vmem:[#allocation135_spill] sm:$0xff] }
 0x210   : > { %1986 = vperm.xlu1 %4454, %v4481_v41  }
 0x212   : > { %v5774_v44 = vpop.permute.xlu1 %1430  ;;  %v5776_v50 = vpop.permute.xlu0 %1434 }
 0x213   : > { %8850 = vst [vmem:[#allocation131_spill] sm:$0xff] %v5774_v44  ;;  %8851 = vst [vmem:[#allocation148_spill] sm:$0xff] %v5776_v50  ;;  %1670 = vperm.xlu0 %4452, %v5379_v59   ;;  %v8857_v50 = vmov 2   ;;  %v4483_v59 = vld [vmem:[%s4765_s17 + $0x20] sm:$0xff] }
 0x214   : > { %2002 = vperm.xlu1 %4454, %v4482_v40  }
 0x216   : > { %v5780_v52 = vpop.permute.xlu1 %1438  ;;  %v5782_v51 = vpop.permute.xlu0 %1442 }
 0x217   : > { %8852 = vst [vmem:[#allocation149_spill] sm:$0xff] %v5780_v52  ;;  %8853 = vst [vmem:[#allocation150_spill] sm:$0xff] %v5782_v51  ;;  %1674 = vperm.xlu0 %4452, %v8854_v48   ;;  %v4484_v48 = vld [vmem:[%s4765_s17 + $0x28] sm:$0xff] }
 0x218   : > { %2098 = vperm.xlu1 %4454, %v4915_v38   ;;  %v4485_v38 = vld [vmem:[%s4765_s17 + $0x100] sm:$0xff]  ;;  %v8879_v52 = vld [vmem:[#allocation17_spill] sm:$0xff] }
 0x21a   : > { %v5786_v42 = vpop.permute.xlu1 %1446  ;;  %v5788_v41 = vpop.permute.xlu0 %1450 }
 0x21b   : > { %8855 = vst [vmem:[#allocation135_spill] sm:$0xff] %v5786_v42  ;;  %8856 = vst [vmem:[#allocation151_spill] sm:$0xff] %v5788_v41  ;;  %4461 = vset.pattern.permute.xlu0 %v8857_v50  ;;  %v4486_v50 = vld [vmem:[%s4765_s17 + $0x68] sm:$0xff] }
 0x21c   : > { %2130 = vperm.xlu1 %4454, %v4947_v46   ;;  %1970 = vperm.xlu0 %4461, %v4483_v59   ;;  %v4487_v46 = vld [vmem:[%s4765_s17 + $0x140] sm:$0xff] }
 0x21e   : > { %v5793_v40 = vpop.permute.xlu1 %1454  ;;  %v5795_v51 = vpop.permute.xlu0 %1458 }
 0x21f   : > { %8858 = vst [vmem:[#allocation152_spill] sm:$0xff] %v5793_v40  ;;  %8859 = vst [vmem:[#allocation153_spill] sm:$0xff] %v5795_v51  ;;  %v4488_v51 = vld [vmem:[%s4765_s17 + $0xa0] sm:$0xff] }
 0x220   : > { %1974 = vperm.xlu1 %4454, %v4484_v48   ;;  %2082 = vperm.xlu0 %4461, %v4485_v38   ;;  %v4489_v48 = vld [vmem:[%s4765_s17 + $0x8] sm:$0xff] }
 0x222   : > { %v5799_v42 = vpop.permute.xlu1 %1462  ;;  %v5801_v41 = vpop.permute.xlu0 %1466 }
 0x223   : > { %8860 = vst [vmem:[#allocation154_spill] sm:$0xff] %v5799_v42  ;;  %8861 = vst [vmem:[#allocation155_spill] sm:$0xff] %v5801_v41  ;;  %v4490_v41 = vld [vmem:[%s4765_s17 + $0x128] sm:$0xff] }
 0x224   : > { %2006 = vperm.xlu1 %4454, %v4486_v50   ;;  %2114 = vperm.xlu0 %4461, %v4487_v46   ;;  %v4491_v50 = vld [vmem:[%s4765_s17 + $0x48] sm:$0xff] }
 0x226   : > { %v5805_v59 = vpop.permute.xlu1 %1470  ;;  %v5807_v40 = vpop.permute.xlu0 %1474 }
 0x227   : > { %8862 = vst [vmem:[#allocation156_spill] sm:$0xff] %v5805_v59  ;;  %8863 = vst [vmem:[#allocation157_spill] sm:$0xff] %v5807_v40  ;;  %v4492_v40 = vld [vmem:[%s4765_s17 + $0x168] sm:$0xff] }
 0x228   : > { %2034 = vperm.xlu1 %4454, %v4488_v51   ;;  %1958 = vperm.xlu0 %4461, %v4489_v48   ;;  %v4493_v51 = vld [vmem:[%s4765_s17 + $0x80] sm:$0xff] }
 0x22a   : > { %v5811_v38 = vpop.permute.xlu1 %1478  ;;  %v5813_v42 = vpop.permute.xlu0 %1482 }
 0x22b   : > { %8864 = vst [vmem:[#allocation158_spill] sm:$0xff] %v5811_v38  ;;  %8865 = vst [vmem:[#allocation159_spill] sm:$0xff] %v5813_v42 }
 0x22c   : > { %2102 = vperm.xlu1 %4454, %v4490_v41   ;;  %1990 = vperm.xlu0 %4461, %v4491_v50   ;;  %v4494_v41 = vld [vmem:[%s4765_s17 + $0x108] sm:$0xff]  ;;  %v1049_v50 = vlaneseq }
 0x22e   : > { %v5817_v46 = vpop.permute.xlu1 %1486  ;;  %v5819_v59 = vpop.permute.xlu0 %1490 }
 0x22f   : > { %8866 = vst [vmem:[#allocation160_spill] sm:$0xff] %v5817_v46  ;;  %8867 = vst [vmem:[#allocation161_spill] sm:$0xff] %v5819_v59  ;;  %v4495_v59 = vld [vmem:[%s4765_s17 + $0x30] sm:$0xff] }
 0x230   : > { %2134 = vperm.xlu1 %4454, %v4492_v40   ;;  %2018 = vperm.xlu0 %4461, %v4493_v51   ;;  %v4496_v40 = vld [vmem:[%s4765_s17 + $0x148] sm:$0xff]  ;;  %v5835_v51 = vshrl.u32 %v1049_v50, 7  ;;  %v5851_v50 = vld [vmem:[%s8478_s1] sm:$0x7] }
 0x232   : > { %v5823_v48 = vpop.permute.xlu1 %1494  ;;  %v5825_v38 = vpop.permute.xlu0 %1498  ;;  %8872 = vst [vmem:[#allocation166_spill] sm:$0xff] %v5835_v51 }
 0x233   : > { %8868 = vst [vmem:[#allocation162_spill] sm:$0xff] %v5823_v48  ;;  %8869 = vst [vmem:[#allocation163_spill] sm:$0xff] %v5825_v38 }
 0x234   : > { %2162 = vperm.xlu1 %4454, %v8710_v47   ;;  %2086 = vperm.xlu0 %4461, %v4494_v41   ;;  %v4497_v47 = vld [vmem:[%s4765_s17 + $0x70] sm:$0xff]  ;;  %v4498_v41 = vld [vmem:[%s4765_s17 + $0x180] sm:$0xff] }
 0x236   : > { %v5829_v42 = vpop.permute.xlu1 %1502  ;;  %v5831_v46 = vpop.permute.xlu0 %1506 }
 0x237   : > { %8870 = vst [vmem:[#allocation164_spill] sm:$0xff] %v5829_v42  ;;  %8871 = vst [vmem:[#allocation165_spill] sm:$0xff] %v5831_v46  ;;  %v1051_v46 = vsub.s32 0, %v5835_v51 }
 0x238   : > { %1978 = vperm.xlu1 %4454, %v4495_v59   ;;  %2118 = vperm.xlu0 %4461, %v4496_v40   ;;  %v4499_v40 = vld [vmem:[%s4765_s17 + $0xa8] sm:$0xff] }
 0x23a   : > { %v5837_v48 = vpop.permute.xlu1 %1510  ;;  %v5839_v38 = vpop.permute.xlu0 %1514 }
 0x23b   : > { %8873 = vst [vmem:[#allocation167_spill] sm:$0xff] %v5837_v48  ;;  %8874 = vst [vmem:[#allocation168_spill] sm:$0xff] %v5839_v38  ;;  %v4500_v38 = vld [vmem:[%s4765_s17 + $0x10] sm:$0xff] }
 0x23c   : > { %2010 = vperm.xlu1 %4454, %v4497_v47   ;;  %2146 = vperm.xlu0 %4461, %v4498_v41   ;;  %v5856_v47 = vrot.slane %v5851_v50, %v1051_v46 }
 0x23e   : > { %v5844_v42 = vpop.permute.xlu1 %1518  ;;  %v5846_v59 = vpop.permute.xlu0 %1522  ;;  %v5866_v44 = vmul.f32 %v5856_v47, %v8879_v52 }
 0x23f   : > { %8875 = vst [vmem:[#allocation169_spill] sm:$0xff] %v5844_v42  ;;  %8876 = vst [vmem:[#allocation170_spill] sm:$0xff] %v5846_v59  ;;  %v4501_v42 = vld [vmem:[%s4765_s17 + $0xe0] sm:$0xff]  ;;  %v4502_v59 = vld [vmem:[%s4765_s17 + $0x50] sm:$0xff] }
 0x240   : > { %2038 = vperm.xlu1 %4454, %v4499_v40   ;;  %1962 = vperm.xlu0 %4461, %v4500_v38   ;;  %8880 = vst [vmem:[#allocation17_spill] sm:$0xff] %v5866_v44  ;;  %v8881_v40 = vld [vmem:[#allocation18_spill] sm:$0xff]  ;;  %v8892_v44 = vld [vmem:[#allocation29_spill] sm:$0xff] }
 0x241   : > { %v5870_v38 = vmul.f32 %v5856_v47, %v8881_v40  ;;  %v5890_v40 = vmul.f32 %v5856_v47, %v8890_v49 }
 0x242   : > { %v5858_v48 = vpop.permute.xlu1 %1526  ;;  %v5860_v41 = vpop.permute.xlu0 %1530 }
 0x243   : > { %8877 = vst [vmem:[#allocation171_spill] sm:$0xff] %v5858_v48  ;;  %8878 = vst [vmem:[#allocation172_spill] sm:$0xff] %v5860_v41  ;;  %v8885_v48 = vld [vmem:[#allocation21_spill] sm:$0xff] }
 0x244   : > { %2066 = vperm.xlu1 %4454, %v4501_v42   ;;  %1994 = vperm.xlu0 %4461, %v4502_v59   ;;  %8882 = vst [vmem:[#allocation18_spill] sm:$0xff] %v5870_v38  ;;  %v5878_v41 = vmul.f32 %v5856_v47, %v8885_v48  ;;  %v8887_v42 = vld [vmem:[#allocation22_spill] sm:$0xff]  ;;  %v8888_v59 = vld [vmem:[#allocation25_spill] sm:$0xff] }
 0x245   : > { %v5882_v43 = vmul.f32 %v5856_v47, %v8887_v42  ;;  %v5886_v52 = vmul.f32 %v5856_v47, %v8888_v59  ;;  %8891 = vst [vmem:[#allocation25_spill] sm:$0xff] %v5890_v40  ;;  %v4503_v38 = vld [vmem:[%s4765_s17 + $0x130] sm:$0xff]  ;;  %v4504_v59 = vld [vmem:[%s4765_s17 + $0x88] sm:$0xff] }
 0x246   : > { %v5872_v46 = vpop.permute.xlu1 %1534  ;;  %v5874_v45 = vpop.permute.xlu0 %1538  ;;  %8886 = vst [vmem:[#allocation21_spill] sm:$0xff] %v5878_v41  ;;  %v8896_v41 = vld [vmem:[#allocation33_spill] sm:$0xff] }
 0x247   : > { %8883 = vst [vmem:[#allocation173_spill] sm:$0xff] %v5872_v46  ;;  %8884 = vst [vmem:[#allocation174_spill] sm:$0xff] %v5874_v45  ;;  %v5894_v46 = vmul.f32 %v5856_v47, %v8892_v44  ;;  %v8894_v45 = vld [vmem:[#allocation30_spill] sm:$0xff]  ;;  %v5902_v42 = vmul.f32 %v5856_v47, %v8896_v41  ;;  %v8900_v40 = vld [vmem:[#allocation37_spill] sm:$0xff] }
 0x248   : > { %8889 = vst [vmem:[#allocation22_spill] sm:$0xff] %v5886_v52  ;;  %v5898_v48 = vmul.f32 %v5856_v47, %v8894_v45  ;;  %2106 = vperm.xlu1 %4454, %v4503_v38   ;;  %2022 = vperm.xlu0 %4461, %v4504_v59   ;;  %v8898_v52 = vld [vmem:[#allocation34_spill] sm:$0xff]  ;;  %v5912_v44 = vmul.f32 %v5856_v47, %v8900_v40 }
 0x249   : > { %8893 = vst [vmem:[#allocation26_spill] sm:$0xff] %v5894_v46  ;;  %8897 = vst [vmem:[#allocation30_spill] sm:$0xff] %v5902_v42  ;;  %v5908_v49 = vmul.f32 %v5856_v47, %v8898_v52  ;;  %v8902_v46 = vld [vmem:[#allocation38_spill] sm:$0xff]  ;;  %v8908_v52 = vld [vmem:[#allocation45_spill] sm:$0xff] }
 0x24a   : > { %8895 = vst [vmem:[#allocation29_spill] sm:$0xff] %v5898_v48  ;;  %8901 = vst [vmem:[#allocation34_spill] sm:$0xff] %v5912_v44  ;;  %v5916_v45 = vmul.f32 %v5856_v47, %v8902_v46  ;;  %v8904_v48 = vld [vmem:[#allocation41_spill] sm:$0xff]  ;;  %v8906_v38 = vld [vmem:[#allocation42_spill] sm:$0xff]  ;;  %v5928_v42 = vmul.f32 %v5856_v47, %v8908_v52 }
 0x24b   : > { %8899 = vst [vmem:[#allocation33_spill] sm:$0xff] %v5908_v49  ;;  %v5920_v41 = vmul.f32 %v5856_v47, %v8904_v48  ;;  %v5924_v59 = vmul.f32 %v5856_v47, %v8906_v38  ;;  %v8910_v40 = vld [vmem:[#allocation46_spill] sm:$0xff]  ;;  %v8912_v49 = vld [vmem:[#allocation49_spill] sm:$0xff]  ;;  %v5940_v48 = vpop.permute.xlu0 %1546 }
 0x24c   : > { %8903 = vst [vmem:[#allocation37_spill] sm:$0xff] %v5916_v45  ;;  %8909 = vst [vmem:[#allocation42_spill] sm:$0xff] %v5928_v42  ;;  %v5932_v44 = vmul.f32 %v5856_v47, %v8910_v40  ;;  %v5936_v46 = vmul.f32 %v5856_v47, %v8912_v49  ;;  %v5938_v45 = vpop.permute.xlu1 %1542  ;;  %v8920_v42 = vld [vmem:[#allocation54_spill] sm:$0xff] }
 0x24d   : > { %8905 = vst [vmem:[#allocation38_spill] sm:$0xff] %v5920_v41  ;;  %8907 = vst [vmem:[#allocation41_spill] sm:$0xff] %v5924_v59  ;;  %v8916_v41 = vld [vmem:[#allocation50_spill] sm:$0xff]  ;;  %v8918_v59 = vld [vmem:[#allocation53_spill] sm:$0xff]  ;;  %v5952_v40 = vmul.f32 %v5856_v47, %v8920_v42 }
 0x24e   : > { %8911 = vst [vmem:[#allocation45_spill] sm:$0xff] %v5932_v44  ;;  %8913 = vst [vmem:[#allocation46_spill] sm:$0xff] %v5936_v46  ;;  %v5944_v38 = vmul.f32 %v5856_v47, %v8916_v41  ;;  %v5948_v52 = vmul.f32 %v5856_v47, %v8918_v59  ;;  %v8922_v44 = vld [vmem:[#allocation57_spill] sm:$0xff]  ;;  %v8924_v46 = vld [vmem:[#allocation58_spill] sm:$0xff] }
 0x24f   : > { %8914 = vst [vmem:[#allocation49_spill] sm:$0xff] %v5938_v45  ;;  %8915 = vst [vmem:[#allocation175_spill] sm:$0xff] %v5940_v48  ;;  %v5956_v49 = vmul.f32 %v5856_v47, %v8922_v44  ;;  %v5960_v45 = vmul.f32 %v5856_v47, %v8924_v46  ;;  %v8926_v48 = vld [vmem:[#allocation61_spill] sm:$0xff]  ;;  %v4506_v42 = vld [vmem:[%s4765_s17 + $0xc0] sm:$0xff] }
 0x250   : > { %8917 = vst [vmem:[#allocation50_spill] sm:$0xff] %v5944_v38  ;;  %8919 = vst [vmem:[#allocation53_spill] sm:$0xff] %v5948_v52  ;;  %v5964_v41 = vmul.f32 %v5856_v47, %v8926_v48  ;;  %v8928_v38 = vld [vmem:[#allocation62_spill] sm:$0xff]  ;;  %2050 = vperm.xlu0 %4461, %v4506_v42  }
 0x251   : > { %8921 = vst [vmem:[#allocation54_spill] sm:$0xff] %v5952_v40  ;;  %8923 = vst [vmem:[#allocation57_spill] sm:$0xff] %v5956_v49  ;;  %v5968_v59 = vmul.f32 %v5856_v47, %v8928_v38  ;;  %v4505_v52 = vld [vmem:[%s4765_s17 + $0x170] sm:$0xff]  ;;  %v8930_v40 = vld [vmem:[#allocation65_spill] sm:$0xff] }
 0x252   : > { %8925 = vst [vmem:[#allocation58_spill] sm:$0xff] %v5960_v45  ;;  %8927 = vst [vmem:[#allocation61_spill] sm:$0xff] %v5964_v41  ;;  %2138 = vperm.xlu1 %4454, %v4505_v52   ;;  %v5974_v44 = vmul.f32 %v5856_v47, %v8930_v40  ;;  %v8932_v49 = vld [vmem:[#allocation66_spill] sm:$0xff]  ;;  %v8934_v45 = vld [vmem:[#allocation69_spill] sm:$0xff] }
 0x253   : > { %8929 = vst [vmem:[#allocation62_spill] sm:$0xff] %v5968_v59  ;;  %v5978_v46 = vmul.f32 %v5856_v47, %v8932_v49  ;;  %v5982_v48 = vmul.f32 %v5856_v47, %v8934_v45  ;;  %v8936_v41 = vld [vmem:[#allocation70_spill] sm:$0xff]  ;;  %v8938_v52 = vld [vmem:[#allocation73_spill] sm:$0xff] }
 0x254   : > { %8931 = vst [vmem:[#allocation65_spill] sm:$0xff] %v5974_v44  ;;  %v5986_v38 = vmul.f32 %v5856_v47, %v8936_v41  ;;  %v5990_v42 = vmul.f32 %v5856_v47, %v8938_v52  ;;  %v8940_v40 = vld [vmem:[#allocation74_spill] sm:$0xff]  ;;  %v8942_v49 = vld [vmem:[#allocation77_spill] sm:$0xff]  ;;  %v6006_v41 = vpop.permute.xlu0 %1554 }
 0x255   : > { %8933 = vst [vmem:[#allocation66_spill] sm:$0xff] %v5978_v46  ;;  %8935 = vst [vmem:[#allocation69_spill] sm:$0xff] %v5982_v48  ;;  %v5994_v44 = vmul.f32 %v5856_v47, %v8940_v40  ;;  %v5998_v46 = vmul.f32 %v5856_v47, %v8942_v49  ;;  %v8944_v59 = vld [vmem:[#allocation78_spill] sm:$0xff]  ;;  %v6004_v48 = vpop.permute.xlu1 %1550 }
 0x256   : > { %8937 = vst [vmem:[#allocation70_spill] sm:$0xff] %v5986_v38  ;;  %8939 = vst [vmem:[#allocation73_spill] sm:$0xff] %v5990_v42  ;;  %v6002_v45 = vmul.f32 %v5856_v47, %v8944_v59  ;;  %v8948_v38 = vld [vmem:[#allocation81_spill] sm:$0xff]  ;;  %v8950_v42 = vld [vmem:[#allocation82_spill] sm:$0xff] }
 0x257   : > { %8941 = vst [vmem:[#allocation74_spill] sm:$0xff] %v5994_v44  ;;  %8943 = vst [vmem:[#allocation77_spill] sm:$0xff] %v5998_v46  ;;  %v6010_v52 = vmul.f32 %v5856_v47, %v8948_v38  ;;  %v6014_v40 = vmul.f32 %v5856_v47, %v8950_v42  ;;  %v8952_v44 = vld [vmem:[#allocation85_spill] sm:$0xff]  ;;  %v8954_v46 = vld [vmem:[#allocation86_spill] sm:$0xff] }
 0x258   : > { %8945 = vst [vmem:[#allocation78_spill] sm:$0xff] %v6002_v45  ;;  %8946 = vst [vmem:[#allocation176_spill] sm:$0xff] %v6004_v48  ;;  %v6018_v49 = vmul.f32 %v5856_v47, %v8952_v44  ;;  %v6022_v59 = vmul.f32 %v5856_v47, %v8954_v46  ;;  %v8956_v45 = vld [vmem:[#allocation89_spill] sm:$0xff]  ;;  %v4508_v44 = vld [vmem:[%s4765_s17 + $0x110] sm:$0xff] }
 0x259   : > { %8947 = vst [vmem:[#allocation177_spill] sm:$0xff] %v6006_v41  ;;  %8949 = vst [vmem:[#allocation81_spill] sm:$0xff] %v6010_v52  ;;  %v6026_v48 = vmul.f32 %v5856_v47, %v8956_v45  ;;  %v8958_v41 = vld [vmem:[#allocation90_spill] sm:$0xff]  ;;  %v8960_v52 = vld [vmem:[#allocation93_spill] sm:$0xff]  ;;  %2090 = vperm.xlu0 %4461, %v4508_v44  }
 0x25a   : > { %8951 = vst [vmem:[#allocation82_spill] sm:$0xff] %v6014_v40  ;;  %8953 = vst [vmem:[#allocation85_spill] sm:$0xff] %v6018_v49  ;;  %v6030_v38 = vmul.f32 %v5856_v47, %v8958_v41  ;;  %v6034_v42 = vmul.f32 %v5856_v47, %v8960_v52  ;;  %v4507_v40 = vld [vmem:[%s4765_s17 + $0x1a8] sm:$0xff]  ;;  %v8962_v49 = vld [vmem:[#allocation94_spill] sm:$0xff] }
 0x25b   : > { %8955 = vst [vmem:[#allocation86_spill] sm:$0xff] %v6022_v59  ;;  %8957 = vst [vmem:[#allocation89_spill] sm:$0xff] %v6026_v48  ;;  %2166 = vperm.xlu1 %4454, %v4507_v40   ;;  %v6040_v46 = vmul.f32 %v5856_v47, %v8962_v49  ;;  %v8964_v59 = vld [vmem:[#allocation97_spill] sm:$0xff]  ;;  %v8966_v48 = vld [vmem:[#allocation98_spill] sm:$0xff] }
 0x25c   : > { %8959 = vst [vmem:[#allocation90_spill] sm:$0xff] %v6030_v38  ;;  %8961 = vst [vmem:[#allocation93_spill] sm:$0xff] %v6034_v42  ;;  %v6044_v45 = vmul.f32 %v5856_v47, %v8964_v59  ;;  %v6048_v41 = vmul.f32 %v5856_v47, %v8966_v48  ;;  %v8968_v38 = vld [vmem:[#allocation101_spill] sm:$0xff]  ;;  %v8970_v40 = vld [vmem:[#allocation102_spill] sm:$0xff] }
 0x25d   : > { %8963 = vst [vmem:[#allocation94_spill] sm:$0xff] %v6040_v46  ;;  %v6052_v52 = vmul.f32 %v5856_v47, %v8968_v38  ;;  %v6056_v44 = vmul.f32 %v5856_v47, %v8970_v40  ;;  %v8972_v49 = vld [vmem:[#allocation105_spill] sm:$0xff]  ;;  %v8974_v59 = vld [vmem:[#allocation106_spill] sm:$0xff]  ;;  %v6072_v38 = vpop.permute.xlu0 %1562 }
 0x25e   : > { %8965 = vst [vmem:[#allocation97_spill] sm:$0xff] %v6044_v45  ;;  %8967 = vst [vmem:[#allocation98_spill] sm:$0xff] %v6048_v41  ;;  %v6060_v42 = vmul.f32 %v5856_v47, %v8972_v49  ;;  %v6064_v45 = vmul.f32 %v5856_v47, %v8974_v59  ;;  %v8976_v46 = vld [vmem:[#allocation109_spill] sm:$0xff]  ;;  %v6070_v41 = vpop.permute.xlu1 %1558 }
 0x25f   : > { %8969 = vst [vmem:[#allocation101_spill] sm:$0xff] %v6052_v52  ;;  %8971 = vst [vmem:[#allocation102_spill] sm:$0xff] %v6056_v44  ;;  %v6068_v48 = vmul.f32 %v5856_v47, %v8976_v46  ;;  %v8980_v52 = vld [vmem:[#allocation110_spill] sm:$0xff]  ;;  %v8982_v44 = vld [vmem:[#allocation113_spill] sm:$0xff] }
 0x260   : > { %8973 = vst [vmem:[#allocation105_spill] sm:$0xff] %v6060_v42  ;;  %8975 = vst [vmem:[#allocation106_spill] sm:$0xff] %v6064_v45  ;;  %v6076_v40 = vmul.f32 %v5856_v47, %v8980_v52  ;;  %v6080_v49 = vmul.f32 %v5856_v47, %v8982_v44  ;;  %v8984_v42 = vld [vmem:[#allocation114_spill] sm:$0xff]  ;;  %v1695_v45 = vsub.s32 1, %v5835_v51  ;;  %v8986_v46 = vld [vmem:[#allocation117_spill] sm:$0xff] }
 0x261   : > { %8977 = vst [vmem:[#allocation109_spill] sm:$0xff] %v6068_v48  ;;  %8978 = vst [vmem:[#allocation178_spill] sm:$0xff] %v6070_v41  ;;  %v6084_v59 = vmul.f32 %v5856_v47, %v8984_v42  ;;  %v6089_v48 = vmul.f32 %v5856_v47, %v8986_v46  ;;  %v8988_v41 = vld [vmem:[#allocation118_spill] sm:$0xff]  ;;  %v8990_v52 = vld [vmem:[#allocation121_spill] sm:$0xff] }
 0x262   : > { %8979 = vst [vmem:[#allocation179_spill] sm:$0xff] %v6072_v38  ;;  %8981 = vst [vmem:[#allocation110_spill] sm:$0xff] %v6076_v40  ;;  %v6093_v38 = vmul.f32 %v5856_v47, %v8988_v41  ;;  %v6097_v40 = vmul.f32 %v5856_v47, %v8990_v52  ;;  %v4509_v44 = vld [vmem:[%s4765_s17 + $0x1e0] sm:$0xff]  ;;  %v8992_v42 = vld [vmem:[#allocation122_spill] sm:$0xff] }
 0x263   : > { %8983 = vst [vmem:[#allocation113_spill] sm:$0xff] %v6080_v49  ;;  %8985 = vst [vmem:[#allocation114_spill] sm:$0xff] %v6084_v59  ;;  %2194 = vperm.xlu1 %4454, %v4509_v44   ;;  %v4510_v49 = vld [vmem:[%s4765_s17 + $0x150] sm:$0xff]  ;;  %v6103_v59 = vmul.f32 %v5856_v47, %v8992_v42  ;;  %v8994_v51 = vld [vmem:[#allocation125_spill] sm:$0xff] }
 0x264   : > { %8987 = vst [vmem:[#allocation117_spill] sm:$0xff] %v6089_v48  ;;  %8989 = vst [vmem:[#allocation118_spill] sm:$0xff] %v6093_v38  ;;  %2122 = vperm.xlu0 %4461, %v4510_v49   ;;  %v6107_v46 = vmul.f32 %v5856_v47, %v8994_v51  ;;  %v8996_v48 = vld [vmem:[#allocation126_spill] sm:$0xff]  ;;  %v8998_v38 = vld [vmem:[#allocation129_spill] sm:$0xff] }
 0x265   : > { %8991 = vst [vmem:[#allocation121_spill] sm:$0xff] %v6097_v40  ;;  %8993 = vst [vmem:[#allocation122_spill] sm:$0xff] %v6103_v59  ;;  %v6111_v41 = vmul.f32 %v5856_v47, %v8996_v48  ;;  %v6115_v52 = vmul.f32 %v5856_v47, %v8998_v38  ;;  %v9000_v44 = vld [vmem:[#allocation130_spill] sm:$0xff]  ;;  %v9001_v42 = vld [vmem:[#allocation133_spill] sm:$0xff]  ;;  %v6135_v38 = vpop.permute.xlu0 %1570 }
 0x266   : > { %8995 = vst [vmem:[#allocation125_spill] sm:$0xff] %v6107_v46  ;;  %v6119_v49 = vmul.f32 %v5856_v47, %v9000_v44  ;;  %v6123_v40 = vmul.f32 %v5856_v47, %v9001_v42  ;;  %v9003_v51 = vld [vmem:[#allocation134_spill] sm:$0xff]  ;;  %v9004_v59 = vld [vmem:[#allocation136_spill] sm:$0xff]  ;;  %v6143_v42 = vmul.f32 %v5856_v47, %v5389_v61  ;;  %v4511_v61 = vld [vmem:[%s4765_s17 + $0x38] sm:$0xff] }
 0x267   : > { %8997 = vst [vmem:[#allocation126_spill] sm:$0xff] %v6111_v41  ;;  %8999 = vst [vmem:[#allocation129_spill] sm:$0xff] %v6115_v52  ;;  %v6127_v46 = vmul.f32 %v5856_v47, %v9003_v51  ;;  %v6131_v48 = vmul.f32 %v5856_v47, %v9004_v59  ;;  %v6133_v41 = vpop.permute.xlu1 %1566  ;;  %v9007_v52 = vld [vmem:[#allocation137_spill] sm:$0xff]  ;;  %v6147_v51 = vmul.f32 %v5856_v47, %v5391_v56  ;;  %1982 = vperm.xlu1 %4454, %v4511_v61  }
 0x268   : > { %9002 = vst [vmem:[#allocation130_spill] sm:$0xff] %v6123_v40  ;;  %9005 = vst [vmem:[#allocation133_spill] sm:$0xff] %v6133_v41  ;;  %v6139_v44 = vmul.f32 %v5856_v47, %v9007_v52  ;;  %v6150_v40 = vrot.slane %v5851_v50, %v1695_v45  ;;  %v6154_v59 = vmul.f32 %v5856_v47, %v5395_v53  ;;  %v4512_v41 = vld [vmem:[%s4765_s17 + $0x188] sm:$0xff] }
 0x269   : > { %9006 = vst [vmem:[#allocation134_spill] sm:$0xff] %v6135_v38  ;;  %v6158_v38 = vmul.f32 %v5856_v47, %v5397_v54  ;;  %v6162_v52 = vmul.f32 %v5856_v47, %v5399_v63  ;;  %2150 = vperm.xlu0 %4461, %v4512_v41   ;;  %v6168_v56 = vmul.f32 %v5856_v47, %v5401_v0 }
 0x26a   : > { %v6172_v53 = vmul.f32 %v5856_v47, %v5407_v55  ;;  %v6176_v54 = vmul.f32 %v5856_v47, %v5409_v62  ;;  %v6180_v63 = vmul.f32 %v5856_v47, %v5413_v58  ;;  %v6184_v45 = vmul.f32 %v5856_v47, %v5415_v60  ;;  %v6200_v58 = vpop.permute.xlu0 %1578 }
 0x26b   : > { %v6188_v0 = vmul.f32 %v5856_v47, %v5419_v57  ;;  %v6192_v55 = vmul.f32 %v5856_v47, %v5421_v4  ;;  %v6196_v62 = vmul.f32 %v5856_v47, %v5425_v2  ;;  %v6198_v41 = vpop.permute.xlu1 %1574  ;;  %9008 = vst [vmem:[#allocation136_spill] sm:$0xff] %v6200_v58  ;;  %v6204_v60 = vmul.f32 %v5856_v47, %v5427_v1  ;;  %v4513_v58 = vld [vmem:[%s4765_s17 + $0x78] sm:$0xff] }
 0x26c   : > { %v6208_v57 = vmul.f32 %v5856_v47, %v5431_v3  ;;  %v6212_v4 = vmul.f32 %v5856_v47, %v5433_v6  ;;  %v6216_v2 = vmul.f32 %v5856_v47, %v5437_v5  ;;  %v6220_v61 = vmul.f32 %v5856_v47, %v5439_v8  ;;  %2014 = vperm.xlu1 %4454, %v4513_v58   ;;  %v4514_v6 = vld [vmem:[%s4765_s17 + $0x1c0] sm:$0xff] }
 0x26d   : > { %v6224_v1 = vmul.f32 %v5856_v47, %v5443_v7  ;;  %v6228_v3 = vmul.f32 %v5856_v47, %v5445_v10  ;;  %2178 = vperm.xlu0 %4461, %v4514_v6   ;;  %v6234_v5 = vmul.f32 %v5856_v47, %v5449_v9  ;;  %v6238_v8 = vmul.f32 %v5856_v47, %v5451_v12 }
 0x26e   : > { %v6242_v7 = vmul.f32 %v5856_v47, %v5455_v11  ;;  %v6246_v10 = vmul.f32 %v5856_v47, %v5457_v14  ;;  %v6250_v58 = vmul.f32 %v5856_v47, %v5461_v13  ;;  %v6254_v9 = vmul.f32 %v5856_v47, %v5463_v16  ;;  %v6266_v14 = vpop.permute.xlu0 %1586 }
 0x26f   : > { %v6258_v12 = vmul.f32 %v5856_v47, %v5467_v15  ;;  %v6262_v11 = vmul.f32 %v5856_v47, %v5469_v18  ;;  %v6264_v6 = vpop.permute.xlu1 %1582  ;;  %9010 = vst [vmem:[#allocation180_spill] sm:$0xff] %v6266_v14  ;;  %v6270_v13 = vmul.f32 %v5856_v47, %v5473_v17  ;;  %v6274_v16 = vmul.f32 %v5856_v47, %v5475_v20  ;;  %v4515_v14 = vld [vmem:[%s4765_s17 + $0xb0] sm:$0xff] }
 0x270   : > { %9009 = vst [vmem:[#allocation137_spill] sm:$0xff] %v6264_v6  ;;  %v6278_v15 = vmul.f32 %v5856_v47, %v5479_v19  ;;  %v6282_v18 = vmul.f32 %v5856_v47, %v5481_v22  ;;  %v6286_v6 = vmul.f32 %v5856_v47, %v5485_v21  ;;  %v6290_v17 = vmul.f32 %v5856_v47, %v5487_v24  ;;  %v4516_v19 = vld [vmem:[%s4765_s17 + $0x18] sm:$0xff] }
 0x271   : > { %v6294_v20 = vmul.f32 %v5856_v47, %v5491_v23  ;;  %2042 = vperm.xlu1 %4454, %v4515_v14   ;;  %1966 = vperm.xlu0 %4461, %v4516_v19   ;;  %v6300_v22 = vmul.f32 %v5856_v47, %v5493_v26  ;;  %v6304_v21 = vmul.f32 %v5856_v47, %v5497_v25  ;;  %v9019_v25 = vld [vmem:[#allocation138_spill] sm:$0xff] }
 0x272   : > { %9011 = vst [vmem:[#allocation181_spill] sm:$0xff] %v6286_v6  ;;  %v6308_v24 = vmul.f32 %v5856_v47, %v5499_v28  ;;  %v6312_v23 = vmul.f32 %v5856_v47, %v5503_v27  ;;  %v6316_v14 = vmul.f32 %v5856_v47, %v5505_v30  ;;  %v6320_v26 = vmul.f32 %v5856_v47, %v5509_v29  ;;  %v6332_v27 = vpop.permute.xlu0 %1594 }
 0x273   : > { %9012 = vst [vmem:[#allocation182_spill] sm:$0xff] %v6294_v20  ;;  %9013 = vst [vmem:[#allocation183_spill] sm:$0xff] %v6300_v22  ;;  %v6324_v19 = vmul.f32 %v5856_v47, %v9019_v25  ;;  %v6328_v28 = vmul.f32 %v5856_v47, %v5515_v31  ;;  %v6336_v30 = vmul.f32 %v5856_v47, %v5517_v34 }
 0x274   : > { %9014 = vst [vmem:[#allocation184_spill] sm:$0xff] %v6304_v21  ;;  %9015 = vst [vmem:[#allocation185_spill] sm:$0xff] %v6308_v24  ;;  %v6330_v21 = vpop.permute.xlu1 %1590  ;;  %v6340_v29 = vmul.f32 %v5856_v47, %v5521_v33  ;;  %v6344_v25 = vmul.f32 %v5856_v47, %v5523_v36  ;;  %v6348_v31 = vmul.f32 %v5856_v47, %v5527_v35  ;;  %v4518_v36 = vld [vmem:[%s4765_s17 + $0x58] sm:$0xff]  ;;  %v9065_v24 = vld [vmem:[#allocation12_spill] sm:$0xff] }
 0x275   : > { %9016 = vst [vmem:[#allocation186_spill] sm:$0xff] %v6312_v23  ;;  %9017 = vst [vmem:[#allocation187_spill] sm:$0xff] %v6316_v14  ;;  %v6356_v34 = vmul.f32 %v5856_v47, %v5533_v37  ;;  %1998 = vperm.xlu0 %4461, %v4518_v36   ;;  %v6366_v35 = vmul.f32 %v5856_v47, %v5539_v39  ;;  %v9040_v39 = vld [vmem:[#allocation144_spill] sm:$0xff]  ;;  %v9057_v23 = vld [vmem:[#allocation15_spill] sm:$0xff] }
 0x276   : > { %9018 = vst [vmem:[#allocation188_spill] sm:$0xff] %v6320_v26  ;;  %9020 = vst [vmem:[#allocation138_spill] sm:$0xff] %v6324_v19  ;;  %v9056_v26 = vld [vmem:[#allocation16_spill] sm:$0xff]  ;;  %v9060_v14 = vld [vmem:[#allocation10_spill] sm:$0xff] }
 0x277   : > { %9021 = vst [vmem:[#allocation189_spill] sm:$0xff] %v6328_v28  ;;  %9022 = vst [vmem:[#allocation190_spill] sm:$0xff] %v6332_v27  ;;  %v6352_v28 = vmul.f32 %v5856_v47, %v5529_v32  ;;  %v1699_v19 = vmul.f32 %v6150_v40, %v9056_v26  ;;  %v9064_v26 = vld [vmem:[#allocation20_spill] sm:$0xff]  ;;  %v9078_v27 = vld [vmem:[#allocation17_spill] sm:$0xff] }
 0x278   : > { %9023 = vst [vmem:[#allocation191_spill] sm:$0xff] %v6336_v30  ;;  %9024 = vst [vmem:[#allocation192_spill] sm:$0xff] %v6340_v29  ;;  %v9029_v30 = vld [vmem:[#allocation139_spill] sm:$0xff]  ;;  %v4517_v29 = vld [vmem:[%s4765_s17 + $0xe8] sm:$0xff] }
 0x279   : > { %9025 = vst [vmem:[#allocation193_spill] sm:$0xff] %v6344_v25  ;;  %9026 = vst [vmem:[#allocation194_spill] sm:$0xff] %v6348_v31  ;;  %v6360_v33 = vmul.f32 %v5856_v47, %v9029_v30  ;;  %2070 = vperm.xlu1 %4454, %v4517_v29   ;;  %v9032_v31 = vld [vmem:[#allocation140_spill] sm:$0xff]  ;;  %v9038_v29 = vld [vmem:[#allocation143_spill] sm:$0xff]  ;;  %v6463_v22 = vadd.f32 %v1699_v19, %v9078_v27 }
 0x27a   : > { %9027 = vst [vmem:[#allocation195_spill] sm:$0xff] %v6352_v28  ;;  %9028 = vst [vmem:[#allocation196_spill] sm:$0xff] %v6356_v34  ;;  %v6370_v32 = vmul.f32 %v5856_v47, %v9032_v31  ;;  %v9034_v28 = vld [vmem:[#allocation141_spill] sm:$0xff]  ;;  %v9036_v34 = vld [vmem:[#allocation142_spill] sm:$0xff]  ;;  %v6382_v36 = vmul.f32 %v5856_v47, %v9038_v29 }
 0x27b   : > { %9030 = vst [vmem:[#allocation139_spill] sm:$0xff] %v6360_v33  ;;  %9031 = vst [vmem:[#allocation197_spill] sm:$0xff] %v6366_v35  ;;  %v6374_v37 = vmul.f32 %v5856_v47, %v9034_v28  ;;  %v6378_v30 = vmul.f32 %v5856_v47, %v9036_v34  ;;  %v6386_v35 = vmul.f32 %v5856_v47, %v9040_v39  ;;  %v9042_v31 = vld [vmem:[#allocation145_spill] sm:$0xff]  ;;  %v9044_v33 = vld [vmem:[#allocation146_spill] sm:$0xff]  ;;  %v6398_v34 = vpop.permute.xlu0 %1602 }
 0x27c   : > { %9033 = vst [vmem:[#allocation140_spill] sm:$0xff] %v6370_v32  ;;  %9039 = vst [vmem:[#allocation143_spill] sm:$0xff] %v6382_v36  ;;  %v6390_v32 = vmul.f32 %v5856_v47, %v9042_v31  ;;  %v6394_v28 = vmul.f32 %v5856_v47, %v9044_v33  ;;  %v9050_v36 = vld [vmem:[#allocation5_spill] sm:$0xff]  ;;  %v9054_v33 = vld [vmem:[#allocation8_spill] sm:$0xff] }
 0x27d   : > { %9035 = vst [vmem:[#allocation141_spill] sm:$0xff] %v6374_v37  ;;  %9037 = vst [vmem:[#allocation142_spill] sm:$0xff] %v6378_v30  ;;  %v6396_v37 = vpop.permute.xlu1 %1598  ;;  %v9048_v30 = vld [vmem:[#allocation6_spill] sm:$0xff]  ;;  %v6406_v39 = vmul.f32 %v5856_v47, %v9050_v36  ;;  %v9087_v27 = vld [vmem:[#allocation36_spill] sm:$0xff] }
 0x27e   : > { %9041 = vst [vmem:[#allocation144_spill] sm:$0xff] %v6386_v35  ;;  %9043 = vst [vmem:[#allocation145_spill] sm:$0xff] %v6390_v32  ;;  %v6402_v29 = vmul.f32 %v5856_v47, %v9048_v30  ;;  %v9052_v35 = vld [vmem:[#allocation14_spill] sm:$0xff]  ;;  %v9053_v32 = vld [vmem:[#allocation13_spill] sm:$0xff]  ;;  %v1700_v30 = vmul.f32 %v6150_v40, %v9057_v23  ;;  %v1701_v23 = vmul.f32 %v6150_v40, %v9064_v26 }
 0x27f   : > { %9045 = vst [vmem:[#allocation146_spill] sm:$0xff] %v6394_v28  ;;  %9046 = vst [vmem:[#allocation198_spill] sm:$0xff] %v6396_v37  ;;  %v1698_v31 = vmul.f32 %v6150_v40, %v9052_v35  ;;  %v1697_v25 = vmul.f32 %v6150_v40, %v9053_v32  ;;  %v6414_v28 = vmul.f32 %v5856_v47, %v9054_v33  ;;  %v4520_v36 = vld [vmem:[%s4765_s17 + $0x90] sm:$0xff]  ;;  %v9062_v33 = vld [vmem:[#allocation9_spill] sm:$0xff] }
 0x280   : > { %9047 = vst [vmem:[#allocation199_spill] sm:$0xff] %v6398_v34  ;;  %9049 = vst [vmem:[#allocation6_spill] sm:$0xff] %v6402_v29  ;;  %v4519_v29 = vld [vmem:[%s4765_s17 + $0x138] sm:$0xff]  ;;  %2026 = vperm.xlu0 %4461, %v4520_v36   ;;  %v6428_v32 = vmul.f32 %v5856_v47, %v9060_v14 }
 0x281   : > { %9051 = vst [vmem:[#allocation5_spill] sm:$0xff] %v6406_v39  ;;  %9055 = vst [vmem:[#allocation14_spill] sm:$0xff] %v6414_v28  ;;  %2110 = vperm.xlu1 %4454, %v4519_v29   ;;  %v9058_v39 = vld [vmem:[#allocation7_spill] sm:$0xff]  ;;  %v6432_v28 = vmul.f32 %v5856_v47, %v9062_v33  ;;  %v6438_v29 = vmul.f32 %v5856_v47, %v9065_v24  ;;  %v6446_v37 = vpop.permute.xlu1 %1606  ;;  %v6448_v33 = vpop.permute.xlu0 %1610  ;;  %v6455_v24 = vadd.f32 %v1698_v31, %v5882_v43  ;;  %v9083_v43 = vld [vmem:[#allocation25_spill] sm:$0xff] }
 0x282   : > { %v6424_v35 = vmul.f32 %v5856_v47, %v9058_v39  ;;  %9061 = vst [vmem:[#allocation8_spill] sm:$0xff] %v6428_v32  ;;  %v9067_v36 = vld [vmem:[#allocation19_spill] sm:$0xff]  ;;  %9070 = vst [vmem:[#allocation7_spill] sm:$0xff] %v6446_v37  ;;  %v6473_v31 = vadd.f32 %v1701_v23, %v9083_v43 }
 0x283   : > { %9063 = vst [vmem:[#allocation16_spill] sm:$0xff] %v6432_v28  ;;  %9066 = vst [vmem:[#allocation15_spill] sm:$0xff] %v6438_v29  ;;  %v1702_v39 = vmul.f32 %v6150_v40, %v9067_v36  ;;  %v9069_v32 = vld [vmem:[#allocation23_spill] sm:$0xff]  ;;  %v9075_v29 = vld [vmem:[#allocation18_spill] sm:$0xff] }
 0x284   : > { %9059 = vst [vmem:[#allocation13_spill] sm:$0xff] %v6424_v35  ;;  %v9068_v35 = vld [vmem:[#allocation24_spill] sm:$0xff]  ;;  %v1704_v34 = vmul.f32 %v6150_v40, %v9069_v32  ;;  %9071 = vst [vmem:[#allocation10_spill] sm:$0xff] %v6448_v33  ;;  %v9072_v28 = vld [vmem:[#allocation11_spill] sm:$0xff]  ;;  %v6458_v20 = vadd.f32 %v1697_v25, %v9075_v29 }
 0x285   : > { %v1703_v14 = vmul.f32 %v6150_v40, %v9068_v35  ;;  %v6452_v26 = vmul.f32 %v5856_v47, %v9072_v28  ;;  %9074 = vst [vmem:[#allocation20_spill] sm:$0xff] %v6455_v24  ;;  %v9077_v36 = vld [vmem:[#allocation28_spill] sm:$0xff]  ;;  %9079 = vst [vmem:[#allocation19_spill] sm:$0xff] %v6463_v22  ;;  %v9080_v32 = vld [vmem:[#allocation21_spill] sm:$0xff]  ;;  %v6494_v22 = vpop.permute.xlu0 %1618 }
 0x286   : > { %9076 = vst [vmem:[#allocation12_spill] sm:$0xff] %v6458_v20  ;;  %v1705_v35 = vmul.f32 %v6150_v40, %v9077_v36  ;;  %v6466_v37 = vadd.f32 %v1700_v30, %v9080_v32  ;;  %v9082_v33 = vld [vmem:[#allocation27_spill] sm:$0xff]  ;;  %v4522_v28 = vld [vmem:[%s4765_s17 + $0xc8] sm:$0xff]  ;;  %9084 = vst [vmem:[#allocation23_spill] sm:$0xff] %v6473_v31  ;;  %v1709_v30 = vmul.f32 %v6150_v40, %v9087_v27 }
 0x287   : > { %9073 = vst [vmem:[#allocation9_spill] sm:$0xff] %v6452_v26  ;;  %v1706_v6 = vmul.f32 %v6150_v40, %v9082_v33  ;;  %v4521_v47 = vld [vmem:[%s4765_s17 + $0x178] sm:$0xff]  ;;  %2054 = vperm.xlu0 %4461, %v4522_v28   ;;  %v9085_v25 = vld [vmem:[#allocation32_spill] sm:$0xff]  ;;  %v9088_v32 = vld [vmem:[#allocation22_spill] sm:$0xff] }
 0x288   : > { %9081 = vst [vmem:[#allocation24_spill] sm:$0xff] %v6466_v37  ;;  %2142 = vperm.xlu1 %4454, %v4521_v47   ;;  %v1707_v29 = vmul.f32 %v6150_v40, %v9085_v25  ;;  %v9086_v36 = vld [vmem:[#allocation31_spill] sm:$0xff]  ;;  %v6482_v33 = vadd.f32 %v1702_v39, %v9088_v32  ;;  %v9090_v47 = vld [vmem:[#allocation29_spill] sm:$0xff]  ;;  %v9092_v28 = vld [vmem:[#allocation26_spill] sm:$0xff]  ;;  %v6492_v37 = vpop.permute.xlu1 %1614 }
 0x289   : > { %v1708_v19 = vmul.f32 %v6150_v40, %v9086_v36  ;;  %v6485_v26 = vadd.f32 %v1703_v14, %v9090_v47  ;;  %v6488_v23 = vadd.f32 %v1704_v34, %v9092_v28  ;;  %v9094_v43 = vld [vmem:[#allocation35_spill] sm:$0xff]  ;;  %9095 = vst [vmem:[#allocation17_spill] sm:$0xff] %v6492_v37  ;;  %9096 = vst [vmem:[#allocation21_spill] sm:$0xff] %v6494_v22  ;;  %v9097_v36 = vld [vmem:[#allocation33_spill] sm:$0xff] }
 0x28a   : > { %9089 = vst [vmem:[#allocation11_spill] sm:$0xff] %v6482_v33  ;;  %v1710_v25 = vmul.f32 %v6150_v40, %v9094_v43  ;;  %v6497_v24 = vadd.f32 %v1705_v35, %v9097_v36  ;;  %v9099_v27 = vld [vmem:[#allocation40_spill] sm:$0xff]  ;;  %v9100_v32 = vld [vmem:[#allocation39_spill] sm:$0xff]  ;;  %v9102_v28 = vld [vmem:[#allocation30_spill] sm:$0xff] }
 0x28b   : > { %9091 = vst [vmem:[#allocation18_spill] sm:$0xff] %v6485_v26  ;;  %9093 = vst [vmem:[#allocation28_spill] sm:$0xff] %v6488_v23  ;;  %v1711_v39 = vmul.f32 %v6150_v40, %v9099_v27  ;;  %v1712_v14 = vmul.f32 %v6150_v40, %v9100_v32  ;;  %v9101_v47 = vld [vmem:[#allocation44_spill] sm:$0xff]  ;;  %v6506_v23 = vadd.f32 %v1706_v6, %v9102_v28  ;;  %v9104_v43 = vld [vmem:[#allocation43_spill] sm:$0xff] }
 0x28c   : > { %9098 = vst [vmem:[#allocation27_spill] sm:$0xff] %v6497_v24  ;;  %v1713_v34 = vmul.f32 %v6150_v40, %v9101_v47  ;;  %v1714_v26 = vmul.f32 %v6150_v40, %v9104_v43  ;;  %v9105_v33 = vld [vmem:[#allocation48_spill] sm:$0xff]  ;;  %v4523_v35 = vld [vmem:[%s4765_s17 + $0x1b0] sm:$0xff]  ;;  %v4524_v36 = vld [vmem:[%s4765_s17 + $0x118] sm:$0xff] }
 0x28d   : > { %9103 = vst [vmem:[#allocation25_spill] sm:$0xff] %v6506_v23  ;;  %v1715_v31 = vmul.f32 %v6150_v40, %v9105_v33  ;;  %2170 = vperm.xlu1 %4454, %v4523_v35   ;;  %2094 = vperm.xlu0 %4461, %v4524_v36   ;;  %v9106_v27 = vld [vmem:[#allocation37_spill] sm:$0xff]  ;;  %v9108_v32 = vld [vmem:[#allocation34_spill] sm:$0xff]  ;;  %v9112_v28 = vld [vmem:[#allocation47_spill] sm:$0xff] }
 0x28e   : > { %v6515_v24 = vadd.f32 %v1707_v29, %v9106_v27  ;;  %v6518_v20 = vadd.f32 %v1708_v19, %v9108_v32  ;;  %v9110_v47 = vld [vmem:[#allocation41_spill] sm:$0xff]  ;;  %v1716_v43 = vmul.f32 %v6150_v40, %v9112_v28  ;;  %v9113_v23 = vld [vmem:[#allocation38_spill] sm:$0xff]  ;;  %v9115_v35 = vld [vmem:[#allocation52_spill] sm:$0xff]  ;;  %v6534_v32 = vpop.permute.xlu1 %1622 }
 0x28f   : > { %v6521_v6 = vadd.f32 %v1709_v30, %v9110_v47  ;;  %v6526_v33 = vadd.f32 %v1710_v25, %v9113_v23  ;;  %v1717_v36 = vmul.f32 %v6150_v40, %v9115_v35  ;;  %v9116_v22 = vld [vmem:[#allocation51_spill] sm:$0xff]  ;;  %v9117_v27 = vld [vmem:[#allocation56_spill] sm:$0xff]  ;;  %9118 = vst [vmem:[#allocation29_spill] sm:$0xff] %v6534_v32  ;;  %v6536_v30 = vpop.permute.xlu0 %1626  ;;  %v9120_v47 = vld [vmem:[#allocation45_spill] sm:$0xff] }
 0x290   : > { %9107 = vst [vmem:[#allocation32_spill] sm:$0xff] %v6515_v24  ;;  %9109 = vst [vmem:[#allocation31_spill] sm:$0xff] %v6518_v20  ;;  %v1718_v29 = vmul.f32 %v6150_v40, %v9116_v22  ;;  %v1719_v19 = vmul.f32 %v6150_v40, %v9117_v27  ;;  %v6539_v20 = vadd.f32 %v1711_v39, %v9120_v47  ;;  %v9122_v28 = vld [vmem:[#allocation42_spill] sm:$0xff]  ;;  %v9126_v35 = vld [vmem:[#allocation55_spill] sm:$0xff] }
 0x291   : > { %9111 = vst [vmem:[#allocation36_spill] sm:$0xff] %v6521_v6  ;;  %9114 = vst [vmem:[#allocation22_spill] sm:$0xff] %v6526_v33  ;;  %v6542_v24 = vadd.f32 %v1712_v14, %v9122_v28  ;;  %v9124_v23 = vld [vmem:[#allocation50_spill] sm:$0xff]  ;;  %v1720_v33 = vmul.f32 %v6150_v40, %v9126_v35  ;;  %v9131_v32 = vld [vmem:[#allocation60_spill] sm:$0xff] }
 0x292   : > { %9119 = vst [vmem:[#allocation26_spill] sm:$0xff] %v6536_v30  ;;  %9121 = vst [vmem:[#allocation35_spill] sm:$0xff] %v6539_v20  ;;  %v6545_v25 = vadd.f32 %v1713_v34, %v9124_v23  ;;  %v9127_v22 = vld [vmem:[#allocation46_spill] sm:$0xff]  ;;  %v1721_v30 = vmul.f32 %v6150_v40, %v9131_v32  ;;  %v4525_v39 = vld [vmem:[%s4765_s17 + $0x1e8] sm:$0xff] }
 0x293   : > { %9123 = vst [vmem:[#allocation33_spill] sm:$0xff] %v6542_v24  ;;  %v6550_v6 = vadd.f32 %v1714_v26, %v9127_v22  ;;  %v9129_v27 = vld [vmem:[#allocation54_spill] sm:$0xff]  ;;  %2198 = vperm.xlu1 %4454, %v4525_v39   ;;  %v4526_v47 = vld [vmem:[%s4765_s17 + $0x158] sm:$0xff]  ;;  %v9132_v14 = vld [vmem:[#allocation53_spill] sm:$0xff]  ;;  %v6581_v24 = vpop.permute.xlu0 %1634 }
 0x294   : > { %9125 = vst [vmem:[#allocation40_spill] sm:$0xff] %v6545_v25  ;;  %v6553_v37 = vadd.f32 %v1715_v31, %v9129_v27  ;;  %2126 = vperm.xlu0 %4461, %v4526_v47   ;;  %v6560_v28 = vadd.f32 %v1716_v43, %v9132_v14  ;;  %v9134_v34 = vld [vmem:[#allocation59_spill] sm:$0xff]  ;;  %v9135_v35 = vld [vmem:[#allocation64_spill] sm:$0xff]  ;;  %v9137_v27 = vld [vmem:[#allocation58_spill] sm:$0xff] }
 0x295   : > { %9128 = vst [vmem:[#allocation39_spill] sm:$0xff] %v6550_v6  ;;  %v1722_v23 = vmul.f32 %v6150_v40, %v9134_v34  ;;  %v1723_v26 = vmul.f32 %v6150_v40, %v9135_v35  ;;  %v9136_v22 = vld [vmem:[#allocation63_spill] sm:$0xff]  ;;  %v6569_v32 = vadd.f32 %v1717_v36, %v9137_v27  ;;  %v9139_v39 = vld [vmem:[#allocation57_spill] sm:$0xff]  ;;  %v9141_v47 = vld [vmem:[#allocation62_spill] sm:$0xff] }
 0x296   : > { %9130 = vst [vmem:[#allocation44_spill] sm:$0xff] %v6553_v37  ;;  %9133 = vst [vmem:[#allocation30_spill] sm:$0xff] %v6560_v28  ;;  %v1724_v31 = vmul.f32 %v6150_v40, %v9136_v22  ;;  %v6572_v37 = vadd.f32 %v1718_v29, %v9139_v39  ;;  %v6575_v43 = vadd.f32 %v1719_v19, %v9141_v47  ;;  %v9143_v14 = vld [vmem:[#allocation68_spill] sm:$0xff]  ;;  %v6579_v28 = vpop.permute.xlu1 %1630  ;;  %v9146_v35 = vld [vmem:[#allocation61_spill] sm:$0xff] }
 0x297   : > { %9138 = vst [vmem:[#allocation43_spill] sm:$0xff] %v6569_v32  ;;  %v1725_v34 = vmul.f32 %v6150_v40, %v9143_v14  ;;  %9144 = vst [vmem:[#allocation34_spill] sm:$0xff] %v6579_v28  ;;  %v6584_v6 = vadd.f32 %v1720_v33, %v9146_v35  ;;  %v9148_v22 = vld [vmem:[#allocation67_spill] sm:$0xff]  ;;  %v9149_v27 = vld [vmem:[#allocation72_spill] sm:$0xff] }
 0x298   : > { %9140 = vst [vmem:[#allocation48_spill] sm:$0xff] %v6572_v37  ;;  %9142 = vst [vmem:[#allocation37_spill] sm:$0xff] %v6575_v43  ;;  %v1726_v36 = vmul.f32 %v6150_v40, %v9148_v22  ;;  %v1727_v29 = vmul.f32 %v6150_v40, %v9149_v27  ;;  %v9150_v39 = vld [vmem:[#allocation71_spill] sm:$0xff]  ;;  %v9151_v47 = vld [vmem:[#allocation66_spill] sm:$0xff] }
 0x299   : > { %9145 = vst [vmem:[#allocation41_spill] sm:$0xff] %v6581_v24  ;;  %9147 = vst [vmem:[#allocation47_spill] sm:$0xff] %v6584_v6  ;;  %v1728_v19 = vmul.f32 %v6150_v40, %v9150_v39  ;;  %v6593_v43 = vadd.f32 %v1721_v30, %v9151_v47  ;;  %v9153_v14 = vld [vmem:[#allocation76_spill] sm:$0xff]  ;;  %v9154_v20 = vld [vmem:[#allocation75_spill] sm:$0xff] }
 0x29a   : > { %v1729_v37 = vmul.f32 %v6150_v40, %v9153_v14  ;;  %v1730_v25 = vmul.f32 %v6150_v40, %v9154_v20  ;;  %v4527_v33 = vld [vmem:[%s4765_s17 + $0xb8] sm:$0xff]  ;;  %v4528_v35 = vld [vmem:[%s4765_s17 + $0x190] sm:$0xff]  ;;  %v9155_v22 = vld [vmem:[#allocation65_spill] sm:$0xff] }
 0x29b   : > { %9152 = vst [vmem:[#allocation38_spill] sm:$0xff] %v6593_v43  ;;  %2046 = vperm.xlu1 %4454, %v4527_v33   ;;  %2154 = vperm.xlu0 %4461, %v4528_v35   ;;  %v6602_v6 = vadd.f32 %v1722_v23, %v9155_v22  ;;  %v9157_v27 = vld [vmem:[#allocation70_spill] sm:$0xff]  ;;  %v9159_v39 = vld [vmem:[#allocation69_spill] sm:$0xff]  ;;  %v9161_v47 = vld [vmem:[#allocation80_spill] sm:$0xff] }
 0x29c   : > { %v6605_v32 = vadd.f32 %v1723_v26, %v9157_v27  ;;  %v6608_v30 = vadd.f32 %v1724_v31, %v9159_v39  ;;  %v1731_v14 = vmul.f32 %v6150_v40, %v9161_v47  ;;  %v9162_v43 = vld [vmem:[#allocation74_spill] sm:$0xff]  ;;  %v9164_v33 = vld [vmem:[#allocation79_spill] sm:$0xff]  ;;  %v9165_v24 = vld [vmem:[#allocation84_spill] sm:$0xff]  ;;  %v6621_v27 = vpop.permute.xlu1 %1638  ;;  %v6623_v31 = vpop.permute.xlu0 %1642 }
 0x29d   : > { %9156 = vst [vmem:[#allocation52_spill] sm:$0xff] %v6602_v6  ;;  %v6613_v20 = vadd.f32 %v1725_v34, %v9162_v43  ;;  %v1732_v35 = vmul.f32 %v6150_v40, %v9164_v33  ;;  %v1733_v23 = vmul.f32 %v6150_v40, %v9165_v24  ;;  %v9166_v22 = vld [vmem:[#allocation83_spill] sm:$0xff]  ;;  %9167 = vst [vmem:[#allocation42_spill] sm:$0xff] %v6621_v27  ;;  %v9169_v39 = vld [vmem:[#allocation73_spill] sm:$0xff] }
 0x29e   : > { %9158 = vst [vmem:[#allocation51_spill] sm:$0xff] %v6605_v32  ;;  %9160 = vst [vmem:[#allocation56_spill] sm:$0xff] %v6608_v30  ;;  %v1734_v26 = vmul.f32 %v6150_v40, %v9166_v22  ;;  %v6626_v30 = vadd.f32 %v1726_v36, %v9169_v39  ;;  %v9171_v47 = vld [vmem:[#allocation78_spill] sm:$0xff]  ;;  %v9173_v43 = vld [vmem:[#allocation77_spill] sm:$0xff] }
 0x29f   : > { %9163 = vst [vmem:[#allocation45_spill] sm:$0xff] %v6613_v20  ;;  %9168 = vst [vmem:[#allocation50_spill] sm:$0xff] %v6623_v31  ;;  %v6629_v32 = vadd.f32 %v1727_v29, %v9171_v47  ;;  %v6632_v34 = vadd.f32 %v1728_v19, %v9173_v43  ;;  %v9175_v33 = vld [vmem:[#allocation88_spill] sm:$0xff]  ;;  %v9176_v24 = vld [vmem:[#allocation82_spill] sm:$0xff] }
 0x2a0   : > { %9170 = vst [vmem:[#allocation55_spill] sm:$0xff] %v6626_v30  ;;  %v1735_v6 = vmul.f32 %v6150_v40, %v9175_v33  ;;  %v6637_v20 = vadd.f32 %v1729_v37, %v9176_v24  ;;  %v9178_v22 = vld [vmem:[#allocation81_spill] sm:$0xff]  ;;  %v9180_v27 = vld [vmem:[#allocation87_spill] sm:$0xff]  ;;  %v4529_v36 = vld [vmem:[%s4765_s17 + $0xf0] sm:$0xff]  ;;  %v6668_v30 = vpop.permute.xlu0 %1650 }
 0x2a1   : > { %9172 = vst [vmem:[#allocation46_spill] sm:$0xff] %v6629_v32  ;;  %9174 = vst [vmem:[#allocation54_spill] sm:$0xff] %v6632_v34  ;;  %v6640_v28 = vadd.f32 %v1730_v25, %v9178_v22  ;;  %v1736_v31 = vmul.f32 %v6150_v40, %v9180_v27  ;;  %2074 = vperm.xlu1 %4454, %v4529_v36   ;;  %v4530_v39 = vld [vmem:[%s4765_s17 + $0x1c8] sm:$0xff]  ;;  %v9181_v29 = vld [vmem:[#allocation86_spill] sm:$0xff]  ;;  %v6666_v32 = vpop.permute.xlu1 %1646 }
 0x2a2   : > { %9177 = vst [vmem:[#allocation60_spill] sm:$0xff] %v6637_v20  ;;  %2182 = vperm.xlu0 %4461, %v4530_v39   ;;  %v6647_v47 = vadd.f32 %v1731_v14, %v9181_v29  ;;  %v9183_v19 = vld [vmem:[#allocation92_spill] sm:$0xff]  ;;  %v9184_v33 = vld [vmem:[#allocation91_spill] sm:$0xff]  ;;  %v9186_v22 = vld [vmem:[#allocation85_spill] sm:$0xff] }
 0x2a3   : > { %9179 = vst [vmem:[#allocation53_spill] sm:$0xff] %v6640_v28  ;;  %v1737_v43 = vmul.f32 %v6150_v40, %v9183_v19  ;;  %v1738_v37 = vmul.f32 %v6150_v40, %v9184_v33  ;;  %v9185_v24 = vld [vmem:[#allocation96_spill] sm:$0xff]  ;;  %v6656_v27 = vadd.f32 %v1732_v35, %v9186_v22  ;;  %v9188_v36 = vld [vmem:[#allocation90_spill] sm:$0xff]  ;;  %v9190_v39 = vld [vmem:[#allocation89_spill] sm:$0xff] }
 0x2a4   : > { %9182 = vst [vmem:[#allocation59_spill] sm:$0xff] %v6647_v47  ;;  %v1739_v25 = vmul.f32 %v6150_v40, %v9185_v24  ;;  %v6659_v34 = vadd.f32 %v1733_v23, %v9188_v36  ;;  %v6662_v14 = vadd.f32 %v1734_v26, %v9190_v39  ;;  %v9192_v29 = vld [vmem:[#allocation95_spill] sm:$0xff]  ;;  %9193 = vst [vmem:[#allocation57_spill] sm:$0xff] %v6666_v32  ;;  %v9195_v33 = vld [vmem:[#allocation94_spill] sm:$0xff] }
 0x2a5   : > { %9187 = vst [vmem:[#allocation64_spill] sm:$0xff] %v6656_v27  ;;  %v1740_v19 = vmul.f32 %v6150_v40, %v9192_v29  ;;  %9194 = vst [vmem:[#allocation62_spill] sm:$0xff] %v6668_v30  ;;  %v6671_v47 = vadd.f32 %v1735_v6, %v9195_v33  ;;  %v9197_v24 = vld [vmem:[#allocation100_spill] sm:$0xff]  ;;  %v9198_v22 = vld [vmem:[#allocation99_spill] sm:$0xff] }
 0x2a6   : > { %9189 = vst [vmem:[#allocation63_spill] sm:$0xff] %v6659_v34  ;;  %9191 = vst [vmem:[#allocation58_spill] sm:$0xff] %v6662_v14  ;;  %v1741_v35 = vmul.f32 %v6150_v40, %v9197_v24  ;;  %v1742_v23 = vmul.f32 %v6150_v40, %v9198_v22  ;;  %v9199_v36 = vld [vmem:[#allocation104_spill] sm:$0xff]  ;;  %v9200_v39 = vld [vmem:[#allocation93_spill] sm:$0xff] }
 0x2a7   : > { %9196 = vst [vmem:[#allocation68_spill] sm:$0xff] %v6671_v47  ;;  %v1743_v26 = vmul.f32 %v6150_v40, %v9199_v36  ;;  %v6680_v27 = vadd.f32 %v1736_v31, %v9200_v39  ;;  %v9202_v29 = vld [vmem:[#allocation103_spill] sm:$0xff]  ;;  %v9203_v14 = vld [vmem:[#allocation108_spill] sm:$0xff]  ;;  %v9204_v24 = vld [vmem:[#allocation98_spill] sm:$0xff] }
 0x2a8   : > { %v1744_v28 = vmul.f32 %v6150_v40, %v9202_v29  ;;  %v1745_v20 = vmul.f32 %v6150_v40, %v9203_v14  ;;  %v4531_v6 = vld [vmem:[%s4765_s17 + $0x220] sm:$0xff]  ;;  %v4532_v33 = vld [vmem:[%s4765_s17 + $0x98] sm:$0xff]  ;;  %v6689_v47 = vadd.f32 %v1737_v43, %v9204_v24  ;;  %v9206_v22 = vld [vmem:[#allocation97_spill] sm:$0xff] }
 0x2a9   : > { %9201 = vst [vmem:[#allocation61_spill] sm:$0xff] %v6680_v27  ;;  %2226 = vperm.xlu1 %4454, %v4531_v6   ;;  %2030 = vperm.xlu0 %4461, %v4532_v33   ;;  %v6692_v34 = vadd.f32 %v1738_v37, %v9206_v22  ;;  %v9208_v36 = vld [vmem:[#allocation102_spill] sm:$0xff]  ;;  %v9210_v39 = vld [vmem:[#allocation107_spill] sm:$0xff]  ;;  %v9211_v27 = vld [vmem:[#allocation101_spill] sm:$0xff]  ;;  %v6708_v22 = vpop.permute.xlu1 %1654 }
 0x2aa   : > { %9205 = vst [vmem:[#allocation67_spill] sm:$0xff] %v6689_v47  ;;  %v6695_v31 = vadd.f32 %v1739_v25, %v9208_v36  ;;  %v1746_v29 = vmul.f32 %v6150_v40, %v9210_v39  ;;  %v6700_v14 = vadd.f32 %v1740_v19, %v9211_v27  ;;  %v9213_v6 = vld [vmem:[#allocation112_spill] sm:$0xff]  ;;  %v9214_v30 = vld [vmem:[#allocation111_spill] sm:$0xff]  ;;  %9216 = vst [vmem:[#allocation76_spill] sm:$0xff] %v6708_v22  ;;  %v6710_v25 = vpop.permute.xlu0 %1658 }
 0x2ab   : > { %9207 = vst [vmem:[#allocation72_spill] sm:$0xff] %v6692_v34  ;;  %v1747_v33 = vmul.f32 %v6150_v40, %v9213_v6  ;;  %v1748_v43 = vmul.f32 %v6150_v40, %v9214_v30  ;;  %v9215_v24 = vld [vmem:[#allocation116_spill] sm:$0xff]  ;;  %9217 = vst [vmem:[#allocation75_spill] sm:$0xff] %v6710_v25  ;;  %v9218_v36 = vld [vmem:[#allocation106_spill] sm:$0xff] }
 0x2ac   : > { %9209 = vst [vmem:[#allocation71_spill] sm:$0xff] %v6695_v31  ;;  %9212 = vst [vmem:[#allocation66_spill] sm:$0xff] %v6700_v14  ;;  %v1749_v37 = vmul.f32 %v6150_v40, %v9215_v24  ;;  %v6713_v31 = vadd.f32 %v1741_v35, %v9218_v36  ;;  %v9219_v39 = vld [vmem:[#allocation105_spill] sm:$0xff]  ;;  %v9221_v27 = vld [vmem:[#allocation110_spill] sm:$0xff] }
 0x2ad   : > { %v6716_v34 = vadd.f32 %v1742_v23, %v9219_v39  ;;  %v6719_v19 = vadd.f32 %v1743_v26, %v9221_v27  ;;  %v9223_v6 = vld [vmem:[#allocation115_spill] sm:$0xff]  ;;  %v9224_v30 = vld [vmem:[#allocation109_spill] sm:$0xff]  ;;  %v9226_v24 = vld [vmem:[#allocation114_spill] sm:$0xff] }
 0x2ae   : > { %v1750_v14 = vmul.f32 %v6150_v40, %v9223_v6  ;;  %v6724_v47 = vadd.f32 %v1744_v28, %v9224_v30  ;;  %v6727_v32 = vadd.f32 %v1745_v20, %v9226_v24  ;;  %v9228_v22 = vld [vmem:[#allocation120_spill] sm:$0xff]  ;;  %v4534_v36 = vld [vmem:[%s4765_s17 + $0xd0] sm:$0xff]  ;;  %v9229_v23 = vld [vmem:[#allocation113_spill] sm:$0xff] }
 0x2af   : > { %9220 = vst [vmem:[#allocation65_spill] sm:$0xff] %v6716_v34  ;;  %9222 = vst [vmem:[#allocation70_spill] sm:$0xff] %v6719_v19  ;;  %v1751_v25 = vmul.f32 %v6150_v40, %v9228_v22  ;;  %v4533_v35 = vld [vmem:[%s4765_s17 + $0x260] sm:$0xff]  ;;  %2058 = vperm.xlu0 %4461, %v4534_v36   ;;  %v6734_v39 = vadd.f32 %v1746_v29, %v9229_v23  ;;  %v9231_v26 = vld [vmem:[#allocation119_spill] sm:$0xff] }
 0x2b0   : > { %9225 = vst [vmem:[#allocation69_spill] sm:$0xff] %v6724_v47  ;;  %9227 = vst [vmem:[#allocation80_spill] sm:$0xff] %v6727_v32  ;;  %2258 = vperm.xlu1 %4454, %v4533_v35   ;;  %v1752_v27 = vmul.f32 %v6150_v40, %v9231_v26  ;;  %v9232_v6 = vld [vmem:[#allocation124_spill] sm:$0xff]  ;;  %v9233_v30 = vld [vmem:[#allocation166_spill] sm:$0xff]  ;;  %v6752_v26 = vpop.permute.xlu0 %1662 }
 0x2b1   : > { %9230 = vst [vmem:[#allocation74_spill] sm:$0xff] %v6734_v39  ;;  %v1753_v28 = vmul.f32 %v6150_v40, %v9232_v6  ;;  %v2467_v20 = vsub.s32 2, %v9233_v30  ;;  %v9234_v24 = vld [vmem:[#allocation118_spill] sm:$0xff]  ;;  %v9236_v22 = vld [vmem:[#allocation117_spill] sm:$0xff]  ;;  %v9240_v29 = vld [vmem:[#allocation123_spill] sm:$0xff] }
 0x2b2   : > { %v6742_v47 = vadd.f32 %v1747_v33, %v9234_v24  ;;  %v6745_v35 = vadd.f32 %v1748_v43, %v9236_v22  ;;  %v9238_v36 = vld [vmem:[#allocation122_spill] sm:$0xff]  ;;  %v1754_v23 = vmul.f32 %v6150_v40, %v9240_v29  ;;  %v9241_v39 = vld [vmem:[#allocation121_spill] sm:$0xff]  ;;  %v9243_v6 = vld [vmem:[#allocation128_spill] sm:$0xff]  ;;  %v6763_v22 = vpop.permute.xlu1 %1954 }
 0x2b3   : > { %v6748_v19 = vadd.f32 %v1749_v37, %v9238_v36  ;;  %v6755_v32 = vadd.f32 %v1750_v14, %v9241_v39  ;;  %v1755_v30 = vmul.f32 %v6150_v40, %v9243_v6  ;;  %v9244_v34 = vld [vmem:[#allocation127_spill] sm:$0xff]  ;;  %v9245_v24 = vld [vmem:[#allocation132_spill] sm:$0xff]  ;;  %v9246_v37 = vld [vmem:[#allocation126_spill] sm:$0xff] }
 0x2b4   : > { %9235 = vst [vmem:[#allocation79_spill] sm:$0xff] %v6742_v47  ;;  %9237 = vst [vmem:[#allocation84_spill] sm:$0xff] %v6745_v35  ;;  %v1756_v33 = vmul.f32 %v6150_v40, %v9244_v34  ;;  %v1757_v43 = vmul.f32 %v6150_v40, %v9245_v24  ;;  %v6766_v36 = vadd.f32 %v1751_v25, %v9246_v37  ;;  %v9248_v29 = vld [vmem:[#allocation147_spill] sm:$0xff]  ;;  %v4536_v6 = vld [vmem:[%s4765_s17 + $0x200] sm:$0xff] }
 0x2b5   : > { %9239 = vst [vmem:[#allocation83_spill] sm:$0xff] %v6748_v19  ;;  %9242 = vst [vmem:[#allocation73_spill] sm:$0xff] %v6755_v32  ;;  %v1758_v35 = vmul.f32 %v6150_v40, %v9248_v29  ;;  %v9249_v47 = vld [vmem:[#allocation131_spill] sm:$0xff]  ;;  %2210 = vperm.xlu0 %4461, %v4536_v6   ;;  %v9250_v32 = vld [vmem:[#allocation125_spill] sm:$0xff]  ;;  %v6778_v24 = vadd.f32 %v1753_v28, %v6119_v49  ;;  %v6783_v37 = vrot.slane %v5851_v50, %v2467_v20  ;;  %v6794_v28 = vpop.permute.xlu0 %1666 }
 0x2b6   : > { %9247 = vst [vmem:[#allocation78_spill] sm:$0xff] %v6766_v36  ;;  %v1759_v14 = vmul.f32 %v6150_v40, %v9249_v47  ;;  %v4535_v39 = vld [vmem:[%s4765_s17 + $0x1b8] sm:$0xff]  ;;  %v6775_v34 = vadd.f32 %v1752_v27, %v9250_v32  ;;  %v9252_v19 = vld [vmem:[#allocation148_spill] sm:$0xff]  ;;  %v9253_v29 = vld [vmem:[#allocation129_spill] sm:$0xff] }
 0x2b7   : > { %2174 = vperm.xlu1 %4454, %v4535_v39   ;;  %v1760_v25 = vmul.f32 %v6150_v40, %v9252_v19  ;;  %v6786_v47 = vadd.f32 %v1754_v23, %v9253_v29  ;;  %v9255_v39 = vld [vmem:[#allocation149_spill] sm:$0xff]  ;;  %v9256_v36 = vld [vmem:[#allocation150_spill] sm:$0xff]  ;;  %v9257_v27 = vld [vmem:[#allocation135_spill] sm:$0xff]  ;;  %v6797_v19 = vadd.f32 %v1755_v30, %v6127_v46  ;;  %v6803_v23 = vadd.f32 %v1757_v43, %v6139_v44 }
 0x2b8   : > { %9251 = vst [vmem:[#allocation77_spill] sm:$0xff] %v6775_v34  ;;  %v1761_v6 = vmul.f32 %v6150_v40, %v9255_v39  ;;  %v1762_v32 = vmul.f32 %v6150_v40, %v9256_v36  ;;  %v1763_v49 = vmul.f32 %v6150_v40, %v9257_v27  ;;  %v9258_v50 = vld [vmem:[#allocation130_spill] sm:$0xff]  ;;  %v9260_v29 = vld [vmem:[#allocation151_spill] sm:$0xff]  ;;  %v6807_v34 = vpop.permute.xlu1 %1986  ;;  %v6810_v36 = vadd.f32 %v1758_v35, %v6131_v48  ;;  %v9263_v43 = vld [vmem:[#allocation153_spill] sm:$0xff] }
 0x2b9   : > { %9254 = vst [vmem:[#allocation88_spill] sm:$0xff] %v6786_v47  ;;  %v6800_v20 = vadd.f32 %v1756_v33, %v9258_v50  ;;  %v1764_v39 = vmul.f32 %v6150_v40, %v9260_v29  ;;  %v6813_v27 = vadd.f32 %v1759_v14, %v6147_v51  ;;  %v9261_v47 = vld [vmem:[#allocation152_spill] sm:$0xff]  ;;  %v4537_v30 = vld [vmem:[%s4765_s17 + $0x1f0] sm:$0xff]  ;;  %v6820_v44 = vadd.f32 %v1760_v25, %v6143_v42  ;;  %v9265_v35 = vld [vmem:[#allocation155_spill] sm:$0xff] }
 0x2ba   : > { %v1765_v46 = vmul.f32 %v6150_v40, %v9261_v47  ;;  %v4538_v33 = vld [vmem:[%s4765_s17 + $0x240] sm:$0xff]  ;;  %v1766_v50 = vmul.f32 %v6150_v40, %v9263_v43  ;;  %v9264_v29 = vld [vmem:[#allocation154_spill] sm:$0xff]  ;;  %v1768_v51 = vmul.f32 %v6150_v40, %v9265_v35  ;;  %v6829_v14 = vadd.f32 %v1761_v6, %v6158_v38  ;;  %v9271_v6 = vld [vmem:[#allocation159_spill] sm:$0xff] }
 0x2bb   : > { %9259 = vst [vmem:[#allocation82_spill] sm:$0xff] %v6800_v20  ;;  %2202 = vperm.xlu1 %4454, %v4537_v30   ;;  %2242 = vperm.xlu0 %4461, %v4538_v33   ;;  %9262 = vst [vmem:[#allocation81_spill] sm:$0xff] %v6820_v44  ;;  %v1767_v48 = vmul.f32 %v6150_v40, %v9264_v29  ;;  %v6832_v47 = vadd.f32 %v1762_v32, %v6154_v59  ;;  %v9267_v25 = vld [vmem:[#allocation156_spill] sm:$0xff]  ;;  %v6839_v33 = vpop.permute.xlu0 %1670  ;;  %v9269_v29 = vld [vmem:[#allocation157_spill] sm:$0xff] }
 0x2bc   : > { %v6835_v42 = vadd.f32 %v1763_v49, %v6168_v56  ;;  %v1769_v30 = vmul.f32 %v6150_v40, %v9267_v25  ;;  %v6842_v43 = vadd.f32 %v1764_v39, %v6162_v52  ;;  %v1770_v35 = vmul.f32 %v6150_v40, %v9269_v29  ;;  %v9270_v44 = vld [vmem:[#allocation158_spill] sm:$0xff]  ;;  %v6850_v32 = vpop.permute.xlu1 %2002  ;;  %v9272_v49 = vld [vmem:[#allocation160_spill] sm:$0xff]  ;;  %v4540_v29 = vld [vmem:[%s4765_s17 + $0x198] sm:$0xff] }
 0x2bd   : > { %v1771_v38 = vmul.f32 %v6150_v40, %v9270_v44  ;;  %v1772_v59 = vmul.f32 %v6150_v40, %v9271_v6  ;;  %v6853_v56 = vadd.f32 %v1765_v46, %v6176_v54  ;;  %v1773_v25 = vmul.f32 %v6150_v40, %v9272_v49  ;;  %v4539_v39 = vld [vmem:[%s4765_s17 + $0x320] sm:$0xff]  ;;  %v9276_v46 = vld [vmem:[#allocation162_spill] sm:$0xff] }
 0x2be   : > { %9266 = vst [vmem:[#allocation87_spill] sm:$0xff] %v6835_v42  ;;  %9268 = vst [vmem:[#allocation86_spill] sm:$0xff] %v6842_v43  ;;  %v9273_v42 = vld [vmem:[#allocation161_spill] sm:$0xff]  ;;  %v6862_v44 = vadd.f32 %v1766_v50, %v6172_v53  ;;  %v6865_v6 = vadd.f32 %v1767_v48, %v6184_v45  ;;  %v6868_v54 = vadd.f32 %v1768_v51, %v6180_v63  ;;  %v9278_v43 = vld [vmem:[#allocation164_spill] sm:$0xff] }
 0x2bf   : > { %v1774_v52 = vmul.f32 %v6150_v40, %v9273_v42  ;;  %2354 = vperm.xlu1 %4454, %v4539_v39   ;;  %2158 = vperm.xlu0 %4461, %v4540_v29   ;;  %v1775_v49 = vmul.f32 %v6150_v40, %v9276_v46  ;;  %v6873_v42 = vadd.f32 %v1769_v30, %v6192_v55  ;;  %v9277_v39 = vld [vmem:[#allocation163_spill] sm:$0xff]  ;;  %v9279_v50 = vld [vmem:[#allocation165_spill] sm:$0xff]  ;;  %v6881_v48 = vpop.permute.xlu0 %1674  ;;  %v4587_v20 = vld [vmem:[%s4765_s17 + $0x2b0] sm:$0xff] }
 0x2c0   : > { %9274 = vst [vmem:[#allocation92_spill] sm:$0xff] %v6865_v6  ;;  %9275 = vst [vmem:[#allocation91_spill] sm:$0xff] %v6868_v54  ;;  %v1776_v29 = vmul.f32 %v6150_v40, %v9277_v39  ;;  %v1777_v53 = vmul.f32 %v6150_v40, %v9278_v43  ;;  %v1778_v45 = vmul.f32 %v6150_v40, %v9279_v50  ;;  %v9282_v30 = vld [vmem:[#allocation167_spill] sm:$0xff]  ;;  %v6894_v39 = vpop.permute.xlu1 %2098  ;;  %v9283_v54 = vld [vmem:[#allocation168_spill] sm:$0xff] }
 0x2c1   : > { %v6884_v63 = vadd.f32 %v1770_v35, %v6188_v0  ;;  %v6887_v51 = vadd.f32 %v1771_v38, %v6204_v60  ;;  %v6890_v55 = vadd.f32 %v1772_v59, %v6196_v62  ;;  %v1779_v46 = vmul.f32 %v6150_v40, %v9282_v30  ;;  %v4541_v35 = vld [vmem:[%s4765_s17 + $0x360] sm:$0xff]  ;;  %v4542_v60 = vld [vmem:[%s4765_s17 + $0x1d0] sm:$0xff]  ;;  %v9285_v38 = vld [vmem:[#allocation169_spill] sm:$0xff] }
 0x2c2   : > { %v6897_v43 = vadd.f32 %v1773_v25, %v6212_v4  ;;  %v6900_v50 = vadd.f32 %v1774_v52, %v6208_v57  ;;  %v1780_v0 = vmul.f32 %v6150_v40, %v9283_v54  ;;  %v6907_v62 = vadd.f32 %v1775_v49, %v6220_v61  ;;  %v9286_v30 = vld [vmem:[#allocation170_spill] sm:$0xff]  ;;  %v9287_v25 = vld [vmem:[#allocation171_spill] sm:$0xff]  ;;  %v9290_v49 = vld [vmem:[#allocation172_spill] sm:$0xff] }
 0x2c3   : > { %9280 = vst [vmem:[#allocation96_spill] sm:$0xff] %v6887_v51  ;;  %9281 = vst [vmem:[#allocation85_spill] sm:$0xff] %v6890_v55  ;;  %2386 = vperm.xlu1 %4454, %v4541_v35   ;;  %2186 = vperm.xlu0 %4461, %v4542_v60   ;;  %v1781_v59 = vmul.f32 %v6150_v40, %v9285_v38  ;;  %v1782_v4 = vmul.f32 %v6150_v40, %v9286_v30  ;;  %v9292_v38 = vld [vmem:[#allocation173_spill] sm:$0xff] }
 0x2c4   : > { %9284 = vst [vmem:[#allocation90_spill] sm:$0xff] %v6907_v62  ;;  %v1783_v57 = vmul.f32 %v6150_v40, %v9287_v25  ;;  %v6916_v52 = vadd.f32 %v1776_v29, %v6216_v2  ;;  %v6919_v54 = vadd.f32 %v1777_v53, %v6228_v3  ;;  %v6922_v61 = vadd.f32 %v1778_v45, %v6224_v1  ;;  %v9293_v25 = vld [vmem:[#allocation174_spill] sm:$0xff]  ;;  %v9294_v2 = vld [vmem:[#allocation49_spill] sm:$0xff]  ;;  %v6935_v3 = vpop.permute.xlu1 %2130  ;;  %v6937_v53 = vpop.permute.xlu0 %1970  ;;  %v9296_v45 = vld [vmem:[#allocation175_spill] sm:$0xff] }
 0x2c5   : > { %v1784_v35 = vmul.f32 %v6150_v40, %v9290_v49  ;;  %v6927_v60 = vadd.f32 %v1779_v46, %v6238_v8  ;;  %v1785_v30 = vmul.f32 %v6150_v40, %v9292_v38  ;;  %v1786_v55 = vmul.f32 %v6150_v40, %v9293_v25  ;;  %v9297_v46 = vld [vmem:[#allocation176_spill] sm:$0xff]  ;;  %v4543_v38 = vld [vmem:[%s4765_s17 + $0xf8] sm:$0xff]  ;;  %v4551_v51 = vld [vmem:[%s4765_s17 + $0x248] sm:$0xff] }
 0x2c6   : > { %9288 = vst [vmem:[#allocation89_spill] sm:$0xff] %v6916_v52  ;;  %9289 = vst [vmem:[#allocation95_spill] sm:$0xff] %v6922_v61  ;;  %v1787_v29 = vmul.f32 %v6150_v40, %v9294_v2  ;;  %v6940_v1 = vadd.f32 %v1780_v0, %v6234_v5  ;;  %v1788_v8 = vmul.f32 %v6150_v40, %v9296_v45  ;;  %v4544_v52 = vld [vmem:[%s4765_s17 + $0x300] sm:$0xff]  ;;  %v9300_v5 = vld [vmem:[#allocation177_spill] sm:$0xff] }
 0x2c7   : > { %9291 = vst [vmem:[#allocation94_spill] sm:$0xff] %v6927_v60  ;;  %v1789_v49 = vmul.f32 %v6150_v40, %v9297_v46  ;;  %2078 = vperm.xlu1 %4454, %v4543_v38   ;;  %2338 = vperm.xlu0 %4461, %v4544_v52   ;;  %v6949_v25 = vadd.f32 %v1781_v59, %v6246_v10  ;;  %v9302_v46 = vld [vmem:[#allocation178_spill] sm:$0xff]  ;;  %v9303_v52 = vld [vmem:[#allocation179_spill] sm:$0xff]  ;;  %v9304_v59 = vld [vmem:[#allocation133_spill] sm:$0xff] }
 0x2c8   : > { %9295 = vst [vmem:[#allocation100_spill] sm:$0xff] %v6940_v1  ;;  %v6952_v2 = vadd.f32 %v1782_v4, %v6242_v7  ;;  %v6955_v60 = vadd.f32 %v1783_v57, %v6254_v9  ;;  %v1790_v0 = vmul.f32 %v6150_v40, %v9300_v5  ;;  %v6960_v45 = vadd.f32 %v1784_v35, %v6250_v58  ;;  %v9308_v58 = vld [vmem:[#allocation134_spill] sm:$0xff]  ;;  %v6979_v5 = vpop.permute.xlu1 %1974  ;;  %v9331_v1 = vld [vmem:[#allocation187_spill] sm:$0xff]  ;;  %v9363_v61 = vld [vmem:[#allocation76_spill] sm:$0xff] }
 0x2c9   : > { %v1791_v38 = vmul.f32 %v6150_v40, %v9302_v46  ;;  %v1792_v10 = vmul.f32 %v6150_v40, %v9303_v52  ;;  %v1793_v7 = vmul.f32 %v6150_v40, %v9304_v59  ;;  %v6969_v4 = vadd.f32 %v1785_v30, %v6262_v11  ;;  %v6981_v46 = vpop.permute.xlu0 %2082  ;;  %v4545_v30 = vld [vmem:[%s4765_s17 + $0x228] sm:$0xff] }
 0x2ca   : > { %9298 = vst [vmem:[#allocation99_spill] sm:$0xff] %v6952_v2  ;;  %9299 = vst [vmem:[#allocation104_spill] sm:$0xff] %v6955_v60  ;;  %v6972_v9 = vadd.f32 %v1786_v55, %v6258_v12  ;;  %v6975_v57 = vadd.f32 %v1787_v29, %v6274_v16  ;;  %v1794_v35 = vmul.f32 %v6150_v40, %v9308_v58  ;;  %v9311_v55 = vld [vmem:[#allocation136_spill] sm:$0xff]  ;;  %v9313_v59 = vld [vmem:[#allocation137_spill] sm:$0xff] }
 0x2cb   : > { %9301 = vst [vmem:[#allocation93_spill] sm:$0xff] %v6960_v45  ;;  %9305 = vst [vmem:[#allocation103_spill] sm:$0xff] %v6969_v4  ;;  %v6984_v52 = vadd.f32 %v1788_v8, %v6270_v13  ;;  %v6987_v11 = vadd.f32 %v1789_v49, %v6282_v18  ;;  %v1795_v12 = vmul.f32 %v6150_v40, %v6198_v41  ;;  %2230 = vperm.xlu1 %4454, %v4545_v30   ;;  %v9314_v45 = vld [vmem:[#allocation180_spill] sm:$0xff]  ;;  %v9316_v49 = vld [vmem:[#allocation181_spill] sm:$0xff] }
 0x2cc   : > { %9306 = vst [vmem:[#allocation108_spill] sm:$0xff] %v6972_v9  ;;  %9307 = vst [vmem:[#allocation98_spill] sm:$0xff] %v6975_v57  ;;  %v1796_v16 = vmul.f32 %v6150_v40, %v9311_v55  ;;  %v6995_v29 = vadd.f32 %v1790_v0, %v6278_v15  ;;  %v1797_v58 = vmul.f32 %v6150_v40, %v9313_v59  ;;  %v4546_v8 = vld [vmem:[%s4765_s17 + $0x340] sm:$0xff]  ;;  %v9318_v15 = vld [vmem:[#allocation183_spill] sm:$0xff] }
 0x2cd   : > { %9309 = vst [vmem:[#allocation97_spill] sm:$0xff] %v6984_v52  ;;  %9310 = vst [vmem:[#allocation102_spill] sm:$0xff] %v6987_v11  ;;  %v1798_v13 = vmul.f32 %v6150_v40, %v9314_v45  ;;  %v1799_v18 = vmul.f32 %v6150_v40, %v6330_v21  ;;  %2370 = vperm.xlu0 %4461, %v4546_v8   ;;  %v7005_v41 = vadd.f32 %v1791_v38, %v6290_v17  ;;  %v9319_v30 = vld [vmem:[#allocation190_spill] sm:$0xff]  ;;  %v9323_v8 = vld [vmem:[#allocation199_spill] sm:$0xff] }
 0x2ce   : > { %9312 = vst [vmem:[#allocation107_spill] sm:$0xff] %v6995_v29  ;;  %v7008_v55 = vadd.f32 %v1792_v10, %v9316_v49  ;;  %v7011_v0 = vadd.f32 %v1793_v7, %v9318_v15  ;;  %v1800_v59 = vmul.f32 %v6150_v40, %v9319_v30  ;;  %v9320_v52 = vld [vmem:[#allocation182_spill] sm:$0xff]  ;;  %v1802_v17 = vmul.f32 %v6150_v40, %v9323_v8  ;;  %v9324_v38 = vld [vmem:[#allocation7_spill] sm:$0xff]  ;;  %v7024_v49 = vpop.permute.xlu1 %2006  ;;  %v7026_v7 = vpop.permute.xlu0 %2114  ;;  %v9325_v15 = vld [vmem:[#allocation185_spill] sm:$0xff] }
 0x2cf   : > { %9315 = vst [vmem:[#allocation101_spill] sm:$0xff] %v7005_v41  ;;  %v7016_v45 = vadd.f32 %v1794_v35, %v9320_v52  ;;  %v9322_v57 = vld [vmem:[#allocation198_spill] sm:$0xff]  ;;  %v1803_v10 = vmul.f32 %v6150_v40, %v9324_v38  ;;  %v9327_v30 = vld [vmem:[#allocation184_spill] sm:$0xff]  ;;  %v4547_v8 = vld [vmem:[%s4765_s17 + $0x268] sm:$0xff]  ;;  %v7040_v38 = vadd.f32 %v1797_v58, %v9331_v1 }
 0x2d0   : > { %9317 = vst [vmem:[#allocation112_spill] sm:$0xff] %v7008_v55  ;;  %v1801_v21 = vmul.f32 %v6150_v40, %v9322_v57  ;;  %v7029_v55 = vadd.f32 %v1795_v12, %v9325_v15  ;;  %v7032_v35 = vadd.f32 %v1796_v16, %v9327_v30  ;;  %v9329_v52 = vld [vmem:[#allocation10_spill] sm:$0xff]  ;;  %v9330_v57 = vld [vmem:[#allocation17_spill] sm:$0xff]  ;;  %2262 = vperm.xlu1 %4454, %v4547_v8   ;;  %v4548_v30 = vld [vmem:[%s4765_s17 + $0xd8] sm:$0xff] }
 0x2d1   : > { %9321 = vst [vmem:[#allocation111_spill] sm:$0xff] %v7016_v45  ;;  %v1804_v41 = vmul.f32 %v6150_v40, %v9329_v52  ;;  %v1805_v29 = vmul.f32 %v6150_v40, %v9330_v57  ;;  %v9332_v60 = vld [vmem:[#allocation186_spill] sm:$0xff]  ;;  %v9336_v15 = vld [vmem:[#allocation21_spill] sm:$0xff]  ;;  %2062 = vperm.xlu0 %4461, %v4548_v30   ;;  %v9337_v52 = vld [vmem:[#allocation188_spill] sm:$0xff] }
 0x2d2   : > { %9326 = vst [vmem:[#allocation116_spill] sm:$0xff] %v7029_v55  ;;  %9328 = vst [vmem:[#allocation106_spill] sm:$0xff] %v7032_v35  ;;  %v7043_v9 = vadd.f32 %v1798_v13, %v9332_v60  ;;  %v9334_v11 = vld [vmem:[#allocation138_spill] sm:$0xff]  ;;  %v1806_v16 = vmul.f32 %v6150_v40, %v9336_v15  ;;  %v7052_v35 = vadd.f32 %v1800_v59, %v9337_v52  ;;  %v9339_v57 = vld [vmem:[#allocation29_spill] sm:$0xff]  ;;  %v7071_v52 = vpop.permute.xlu1 %2034 }
 0x2d3   : > { %v7046_v12 = vadd.f32 %v1799_v18, %v9334_v11  ;;  %v1807_v8 = vmul.f32 %v6150_v40, %v9339_v57  ;;  %v9340_v1 = vld [vmem:[#allocation26_spill] sm:$0xff]  ;;  %v9342_v11 = vld [vmem:[#allocation191_spill] sm:$0xff]  ;;  %v9343_v55 = vld [vmem:[#allocation189_spill] sm:$0xff]  ;;  %v2469_v59 = vmul.f32 %v6783_v37, %v6763_v22  ;;  %v7073_v57 = vpop.permute.xlu0 %1958 }
 0x2d4   : > { %9333 = vst [vmem:[#allocation105_spill] sm:$0xff] %v7043_v9  ;;  %9338 = vst [vmem:[#allocation115_spill] sm:$0xff] %v7052_v35  ;;  %v1808_v58 = vmul.f32 %v6150_v40, %v9340_v1  ;;  %v9341_v60 = vld [vmem:[#allocation34_spill] sm:$0xff]  ;;  %v7061_v18 = vadd.f32 %v1801_v21, %v9342_v11  ;;  %v7064_v15 = vadd.f32 %v1802_v17, %v9343_v55  ;;  %v9345_v30 = vld [vmem:[#allocation193_spill] sm:$0xff] }
 0x2d5   : > { %9335 = vst [vmem:[#allocation110_spill] sm:$0xff] %v7046_v12  ;;  %v1809_v13 = vmul.f32 %v6150_v40, %v9341_v60  ;;  %v7067_v12 = vadd.f32 %v1803_v10, %v9345_v30  ;;  %v9347_v1 = vld [vmem:[#allocation192_spill] sm:$0xff]  ;;  %v9349_v60 = vld [vmem:[#allocation195_spill] sm:$0xff]  ;;  %v9350_v11 = vld [vmem:[#allocation41_spill] sm:$0xff]  ;;  %v2477_v17 = vmul.f32 %v6783_v37, %v6807_v34 }
 0x2d6   : > { %9344 = vst [vmem:[#allocation109_spill] sm:$0xff] %v7064_v15  ;;  %v7076_v35 = vadd.f32 %v1804_v41, %v9347_v1  ;;  %v7079_v21 = vadd.f32 %v1805_v29, %v9349_v60  ;;  %v1810_v55 = vmul.f32 %v6150_v40, %v9350_v11  ;;  %v4549_v10 = vld [vmem:[%s4765_s17 + $0x2a0] sm:$0xff]  ;;  %v9351_v30 = vld [vmem:[#allocation194_spill] sm:$0xff]  ;;  %v9355_v1 = vld [vmem:[#allocation57_spill] sm:$0xff] }
 0x2d7   : > { %9346 = vst [vmem:[#allocation114_spill] sm:$0xff] %v7067_v12  ;;  %2290 = vperm.xlu1 %4454, %v4549_v10   ;;  %v7087_v22 = vadd.f32 %v1806_v16, %v9351_v30  ;;  %v9353_v12 = vld [vmem:[#allocation42_spill] sm:$0xff]  ;;  %v1813_v29 = vmul.f32 %v6150_v40, %v9355_v1  ;;  %v4550_v60 = vld [vmem:[%s4765_s17 + $0x208] sm:$0xff]  ;;  %v9356_v11 = vld [vmem:[#allocation139_spill] sm:$0xff]  ;;  %v1815_v1 = vmul.f32 %v6150_v40, %v9363_v61 }
 0x2d8   : > { %9348 = vst [vmem:[#allocation120_spill] sm:$0xff] %v7076_v35  ;;  %v1811_v2 = vmul.f32 %v6150_v40, %v9353_v12  ;;  %v9354_v4 = vld [vmem:[#allocation50_spill] sm:$0xff]  ;;  %2214 = vperm.xlu0 %4461, %v4550_v60   ;;  %v7097_v35 = vadd.f32 %v1807_v8, %v9356_v11  ;;  %v9358_v34 = vld [vmem:[#allocation196_spill] sm:$0xff]  ;;  %v2513_v12 = vmul.f32 %v6783_v37, %v6935_v3  ;;  %v7114_v11 = vpop.permute.xlu1 %2102 }
 0x2d9   : > { %9352 = vst [vmem:[#allocation113_spill] sm:$0xff] %v7087_v22  ;;  %v1812_v41 = vmul.f32 %v6150_v40, %v9354_v4  ;;  %v7100_v62 = vadd.f32 %v1808_v58, %v9358_v34  ;;  %v9360_v10 = vld [vmem:[#allocation140_spill] sm:$0xff]  ;;  %v9362_v30 = vld [vmem:[#allocation62_spill] sm:$0xff]  ;;  %v2473_v58 = vmul.f32 %v6783_v37, %v6937_v53  ;;  %v9365_v34 = vld [vmem:[#allocation197_spill] sm:$0xff]  ;;  %v2481_v61 = vmul.f32 %v6783_v37, %v6850_v32 }
 0x2da   : > { %9357 = vst [vmem:[#allocation119_spill] sm:$0xff] %v7097_v35  ;;  %v7103_v16 = vadd.f32 %v1809_v13, %v9360_v10  ;;  %v1814_v4 = vmul.f32 %v6150_v40, %v9362_v30  ;;  %v9364_v60 = vld [vmem:[#allocation12_spill] sm:$0xff]  ;;  %v1991_v13 = vpop.permute.xlu0 %1990  ;;  %v7117_v10 = vadd.f32 %v1810_v55, %v9365_v34  ;;  %v9367_v30 = vld [vmem:[#allocation27_spill] sm:$0xff]  ;;  %v9368_v53 = vmov 1   ;;  %v9371_v55 = vld [vmem:[#allocation141_spill] sm:$0xff] }
 0x2db   : > { %9359 = vst [vmem:[#allocation124_spill] sm:$0xff] %v7100_v62  ;;  %v2597_v8 = vadd.f32 %v2469_v59, %v9364_v60  ;;  %v7122_v3 = vld [vmem:[%s8479_s2] ss:$0 sm:$0xff]  ;;  %v2605_v62 = vadd.f32 %v2477_v17, %v9367_v30  ;;  %v2505_v59 = vmul.f32 %v6783_v37, %v6894_v39  ;;  %4455 = vset.pattern.permute.xlu1 %v9368_v53  ;;  %v9369_v60 = vld [vmem:[#allocation142_spill] sm:$0xff]  ;;  %v9375_v32 = vld [vmem:[#allocation75_spill] sm:$0xff] }
 0x2dc   : > { %9361 = vst [vmem:[#allocation166_spill] sm:$0xff] %v7103_v16  ;;  %9366 = vst [vmem:[#allocation118_spill] sm:$0xff] %v7117_v10  ;;  %v7131_v35 = vadd.f32 %v1811_v2, %v9369_v60  ;;  %v7134_v34 = vadd.f32 %v1812_v41, %v9371_v55  ;;  %v9373_v10 = vld [vmem:[#allocation144_spill] sm:$0xff]  ;;  %2246 = vperm.xlu0 %4461, %v4551_v51   ;;  %v1816_v39 = vmul.f32 %v6150_v40, %v9375_v32  ;;  %v9378_v51 = vld [vmem:[#allocation146_spill] sm:$0xff]  ;;  %v2135_v32 = vpop.permute.xlu1 %2134 }
 0x2dd   : > { %v7137_v6 = vadd.f32 %v1813_v29, %v9373_v10  ;;  %v7141_v17 = vld [vmem:[%s4765_s17 + $0x3e0] sm:$0xff]  ;;  %v1817_v30 = vmul.f32 %v6150_v40, %v6752_v26  ;;  %v1818_v2 = vmul.f32 %v6150_v40, %v6794_v28  ;;  %v2641_v41 = vadd.f32 %v2513_v12, %v6713_v31  ;;  %v9376_v29 = vld [vmem:[#allocation143_spill] sm:$0xff]  ;;  %v9407_v16 = vld [vmem:[#allocation53_spill] sm:$0xff] }
 0x2de   : > { %9370 = vst [vmem:[#allocation117_spill] sm:$0xff] %v7131_v35  ;;  %9372 = vst [vmem:[#allocation122_spill] sm:$0xff] %v7134_v34  ;;  %1678 = vperm.xlu1 %4455, %v7141_v17   ;;  %v7152_v10 = vadd.f32 %v1814_v4, %v9376_v29  ;;  %v7155_v60 = vadd.f32 %v1815_v1, %v9378_v51  ;;  %v2732_v55 = vadd.f32 %v7122_v3, %v2597_v8  ;;  %v9380_v34 = vld [vmem:[#allocation23_spill] sm:$0xff]  ;;  %v9381_v22 = vld [vmem:[#allocation36_spill] sm:$0xff]  ;;  %v9383_v29 = vmov 2  }
 0x2df   : > { %9374 = vst [vmem:[#allocation123_spill] sm:$0xff] %v7137_v6  ;;  %v2601_v35 = vadd.f32 %v2473_v58, %v9380_v34  ;;  %v2019_v6 = vpop.permute.xlu0 %2018  ;;  %v2740_v26 = vadd.f32 %v7122_v3, %v2605_v62  ;;  %v1819_v28 = vmul.f32 %v6150_v40, %v6839_v33  ;;  %v2609_v31 = vadd.f32 %v2481_v61, %v9381_v22  ;;  %v9382_v12 = vld [vmem:[#allocation63_spill] sm:$0xff]  ;;  %v4553_v34 = vld [vmem:[%s4765_s17 + $0x280] sm:$0xff]  ;;  %v9384_v62 = vld [vmem:[#allocation145_spill] sm:$0xff] }
 0x2e0   : > { %9377 = vst [vmem:[#allocation121_spill] sm:$0xff] %v7152_v10  ;;  %9379 = vst [vmem:[#allocation128_spill] sm:$0xff] %v7155_v60  ;;  %v2633_v4 = vadd.f32 %v2505_v59, %v9382_v12  ;;  %v2474_v1 = vmul.f32 %v6783_v37, %v6979_v5  ;;  %v2482_v8 = vmul.f32 %v6783_v37, %v7024_v49  ;;  %2274 = vperm.xlu0 %4461, %v4553_v34   ;;  %v9386_v33 = vld [vmem:[#allocation5_spill] sm:$0xff]  ;;  %v9388_v61 = vld [vmem:[#allocation6_spill] sm:$0xff] }
 0x2e1   : > { %v2509_v58 = vmul.f32 %v6783_v37, %v7026_v7  ;;  %v7173_v51 = vadd.f32 %v1816_v39, %v9384_v62  ;;  %v7176_v22 = vadd.f32 %v1817_v30, %v9386_v33  ;;  %v7179_v59 = vadd.f32 %v1818_v2, %v9388_v61  ;;  %v4554_v12 = vld [vmem:[%s4765_s17 + $0x1d8] sm:$0xff]  ;;  %v2163_v62 = vpop.permute.xlu1 %2162  ;;  %v9390_v2 = vld [vmem:[#allocation13_spill] sm:$0xff] }
 0x2e2   : > { %4456 = vset.pattern.permute.xlu1 %v9383_v29  ;;  %v2776_v5 = vadd.f32 %v7122_v3, %v2641_v41  ;;  %v2860_v49 = vmax.f32 %v2732_v55, 0.0  ;;  %v2736_v7 = vadd.f32 %v7122_v3, %v2601_v35  ;;  %v2501_v34 = vmul.f32 %v6783_v37, %v6981_v46  ;;  %v9392_v35 = vld [vmem:[#allocation11_spill] sm:$0xff] }
 0x2e3   : > { %9385 = vst [vmem:[#allocation127_spill] sm:$0xff] %v7173_v51  ;;  %9387 = vst [vmem:[#allocation132_spill] sm:$0xff] %v7176_v22  ;;  %2190 = vperm.xlu1 %4456, %v4554_v12   ;;  %v2489_v39 = vmul.f32 %v6783_v37, %v7071_v52  ;;  %v2087_v30 = vpop.permute.xlu0 %2086  ;;  %v2868_v33 = vmax.f32 %v2740_v26, 0.0  ;;  %v7189_v61 = vadd.f32 %v1819_v28, %v9390_v2  ;;  %v9393_v51 = vld [vmem:[#allocation22_spill] sm:$0xff]  ;;  %v4555_v52 = vld [vmem:[%s4765_s17 + $0x1f8] sm:$0xff] }
 0x2e4   : > { %9389 = vst [vmem:[#allocation126_spill] sm:$0xff] %v7179_v59  ;;  %v2768_v41 = vadd.f32 %v7122_v3, %v2633_v4  ;;  %v2478_v12 = vmul.f32 %v6783_v37, %v1991_v13  ;;  %v2744_v55 = vadd.f32 %v7122_v3, %v2609_v31  ;;  %v2602_v60 = vadd.f32 %v2474_v1, %v9392_v35  ;;  %v9394_v59 = vld [vmem:[#allocation67_spill] sm:$0xff]  ;;  %v4556_v13 = vld [vmem:[%s4765_s17 + $0x308] sm:$0xff]  ;;  %v9395_v1 = vld [vmem:[#allocation60_spill] sm:$0xff] }
 0x2e5   : > { %9391 = vst [vmem:[#allocation147_spill] sm:$0xff] %v7189_v61  ;;  %v2610_v46 = vadd.f32 %v2482_v8, %v9393_v51  ;;  %v2637_v10 = vadd.f32 %v2509_v58, %v9394_v59  ;;  %2206 = vperm.xlu0 %4461, %v4555_v52   ;;  %v1820_v26 = vmul.f32 %v6150_v40, %v6881_v48  ;;  %v2904_v22 = vmax.f32 %v2776_v5, 0.0  ;;  %v9396_v8 = vld [vmem:[#allocation43_spill] sm:$0xff]  ;;  %v1979_v59 = vpop.permute.xlu1 %1978 }
 0x2e6   : > { %v2470_v28 = vmul.f32 %v6783_v37, %v7073_v57  ;;  %v2514_v4 = vmul.f32 %v6783_v37, %v2135_v32  ;;  %v2864_v31 = vmax.f32 %v2736_v7, 0.0  ;;  %v2629_v2 = vadd.f32 %v2501_v34, %v9395_v1  ;;  %v9397_v57 = vld [vmem:[#allocation25_spill] sm:$0xff] }
 0x2e7   : > { %2342 = vperm.xlu1 %4456, %v4556_v13   ;;  %v2617_v51 = vadd.f32 %v2489_v39, %v9396_v8  ;;  %v2506_v58 = vmul.f32 %v6783_v37, %v7114_v11  ;;  %v2119_v48 = vpop.permute.xlu0 %2118  ;;  %v7208_v5 = vmax.f32 %v2860_v49, %v2868_v33  ;;  %v2896_v35 = vmax.f32 %v2768_v41, 0.0  ;;  %v4557_v13 = vld [vmem:[%s4765_s17 + $0x348] sm:$0xff]  ;;  %v9398_v11 = vld [vmem:[#allocation14_spill] sm:$0xff]  ;;  %v9400_v49 = vld [vmem:[#allocation20_spill] sm:$0xff] }
 0x2e8   : > { %v2606_v52 = vadd.f32 %v2478_v12, %v9397_v57  ;;  %v2485_v32 = vmul.f32 %v6783_v37, %v2019_v6  ;;  %v2872_v61 = vmax.f32 %v2744_v55, 0.0  ;;  %v2737_v7 = vadd.f32 %v7122_v3, %v2602_v60  ;;  %v9401_v41 = vld [vmem:[#allocation65_spill] sm:$0xff] }
 0x2e9   : > { %v2745_v34 = vadd.f32 %v7122_v3, %v2610_v46  ;;  %v2772_v39 = vadd.f32 %v7122_v3, %v2637_v10  ;;  %2374 = vperm.xlu0 %4461, %v4557_v13   ;;  %v7217_v1 = vadd.f32 %v1820_v26, %v9398_v11  ;;  %v7219_v8 = vmax.f32 %v2896_v35, %v2904_v22  ;;  %v4558_v57 = vld [vmem:[%s4765_s17 + $0x328] sm:$0xff]  ;;  %v9402_v10 = vld [vmem:[#allocation58_spill] sm:$0xff]  ;;  %v2011_v13 = vpop.permute.xlu1 %2010  ;;  %v9403_v35 = vld [vmem:[#allocation40_spill] sm:$0xff] }
 0x2ea   : > { %v2598_v33 = vadd.f32 %v2470_v28, %v9400_v49  ;;  %v2642_v12 = vadd.f32 %v2514_v4, %v9401_v41  ;;  %v3000_v6 = vmax.f32 %v2864_v31, %v2872_v61  ;;  %v2764_v60 = vadd.f32 %v7122_v3, %v2629_v2  ;;  %v4559_v2 = vld [vmem:[%s4765_s17 + $0x380] sm:$0xff] }
 0x2eb   : > { %9399 = vst [vmem:[#allocation131_spill] sm:$0xff] %v7217_v1  ;;  %2358 = vperm.xlu1 %4456, %v4558_v57   ;;  %v2752_v55 = vadd.f32 %v7122_v3, %v2617_v51  ;;  %v2634_v46 = vadd.f32 %v2506_v58, %v9402_v10  ;;  %v2147_v26 = vpop.permute.xlu0 %2146  ;;  %v2741_v22 = vadd.f32 %v7122_v3, %v2606_v52  ;;  %v2865_v49 = vmax.f32 %v2737_v7, 0.0  ;;  %v4561_v1 = vld [vmem:[%s4765_s17 + $0x210] sm:$0xff] }
 0x2ec   : > { %v2613_v11 = vadd.f32 %v2485_v32, %v9403_v35  ;;  %v2521_v28 = vmul.f32 %v6783_v37, %v2163_v62  ;;  %v2510_v4 = vmul.f32 %v6783_v37, %v2119_v48  ;;  %v2873_v41 = vmax.f32 %v2745_v34, 0.0  ;;  %v4560_v32 = vld [vmem:[%s4765_s17 + $0x368] sm:$0xff] }
 0x2ed   : > { %v2900_v61 = vmax.f32 %v2772_v39, 0.0  ;;  %v2483_v31 = vmul.f32 %v6783_v37, %v2011_v13  ;;  %2402 = vperm.xlu0 %4461, %v4559_v2   ;;  %v2733_v51 = vadd.f32 %v7122_v3, %v2598_v33  ;;  %v2777_v58 = vadd.f32 %v7122_v3, %v2642_v12  ;;  %v2039_v39 = vpop.permute.xlu1 %2038  ;;  %v9404_v12 = vld [vmem:[#allocation83_spill] sm:$0xff] }
 0x2ee   : > { %v2502_v57 = vmul.f32 %v6783_v37, %v2087_v30  ;;  %v2517_v52 = vmul.f32 %v6783_v37, %v2147_v26  ;;  %v2892_v62 = vmax.f32 %v2764_v60, 0.0  ;;  %v2880_v48 = vmax.f32 %v2752_v55, 0.0  ;;  %v9405_v30 = vld [vmem:[#allocation72_spill] sm:$0xff]  ;;  %v4464_v26 = vld [vmem:[%s8480_s3 + $0x38] sm:$0xff]  }
 0x2ef   : > { %2390 = vperm.xlu1 %4456, %v4560_v32   ;;  %v2769_v7 = vadd.f32 %v7122_v3, %v2634_v46  ;;  %v2475_v34 = vmul.f32 %v6783_v37, %v1979_v59  ;;  %v1963_v10 = vpop.permute.xlu0 %1962  ;;  %v2869_v13 = vmax.f32 %v2741_v22, 0.0  ;;  %v2748_v33 = vadd.f32 %v7122_v3, %v2613_v11  ;;  %v9406_v46 = vld [vmem:[#allocation35_spill] sm:$0xff]  ;;  %4360 = vmatprep.subr.bf16.mxu0 %v4464_v26 }
 0x2f0   : > { %v2649_v35 = vadd.f32 %v2521_v28, %v9404_v12  ;;  %v2638_v2 = vadd.f32 %v2510_v4, %v9405_v30  ;;  %v7246_v60 = vmax.f32 %v2865_v49, %v2873_v41  ;;  %v7248_v55 = vmax.f32 %v2892_v62, %v2900_v61  ;;  %v9408_v12 = vld [vmem:[#allocation80_spill] sm:$0xff]  ;;  %v9409_v41 = vld [vmem:[#allocation18_spill] sm:$0xff]  ;;  %4361 = vmatpush3.bf16.msra.mxu0 %v4464_v26 }
 0x2f1   : > { %v2611_v59 = vadd.f32 %v2483_v31, %v9406_v46  ;;  %v2490_v32 = vmul.f32 %v6783_v37, %v2039_v39  ;;  %2218 = vperm.xlu0 %4461, %v4561_v1   ;;  %v2861_v22 = vmax.f32 %v2733_v51, 0.0  ;;  %v2905_v11 = vmax.f32 %v2777_v58, 0.0  ;;  %v4562_v30 = vld [vmem:[%s4765_s17 + $0x3a0] sm:$0xff]  ;;  %v2067_v62 = vpop.permute.xlu1 %2066  ;;  %v9411_v46 = vld [vmem:[#allocation19_spill] sm:$0xff] }
 0x2f2   : > { %v2630_v28 = vadd.f32 %v2502_v57, %v9407_v16  ;;  %v2645_v4 = vadd.f32 %v2517_v52, %v9408_v12  ;;  %v7256_v9 = vmax.f32 %v3000_v6, %v2880_v48  ;;  %v2897_v49 = vmax.f32 %v2769_v7, 0.0  ;;  %v4465_v6 = vld [vmem:[%s8480_s3 + $0x30] sm:$0xff]   ;;  %v9410_v52 = vld [vmem:[#allocation48_spill] sm:$0xff] }
 0x2f3   : > { %2418 = vperm.xlu1 %4456, %v4562_v30   ;;  %v2603_v61 = vadd.f32 %v2475_v34, %v9409_v41  ;;  %v2471_v31 = vmul.f32 %v6783_v37, %v1963_v10  ;;  %v1995_v39 = vpop.permute.xlu0 %1994  ;;  %v7260_v1 = vmax.f32 %v2861_v22, %v2869_v13  ;;  %v2876_v16 = vmax.f32 %v2748_v33, 0.0  ;;  %v4563_v10 = vld [vmem:[%s4765_s17 + $0x250] sm:$0xff]  ;;  %4362 = vmatprep.subr.bf16.mxu0 %v4465_v6  ;;  %v9413_v12 = vld [vmem:[#allocation32_spill] sm:$0xff] }
 0x2f4   : > { %v2784_v51 = vadd.f32 %v7122_v3, %v2649_v35  ;;  %v2773_v58 = vadd.f32 %v7122_v3, %v2638_v2  ;;  %v2746_v57 = vadd.f32 %v7122_v3, %v2611_v59  ;;  %v2618_v48 = vadd.f32 %v2490_v32, %v9410_v52  ;;  %v4564_v2 = vld [vmem:[%s4765_s17 + $0x230] sm:$0xff]  ;;  %v9412_v32 = vld [vmem:[#allocation45_spill] sm:$0xff]  ;;  %4363 = vmatpush3.bf16.msra.mxu0 %v4465_v6 }
 0x2f5   : > { %v2497_v7 = vmul.f32 %v6783_v37, %v2067_v62  ;;  %v2479_v34 = vmul.f32 %v6783_v37, %v1995_v39  ;;  %2250 = vperm.xlu0 %4461, %v4563_v10   ;;  %v7272_v13 = vmax.f32 %v2897_v49, %v2905_v11  ;;  %v2765_v33 = vadd.f32 %v7122_v3, %v2630_v28  ;;  %v2107_v41 = vpop.permute.xlu1 %2106  ;;  %v4565_v6 = vld [vmem:[%s4765_s17 + $0x288] sm:$0xff] }
 0x2f6   : > { %v2780_v35 = vadd.f32 %v7122_v3, %v2645_v4  ;;  %v2738_v26 = vadd.f32 %v7122_v3, %v2603_v61  ;;  %v2599_v59 = vadd.f32 %v2471_v31, %v9411_v46  ;;  %v7282_v28 = vmax.f32 %v7208_v5, %v2876_v16  ;;  %v4466_v61 = vld [vmem:[%s8480_s3 + $0x28] sm:$0xff]  }
 0x2f7   : > { %2234 = vperm.xlu1 %4456, %v4564_v2   ;;  %v2625_v22 = vadd.f32 %v2497_v7, %v9412_v32  ;;  %v2607_v30 = vadd.f32 %v2479_v34, %v9413_v12  ;;  %v2023_v11 = vpop.permute.xlu0 %2022  ;;  %v2912_v4 = vmax.f32 %v2784_v51, 0.0  ;;  %v2507_v49 = vmul.f32 %v6783_v37, %v2107_v41  ;;  %v9414_v51 = vld [vmem:[#allocation39_spill] sm:$0xff]  ;;  %v4566_v2 = vld [vmem:[%s4765_s17 + $0x270] sm:$0xff]  ;;  %4364 = vmatprep.subr.bf16.mxu0 %v4466_v61  ;;  %v9415_v32 = vld [vmem:[#allocation68_spill] sm:$0xff] }
 0x2f8   : > { %v2486_v62 = vmul.f32 %v6783_v37, %v2023_v11  ;;  %v2901_v31 = vmax.f32 %v2773_v58, 0.0  ;;  %v2874_v39 = vmax.f32 %v2746_v57, 0.0  ;;  %v2753_v52 = vadd.f32 %v7122_v3, %v2618_v48  ;;  %4365 = vmatpush3.bf16.msra.mxu0 %v4466_v61  ;;  %v4567_v61 = vld [vmem:[%s4765_s17 + $0x2c0] sm:$0xff] }
 0x2f9   : > { %v2760_v7 = vadd.f32 %v7122_v3, %v2625_v22  ;;  %2278 = vperm.xlu0 %4461, %v4565_v6   ;;  %v2893_v34 = vmax.f32 %v2765_v33, 0.0  ;;  %v2908_v5 = vmax.f32 %v2780_v35, 0.0  ;;  %v2742_v16 = vadd.f32 %v7122_v3, %v2607_v30  ;;  %v2139_v12 = vpop.permute.xlu1 %2138 }
 0x2fa   : > { %v2614_v10 = vadd.f32 %v2486_v62, %v9414_v51  ;;  %v2866_v46 = vmax.f32 %v2738_v26, 0.0  ;;  %v2734_v58 = vadd.f32 %v7122_v3, %v2599_v59  ;;  %v2635_v48 = vadd.f32 %v2507_v49, %v9415_v32  ;;  %v4467_v26 = vld [vmem:[%s8480_s3 + $0x20] sm:$0xff]   ;;  %v9417_v51 = vld [vmem:[#allocation38_spill] sm:$0xff] }
 0x2fb   : > { %2266 = vperm.xlu1 %4456, %v4566_v2   ;;  %v2888_v57 = vmax.f32 %v2760_v7, 0.0  ;;  %v2051_v22 = vpop.permute.xlu0 %2050  ;;  %v7298_v33 = vmax.f32 %v7219_v8, %v2912_v4  ;;  %v2515_v30 = vmul.f32 %v6783_v37, %v2139_v12  ;;  %v7306_v59 = vmax.f32 %v2893_v34, %v2901_v31  ;;  %v9416_v7 = vld [vmem:[#allocation70_spill] sm:$0xff]  ;;  %v4568_v2 = vld [vmem:[%s4765_s17 + $0x2a8] sm:$0xff]  ;;  %4366 = vmatprep.subr.bf16.mxu0 %v4467_v26 }
 0x2fc   : > { %v2749_v35 = vadd.f32 %v7122_v3, %v2614_v10  ;;  %v2493_v41 = vmul.f32 %v6783_v37, %v2051_v22  ;;  %v7308_v11 = vmax.f32 %v2866_v46, %v2874_v39  ;;  %v2881_v49 = vmax.f32 %v2753_v52, 0.0  ;;  %4367 = vmatpush3.bf16.msra.mxu0 %v4467_v26 }
 0x2fd   : > { %v3002_v62 = vmax.f32 %v7256_v9, %v2888_v57  ;;  %2306 = vperm.xlu0 %4461, %v4567_v61   ;;  %v7313_v8 = vmax.f32 %v7248_v55, %v2908_v5  ;;  %v2870_v4 = vmax.f32 %v2742_v16, 0.0  ;;  %v2643_v6 = vadd.f32 %v2515_v30, %v9416_v7  ;;  %v2167_v34 = vpop.permute.xlu1 %2166  ;;  %v4569_v30 = vld [vmem:[%s4765_s17 + $0x330] sm:$0xff]  ;;  %v4570_v61 = vld [vmem:[%s4765_s17 + $0x2e0] sm:$0xff] }
 0x2fe   : > { %v2621_v10 = vadd.f32 %v2493_v41, %v9417_v51  ;;  %v2862_v31 = vmax.f32 %v2734_v58, 0.0  ;;  %v2770_v9 = vadd.f32 %v7122_v3, %v2635_v48  ;;  %v2877_v5 = vmax.f32 %v2749_v35, 0.0  ;;  %v4468_v58 = vld [vmem:[%s8480_s3 + $0x18] sm:$0xff]  }
 0x2ff   : > { %2294 = vperm.xlu1 %4456, %v4568_v2   ;;  %v3120_v39 = vcombine.high %v3002_v62, %v3002_v62  ;;  %v3237_v52 = vsel %vm3180_vm0, %v3002_v62, -inf  ;;  %v2091_v46 = vpop.permute.xlu0 %2090  ;;  %v2778_v16 = vadd.f32 %v7122_v3, %v2643_v6  ;;  %v7326_v32 = vmax.f32 %v7246_v60, %v2881_v49  ;;  %4368 = vmatprep.subr.bf16.mxu0 %v4468_v58  ;;  %v9418_v49 = vld [vmem:[#allocation73_spill] sm:$0xff]  ;;  %v9419_v51 = vld [vmem:[#allocation59_spill] sm:$0xff] }
 0x300   : > { %v3238_v55 = vrot.slane %v3237_v52, 4  ;;  %v2756_v57 = vadd.f32 %v7122_v3, %v2621_v10  ;;  %v2522_v48 = vmul.f32 %v6783_v37, %v2167_v34  ;;  %v2503_v22 = vmul.f32 %v6783_v37, %v2091_v46  ;;  %4369 = vmatpush3.bf16.msra.mxu0 %v4468_v58 }
 0x301   : > { %v3244_v12 = vsel %vm3180_vm0, %v3120_v39, -inf  ;;  %2362 = vperm.xlu0 %4461, %v4569_v30   ;;  %v7332_v26 = vmax.f32 %v2862_v31, %v2870_v4  ;;  %v2898_v7 = vmax.f32 %v2770_v9, 0.0  ;;  %v2906_v60 = vmax.f32 %v2778_v16, 0.0  ;;  %v2195_v2 = vpop.permute.xlu1 %2194 }
 0x302   : > { %v3239_v35 = vmax.f32 %v3237_v52, %v3238_v55  ;;  %v3245_v41 = vrot.slane %v3244_v12, 4  ;;  %v2884_v62 = vmax.f32 %v2756_v57, 0.0  ;;  %v2650_v6 = vadd.f32 %v2522_v48, %v9418_v49  ;;  %v4571_v57 = vld [vmem:[%s4765_s17 + $0x388] sm:$0xff] }
 0x303   : > { %2322 = vperm.xlu1 %4456, %v4570_v61   ;;  %v2631_v10 = vadd.f32 %v2503_v22, %v9419_v51  ;;  %v2123_v39 = vpop.permute.xlu0 %2122  ;;  %v7338_v52 = vmax.f32 %v7260_v1, %v2877_v5  ;;  %v2529_v55 = vmul.f32 %v6783_v37, %v2195_v2  ;;  %v7348_v1 = vmax.f32 %v2898_v7, %v2906_v60  ;;  %v9420_v51 = vld [vmem:[#allocation71_spill] sm:$0xff] }
 0x304   : > { %v3240_v34 = vrot.slane %v3239_v35, 2  ;;  %v3246_v46 = vmax.f32 %v3244_v12, %v3245_v41  ;;  %v2990_v4 = vmax.f32 %v7282_v28, %v2884_v62  ;;  %v2785_v31 = vadd.f32 %v7122_v3, %v2650_v6  ;;  %v7352_v41 = vld [vmem:[%s4765_s17 + $0x3e8] sm:$0xff] }
 0x305   : > { %v2766_v9 = vadd.f32 %v7122_v3, %v2631_v10  ;;  %v2511_v16 = vmul.f32 %v6783_v37, %v2123_v39  ;;  %2406 = vperm.xlu0 %4461, %v4571_v57   ;;  %v2657_v30 = vadd.f32 %v2529_v55, %v6803_v23  ;;  %v1983_v62 = vpop.permute.xlu1 %1982 }
 0x306   : > { %v3241_v48 = vmax.f32 %v3239_v35, %v3240_v34  ;;  %v3247_v58 = vrot.slane %v3246_v46, 2  ;;  %v3116_v22 = vcombine.high %v2990_v4, %v2990_v4  ;;  %v3181_v12 = vsel %vm3180_vm0, %v2990_v4, -inf  ;;  %v4573_v34 = vld [vmem:[%s4765_s17 + $0x3c0] sm:$0xff] }
 0x307   : > { %4457 = vset.pattern.permute.xlu1 %v9368_v53  ;;  %v3182_v28 = vrot.slane %v3181_v12, 4  ;;  %v2913_v5 = vmax.f32 %v2785_v31, 0.0  ;;  %v2151_v61 = vpop.permute.xlu0 %2150  ;;  %v2639_v10 = vadd.f32 %v2511_v16, %v9420_v51  ;;  %v2894_v60 = vmax.f32 %v2766_v9, 0.0  ;;  %v9421_v51 = vld [vmem:[#allocation28_spill] sm:$0xff] }
 0x308   : > { %1682 = vperm.xlu1 %4457, %v7352_v41   ;;  %v3242_v35 = vrot.slane %v3241_v48, 1  ;;  %v3248_v49 = vmax.f32 %v3246_v46, %v3247_v58  ;;  %v3188_v6 = vsel %vm3180_vm0, %v3116_v22, -inf  ;;  %v2792_v39 = vadd.f32 %v7122_v3, %v2657_v30 }
 0x309   : > { %v3183_v2 = vmax.f32 %v3181_v12, %v3182_v28  ;;  %v3189_v7 = vrot.slane %v3188_v6, 4  ;;  %2434 = vperm.xlu0 %4461, %v4573_v34   ;;  %v2774_v31 = vadd.f32 %v7122_v3, %v2639_v10  ;;  %v2476_v55 = vmul.f32 %v6783_v37, %v1983_v62  ;;  %v2015_v9 = vpop.permute.xlu1 %2014 }
 0x30a   : > { %v3243_v23 = vmax.f32 %v3241_v48, %v3242_v35  ;;  %v3249_v4 = vrot.slane %v3248_v49, 1  ;;  %v2920_v58 = vmax.f32 %v2792_v39, 0.0  ;;  %v2518_v16 = vmul.f32 %v6783_v37, %v2151_v61  ;;  %v4574_v35 = vld [vmem:[%s4765_s17 + $0x310] sm:$0xff]  ;;  %v4575_v39 = vld [vmem:[%s4765_s17 + $0x218] sm:$0xff] }
 0x30b   : > { %v3184_v57 = vrot.slane %v3183_v2, 2  ;;  %v3190_v46 = vmax.f32 %v3188_v6, %v3189_v7  ;;  %v2179_v22 = vpop.permute.xlu0 %2178  ;;  %v2902_v30 = vmax.f32 %v2774_v31, 0.0  ;;  %v2604_v48 = vadd.f32 %v2476_v55, %v9421_v51  ;;  %v9422_v6 = vld [vmem:[#allocation74_spill] sm:$0xff] }
 0x30c   : > { %4458 = vset.pattern.permute.xlu1 %v9383_v29  ;;  %v3250_v12 = vmax.f32 %v3248_v49, %v3249_v4  ;;  %v3637_v28 = vpack.c.bf16 %v3243_v23, %v3243_v23  ;;  %v3026_v62 = vmax.f32 %v7298_v33, %v2920_v58  ;;  %v2646_v7 = vadd.f32 %v2518_v16, %v9422_v6  ;;  %v4576_v51 = vld [vmem:[%s4765_s17 + $0x350] sm:$0xff] }
 0x30d   : > { %2346 = vperm.xlu1 %4458, %v4574_v35   ;;  %v3185_v10 = vmax.f32 %v3183_v2, %v3184_v57  ;;  %v3191_v34 = vrot.slane %v3190_v46, 2  ;;  %2222 = vperm.xlu0 %4461, %v4575_v39   ;;  %v7371_v49 = vmax.f32 %v7272_v13, %v2913_v5  ;;  %v7373_v23 = vmax.f32 %v2894_v60, %v2902_v30  ;;  %v2043_v33 = vpop.permute.xlu1 %2042  ;;  %v4577_v30 = vld [vmem:[%s4765_s17 + $0x258] sm:$0xff] }
 0x30e   : > { %v3638_v61 = vpack.c.bf16 %v3250_v12, %v3250_v12  ;;  %v7368_v15 = vunpack.c.l.b16 %v3637_v28  ;;  %v3128_v2 = vcombine.high %v3026_v62, %v3026_v62  ;;  %v3349_v55 = vsel %vm3180_vm0, %v3026_v62, -inf }
 0x30f   : > { %v3186_v4 = vrot.slane %v3185_v10, 1  ;;  %v3192_v31 = vmax.f32 %v3190_v46, %v3191_v34  ;;  %v1967_v57 = vpop.permute.xlu0 %1966  ;;  %v3350_v16 = vrot.slane %v3349_v55, 4  ;;  %v2739_v12 = vadd.f32 %v7122_v3, %v2604_v48 }
 0x310   : > { %9423 = vst [vmem:[#allocation125_spill] sm:$0xff] %v7368_v15  ;;  %v7376_v58 = vunpack.c.l.b16 %v3638_v61  ;;  %v2781_v28 = vadd.f32 %v7122_v3, %v2646_v7  ;;  %v3356_v60 = vsel %vm3180_vm0, %v3128_v2, -inf  ;;  %v2484_v46 = vmul.f32 %v6783_v37, %v2015_v9  ;;  %v9425_v7 = vld [vmem:[#allocation33_spill] sm:$0xff] }
 0x311   : > { %2378 = vperm.xlu1 %4458, %v4576_v51   ;;  %v3187_v13 = vmax.f32 %v3185_v10, %v3186_v4  ;;  %v3193_v5 = vrot.slane %v3192_v31, 1  ;;  %2254 = vperm.xlu0 %4461, %v4577_v30   ;;  %v3351_v35 = vmax.f32 %v3349_v55, %v3350_v16  ;;  %v3357_v34 = vrot.slane %v3356_v60, 4  ;;  %v2071_v4 = vpop.permute.xlu1 %2070  ;;  %v4578_v30 = vld [vmem:[%s4765_s17 + $0x370] sm:$0xff] }
 0x312   : > { %9424 = vst [vmem:[#allocation148_spill] sm:$0xff] %v7376_v58  ;;  %v2909_v62 = vmax.f32 %v2781_v28, 0.0  ;;  %v2525_v6 = vmul.f32 %v6783_v37, %v2179_v22  ;;  %v2612_v61 = vadd.f32 %v2484_v46, %v9425_v7  ;;  %v2491_v10 = vmul.f32 %v6783_v37, %v2043_v33 }
 0x313   : > { %v3194_v39 = vmax.f32 %v3192_v31, %v3193_v5  ;;  %v3629_v48 = vpack.c.bf16 %v3187_v13, %v3187_v13  ;;  %v1999_v51 = vpop.permute.xlu0 %1998  ;;  %v3352_v2 = vrot.slane %v3351_v35, 2  ;;  %v3358_v58 = vmax.f32 %v3356_v60, %v3357_v34  ;;  %v9426_v31 = vld [vmem:[#allocation37_spill] sm:$0xff]  ;;  %v4579_v13 = vld [vmem:[%s4765_s17 + $0x290] sm:$0xff] }
 0x314   : > { %v2867_v9 = vmax.f32 %v2739_v12, 0.0  ;;  %v2653_v15 = vadd.f32 %v2525_v6, %v6778_v24  ;;  %v7390_v16 = vmax.f32 %v7306_v59, %v2909_v62  ;;  %v2747_v22 = vadd.f32 %v7122_v3, %v2612_v61  ;;  %v4469_v24 = vld [vmem:[%s8480_s3 + $0x10] sm:$0xff]  }
 0x315   : > { %2394 = vperm.xlu1 %4458, %v4578_v30   ;;  %v3630_v55 = vpack.c.bf16 %v3194_v39, %v3194_v39  ;;  %v2619_v28 = vadd.f32 %v2491_v10, %v9426_v31  ;;  %2282 = vperm.xlu0 %4461, %v4579_v13   ;;  %v3353_v33 = vmax.f32 %v3351_v35, %v3352_v2  ;;  %v3359_v5 = vrot.slane %v3358_v58, 2  ;;  %v2111_v6 = vpop.permute.xlu1 %2110  ;;  %v9430_v30 = vld [vmem:[#allocation55_spill] sm:$0xff] }
 0x316   : > { %v2788_v60 = vadd.f32 %v7122_v3, %v2653_v15  ;;  %v2472_v12 = vmul.f32 %v6783_v37, %v1967_v57  ;;  %v7400_v46 = vunpack.c.l.b16 %v3629_v48  ;;  %v2875_v59 = vmax.f32 %v2747_v22, 0.0  ;;  %v9428_v15 = vld [vmem:[#allocation24_spill] sm:$0xff]  ;;  %v4580_v57 = vld [vmem:[%s4765_s17 + $0x3a8] sm:$0xff]  ;;  %4370 = vmatprep.subr.bf16.mxu0 %v4469_v24 }
 0x317   : > { %v2754_v34 = vadd.f32 %v7122_v3, %v2619_v28  ;;  %v2498_v62 = vmul.f32 %v6783_v37, %v2071_v4  ;;  %v2027_v39 = vpop.permute.xlu0 %2026  ;;  %v3354_v35 = vrot.slane %v3353_v33, 1  ;;  %v3360_v7 = vmax.f32 %v3358_v58, %v3359_v5  ;;  %v4581_v28 = vld [vmem:[%s4765_s17 + $0x2c8] sm:$0xff]  ;;  %4371 = vmatpush3.bf16.msra.mxu0 %v4469_v24 }
 0x318   : > { %9427 = vst [vmem:[#allocation129_spill] sm:$0xff] %v7400_v46  ;;  %v2916_v61 = vmax.f32 %v2788_v60, 0.0  ;;  %v2600_v10 = vadd.f32 %v2472_v12, %v9428_v15  ;;  %v7406_v2 = vunpack.c.l.b16 %v3630_v55  ;;  %v2480_v31 = vmul.f32 %v6783_v37, %v1999_v51  ;;  %v9431_v12 = vld [vmem:[#allocation31_spill] sm:$0xff] }
 0x319   : > { %2422 = vperm.xlu1 %4458, %v4580_v57   ;;  %v2882_v48 = vmax.f32 %v2754_v34, 0.0  ;;  %v2626_v22 = vadd.f32 %v2498_v62, %v9430_v30  ;;  %2310 = vperm.xlu0 %4461, %v4581_v28   ;;  %v3355_v4 = vmax.f32 %v3353_v33, %v3354_v35  ;;  %v3361_v13 = vrot.slane %v3360_v7, 1  ;;  %v2143_v15 = vpop.permute.xlu1 %2142 }
 0x31a   : > { %9429 = vst [vmem:[#allocation149_spill] sm:$0xff] %v7406_v2  ;;  %v3014_v58 = vmax.f32 %v7313_v8, %v2916_v61  ;;  %v2735_v5 = vadd.f32 %v7122_v3, %v2600_v10  ;;  %v7413_v60 = vmax.f32 %v2867_v9, %v2875_v59  ;;  %v2608_v34 = vadd.f32 %v2480_v31, %v9431_v12  ;;  %v4582_v61 = vld [vmem:[%s4765_s17 + $0x338] sm:$0xff]  ;;  %v9438_v2 = vld [vmem:[#allocation78_spill] sm:$0xff] }
 0x31b   : > { %v2761_v55 = vadd.f32 %v7122_v3, %v2626_v22  ;;  %v2508_v62 = vmul.f32 %v6783_v37, %v2111_v6  ;;  %v2055_v51 = vpop.permute.xlu0 %2054  ;;  %v3362_v57 = vmax.f32 %v3360_v7, %v3361_v13  ;;  %v3653_v30 = vpack.c.bf16 %v3355_v4, %v3355_v4  ;;  %v9432_v22 = vld [vmem:[#allocation61_spill] sm:$0xff] }
 0x31c   : > { %v3124_v24 = vcombine.high %v3014_v58, %v3014_v58  ;;  %v3293_v33 = vsel %vm3180_vm0, %v3014_v58, -inf  ;;  %v7421_v35 = vmax.f32 %v7308_v11, %v2882_v48  ;;  %v2743_v59 = vadd.f32 %v7122_v3, %v2608_v34 }
 0x31d   : > { %2450 = vperm.xlu1 %4458, %v7141_v17   ;;  %v3294_v8 = vrot.slane %v3293_v33, 4  ;;  %v2889_v9 = vmax.f32 %v2761_v55, 0.0  ;;  %2366 = vperm.xlu0 %4461, %v4582_v61   ;;  %v3654_v6 = vpack.c.bf16 %v3362_v57, %v3362_v57  ;;  %v2863_v7 = vmax.f32 %v2735_v5, 0.0  ;;  %v2171_v11 = vpop.permute.xlu1 %2170  ;;  %v4583_v57 = vld [vmem:[%s4765_s17 + $0x238] sm:$0xff] }
 0x31e   : > { %v3300_v10 = vsel %vm3180_vm0, %v3124_v24, -inf  ;;  %v2636_v31 = vadd.f32 %v2508_v62, %v9432_v22  ;;  %v2871_v13 = vmax.f32 %v2743_v59, 0.0  ;;  %v7428_v58 = vunpack.c.l.b16 %v3653_v30  ;;  %v9435_v59 = vld [vmem:[#allocation44_spill] sm:$0xff]  ;;  %v9436_v22 = vld [vmem:[#allocation69_spill] sm:$0xff] }
 0x31f   : > { %v3295_v28 = vmax.f32 %v3293_v33, %v3294_v8  ;;  %v3301_v4 = vrot.slane %v3300_v10, 4  ;;  %v3005_v17 = vmax.f32 %v7326_v32, %v2889_v9  ;;  %v2095_v48 = vpop.permute.xlu0 %2094  ;;  %v7430_v55 = vunpack.c.l.b16 %v3654_v6  ;;  %v4584_v8 = vld [vmem:[%s4765_s17 + $0x390] sm:$0xff] }
 0x320   : > { %9433 = vst [vmem:[#allocation150_spill] sm:$0xff] %v7428_v58  ;;  %v2487_v12 = vmul.f32 %v6783_v37, %v2027_v39  ;;  %v2516_v34 = vmul.f32 %v6783_v37, %v2143_v15  ;;  %v7437_v9 = vmax.f32 %v2863_v7, %v2871_v13  ;;  %v2771_v30 = vadd.f32 %v7122_v3, %v2636_v31  ;;  %v4585_v13 = vld [vmem:[%s4765_s17 + $0x278] sm:$0xff] }
 0x321   : > { %9434 = vst [vmem:[#allocation135_spill] sm:$0xff] %v7430_v55  ;;  %2238 = vperm.xlu1 %4458, %v4583_v57   ;;  %v3296_v5 = vrot.slane %v3295_v28, 2  ;;  %v3302_v62 = vmax.f32 %v3300_v10, %v3301_v4  ;;  %v3121_v24 = vcombine.high %v3005_v17, %v3005_v17  ;;  %v3251_v33 = vsel %vm3180_vm0, %v3005_v17, -inf  ;;  %2410 = vperm.xlu0 %4461, %v4584_v8   ;;  %v2199_v4 = vpop.permute.xlu1 %2198 }
 0x322   : > { %v3252_v32 = vrot.slane %v3251_v33, 4  ;;  %v2615_v61 = vadd.f32 %v2487_v12, %v9435_v59  ;;  %v2644_v10 = vadd.f32 %v2516_v34, %v9436_v22  ;;  %v2494_v7 = vmul.f32 %v6783_v37, %v2055_v51 }
 0x323   : > { %v3297_v39 = vmax.f32 %v3295_v28, %v3296_v5  ;;  %v3303_v15 = vrot.slane %v3302_v62, 2  ;;  %v3258_v6 = vsel %vm3180_vm0, %v3121_v24, -inf  ;;  %v2127_v57 = vpop.permute.xlu0 %2126  ;;  %v2523_v12 = vmul.f32 %v6783_v37, %v2171_v11  ;;  %v4586_v5 = vld [vmem:[%s4765_s17 + $0x3c8] sm:$0xff] }
 0x324   : > { %v3253_v17 = vmax.f32 %v3251_v33, %v3252_v32  ;;  %v3259_v55 = vrot.slane %v3258_v6, 4  ;;  %v2750_v8 = vadd.f32 %v7122_v3, %v2615_v61  ;;  %v2779_v28 = vadd.f32 %v7122_v3, %v2644_v10  ;;  %v9437_v33 = vld [vmem:[#allocation52_spill] sm:$0xff] }
 0x325   : > { %2270 = vperm.xlu1 %4458, %v4585_v13   ;;  %v3298_v31 = vrot.slane %v3297_v39, 1  ;;  %v3304_v58 = vmax.f32 %v3302_v62, %v3303_v15  ;;  %2438 = vperm.xlu0 %4461, %v4586_v5   ;;  %v2622_v32 = vadd.f32 %v2494_v7, %v9437_v33  ;;  %v2651_v13 = vadd.f32 %v2523_v12, %v9438_v2  ;;  %v2047_v46 = vpop.permute.xlu1 %2046  ;;  %v9441_v33 = vld [vmem:[#allocation64_spill] sm:$0xff] }
 0x326   : > { %v3254_v34 = vrot.slane %v3253_v17, 2  ;;  %v3260_v24 = vmax.f32 %v3258_v6, %v3259_v55  ;;  %v2878_v59 = vmax.f32 %v2750_v8, 0.0  ;;  %v2907_v51 = vmax.f32 %v2779_v28, 0.0  ;;  %v4588_v8 = vld [vmem:[%s4765_s17 + $0x298] sm:$0xff] }
 0x327   : > { %v3299_v22 = vmax.f32 %v3297_v39, %v3298_v31  ;;  %v3305_v61 = vrot.slane %v3304_v58, 1  ;;  %v2155_v62 = vpop.permute.xlu0 %2154  ;;  %v2899_v45 = vmax.f32 %v2771_v30, 0.0  ;;  %v2757_v11 = vadd.f32 %v7122_v3, %v2622_v32 }
 0x328   : > { %v3255_v15 = vmax.f32 %v3253_v17, %v3254_v34  ;;  %v3261_v10 = vrot.slane %v3260_v24, 2  ;;  %v7454_v6 = vmax.f32 %v7332_v26, %v2878_v59  ;;  %v2786_v39 = vadd.f32 %v7122_v3, %v2651_v13  ;;  %v4470_v34 = vld [vmem:[%s8480_s3 + $0x8] sm:$0xff]  }
 0x329   : > { %2298 = vperm.xlu1 %4458, %v4587_v20   ;;  %v3306_v5 = vmax.f32 %v3304_v58, %v3305_v61  ;;  %v3645_v55 = vpack.c.bf16 %v3299_v22, %v3299_v22  ;;  %2286 = vperm.xlu0 %4461, %v4588_v8   ;;  %v2885_v17 = vmax.f32 %v2757_v11, 0.0  ;;  %v2504_v30 = vmul.f32 %v6783_v37, %v2095_v48  ;;  %v2075_v26 = vpop.permute.xlu1 %2074  ;;  %v4589_v22 = vld [vmem:[%s4765_s17 + $0x2e8] sm:$0xff]  ;;  %v9443_v8 = vld [vmem:[#allocation66_spill] sm:$0xff]  ;;  %v4594_v61 = vld [vmem:[%s4765_s17 + $0x318] sm:$0xff] }
 0x32a   : > { %v3256_v7 = vrot.slane %v3255_v15, 1  ;;  %v7458_v2 = vmax.f32 %v3260_v24, %v3261_v10  ;;  %v7461_v28 = vmax.f32 %v2899_v45, %v2907_v51  ;;  %v2914_v20 = vmax.f32 %v2786_v39, 0.0  ;;  %v4471_v24 = vld [vmem:[%s8480_s3] sm:$0xff]   ;;  %v4590_v10 = vld [vmem:[%s4765_s17 + $0x2d0] sm:$0xff]  ;;  %4372 = vmatprep.subr.bf16.mxu0 %v4470_v34 }
 0x32b   : > { %v3646_v31 = vpack.c.bf16 %v3306_v5, %v3306_v5  ;;  %v2530_v58 = vmul.f32 %v6783_v37, %v2199_v4  ;;  %v2183_v12 = vpop.permute.xlu0 %2182  ;;  %v7470_v59 = vunpack.c.l.b16 %v3645_v55  ;;  %v2993_v45 = vmax.f32 %v7338_v52, %v2885_v17  ;;  %4373 = vmatpush3.bf16.msra.mxu0 %v4470_v34 }
 0x32c   : > { %9439 = vst [vmem:[#allocation130_spill] sm:$0xff] %v7458_v2  ;;  %v7472_v48 = vmax.f32 %v3255_v15, %v3256_v7  ;;  %v2632_v32 = vadd.f32 %v2504_v30, %v9441_v33  ;;  %v2512_v13 = vmul.f32 %v6783_v37, %v2127_v57  ;;  %v7485_v52 = vmax.f32 %v7348_v1, %v2914_v20 }
 0x32d   : > { %9440 = vst [vmem:[#allocation151_spill] sm:$0xff] %v7470_v59  ;;  %2326 = vperm.xlu1 %4458, %v4589_v22   ;;  %v7477_v4 = vunpack.c.l.b16 %v3646_v31  ;;  %v2658_v51 = vadd.f32 %v2530_v58, %v6810_v36  ;;  %2314 = vperm.xlu0 %4461, %v4590_v10   ;;  %v3117_v11 = vcombine.high %v2993_v45, %v2993_v45  ;;  %v3195_v15 = vsel %vm3180_vm0, %v2993_v45, -inf  ;;  %v2227_v7 = vpop.permute.xlu1 %2226  ;;  %v9444_v22 = vld [vmem:[#allocation47_spill] sm:$0xff] }
 0x32e   : > { %v2767_v5 = vadd.f32 %v7122_v3, %v2632_v32  ;;  %v3196_v55 = vrot.slane %v3195_v15, 4  ;;  %v2640_v36 = vadd.f32 %v2512_v13, %v9443_v8  ;;  %v2492_v57 = vmul.f32 %v6783_v37, %v2047_v46  ;;  %4374 = vmatprep.subr.bf16.mxu0 %v4471_v24  ;;  %v4591_v32 = vld [vmem:[%s4765_s17 + $0x3b8] sm:$0xff]  ;;  %v7499_v46 = vld [vmem:[%s4765_s17 + $0x3f0] sm:$0xff] }
 0x32f   : > { %9442 = vst [vmem:[#allocation152_spill] sm:$0xff] %v7477_v4  ;;  %v2793_v39 = vadd.f32 %v7122_v3, %v2658_v51  ;;  %v2031_v17 = vpop.permute.xlu0 %2030  ;;  %v3639_v30 = vpack.c.bf16 %v7472_v48, %v7472_v48  ;;  %v3202_v1 = vsel %vm3180_vm0, %v3117_v11, -inf  ;;  %v2519_v20 = vmul.f32 %v6783_v37, %v2155_v62  ;;  %v9445_v51 = vld [vmem:[#allocation79_spill] sm:$0xff]  ;;  %4375 = vmatpush3.bf16.msra.mxu0 %v4471_v24 }
 0x330   : > { %v2895_v31 = vmax.f32 %v2767_v5, 0.0  ;;  %v3197_v58 = vmax.f32 %v3195_v15, %v3196_v55  ;;  %v3203_v34 = vrot.slane %v3202_v1, 4  ;;  %v2775_v33 = vadd.f32 %v7122_v3, %v2640_v36 }
 0x331   : > { %4459 = vset.pattern.permute.xlu1 %v9368_v53  ;;  %v2921_v45 = vmax.f32 %v2793_v39, 0.0  ;;  %2430 = vperm.xlu0 %4461, %v4591_v32   ;;  %v2620_v48 = vadd.f32 %v2492_v57, %v9444_v22  ;;  %v2647_v13 = vadd.f32 %v2519_v20, %v9445_v51  ;;  %v2499_v10 = vmul.f32 %v6783_v37, %v2075_v26  ;;  %v2259_v39 = vpop.permute.xlu1 %2258  ;;  %v9446_v20 = vld [vmem:[#allocation46_spill] sm:$0xff]  ;;  %v9447_v26 = vld [vmem:[#allocation88_spill] sm:$0xff] }
 0x332   : > { %1686 = vperm.xlu1 %4459, %v7499_v46   ;;  %v2526_v62 = vmul.f32 %v6783_v37, %v2183_v12  ;;  %v3198_v11 = vrot.slane %v3197_v58, 2  ;;  %v3204_v15 = vmax.f32 %v3202_v1, %v3203_v34  ;;  %v2903_v55 = vmax.f32 %v2775_v33, 0.0  ;;  %v4593_v34 = vld [vmem:[%s4765_s17 + $0x2d8] sm:$0xff] }
 0x333   : > { %v3029_v5 = vmax.f32 %v7371_v49, %v2921_v45  ;;  %v7507_v8 = vpop.permute.xlu0 %2058  ;;  %v2755_v36 = vadd.f32 %v7122_v3, %v2620_v48  ;;  %v2782_v57 = vadd.f32 %v7122_v3, %v2647_v13  ;;  %v2627_v32 = vadd.f32 %v2499_v10, %v9446_v20 }
 0x334   : > { %v2654_v22 = vadd.f32 %v2526_v62, %v9447_v26  ;;  %v3199_v12 = vmax.f32 %v3197_v58, %v3198_v11  ;;  %v3205_v51 = vrot.slane %v3204_v15, 2  ;;  %v7516_v45 = vmax.f32 %v2895_v31, %v2903_v55 }
 0x335   : > { %v3129_v24 = vcombine.high %v3029_v5, %v3029_v5  ;;  %v3363_v1 = vsel %vm3180_vm0, %v3029_v5, -inf  ;;  %2318 = vperm.xlu0 %4461, %v4593_v34   ;;  %v2883_v33 = vmax.f32 %v2755_v36, 0.0  ;;  %v2910_v48 = vmax.f32 %v2782_v57, 0.0  ;;  %v7523_v11 = vpop.permute.xlu1 %2174 }
 0x336   : > { %4460 = vset.pattern.permute.xlu1 %v9383_v29  ;;  %v3364_v49 = vrot.slane %v3363_v1, 4  ;;  %v3200_v13 = vrot.slane %v3199_v12, 1  ;;  %v7519_v10 = vmax.f32 %v3204_v15, %v3205_v51  ;;  %v2762_v62 = vadd.f32 %v7122_v3, %v2627_v32  ;;  %v4595_v32 = vld [vmem:[%s4765_s17 + $0x3d8] sm:$0xff] }
 0x337   : > { %2350 = vperm.xlu1 %4460, %v4594_v61   ;;  %v3370_v58 = vsel %vm3180_vm0, %v3129_v24, -inf  ;;  %v7525_v5 = vpop.permute.xlu0 %2210  ;;  %v7527_v20 = vunpack.c.l.b16 %v3639_v30  ;;  %v7530_v36 = vmax.f32 %v7413_v60, %v2883_v33  ;;  %v7533_v15 = vmax.f32 %v7373_v23, %v2910_v48 }
 0x338   : > { %9448 = vst [vmem:[#allocation153_spill] sm:$0xff] %v7519_v10  ;;  %v3365_v31 = vmax.f32 %v3363_v1, %v3364_v49  ;;  %v3371_v55 = vrot.slane %v3370_v58, 4  ;;  %v3201_v61 = vmax.f32 %v3199_v12, %v3200_v13  ;;  %v2890_v57 = vmax.f32 %v2762_v62, 0.0  ;;  %v4596_v1 = vld [vmem:[%s4765_s17 + $0x358] sm:$0xff] }
 0x339   : > { %9449 = vst [vmem:[#allocation154_spill] sm:$0xff] %v7527_v20  ;;  %v2789_v26 = vadd.f32 %v7122_v3, %v2654_v22  ;;  %2446 = vperm.xlu0 %4461, %v4595_v32   ;;  %v2537_v34 = vmul.f32 %v6783_v37, %v2227_v7  ;;  %v2488_v30 = vmul.f32 %v6783_v37, %v2031_v17  ;;  %v7542_v33 = vpop.permute.xlu1 %2202  ;;  %v9450_v7 = vld [vmem:[#allocation30_spill] sm:$0xff]  ;;  %v7554_v32 = vld [vmem:[%s8479_s2] ss:$0 sm:$0xff] }
 0x33a   : > { %v3366_v51 = vrot.slane %v3365_v31, 2  ;;  %v3372_v24 = vmax.f32 %v3370_v58, %v3371_v55  ;;  %v3631_v49 = vpack.c.bf16 %v3201_v61, %v3201_v61  ;;  %v3008_v12 = vmax.f32 %v7421_v35, %v2890_v57  ;;  %v4599_v20 = vld [vmem:[%s4765_s17 + $0x3b0] sm:$0xff] }
 0x33b   : > { %2382 = vperm.xlu1 %4460, %v4596_v1   ;;  %v2917_v23 = vmax.f32 %v2789_v26, 0.0  ;;  %v7544_v3 = vpop.permute.xlu0 %2242  ;;  %v2665_v13 = vadd.f32 %v2537_v34, %v6853_v56  ;;  %v2616_v58 = vadd.f32 %v2488_v30, %v9450_v7  ;;  %v2545_v61 = vmul.f32 %v6783_v37, %v2259_v39  ;;  %v4598_v56 = vld [vmem:[%s4765_s17 + $0x378] sm:$0xff] }
 0x33c   : > { %v3367_v22 = vmax.f32 %v3365_v31, %v3366_v51  ;;  %v3373_v48 = vrot.slane %v3372_v24, 2  ;;  %v3122_v17 = vcombine.high %v3008_v12, %v3008_v12  ;;  %v3265_v62 = vsel %vm3180_vm0, %v3008_v12, -inf }
 0x33d   : > { %v3017_v55 = vmax.f32 %v7390_v16, %v2917_v23  ;;  %v3266_v26 = vrot.slane %v3265_v62, 4  ;;  %v2800_v31 = vadd.f32 %v7554_v32, %v2665_v13  ;;  %v2751_v16 = vadd.f32 %v7554_v32, %v2616_v58  ;;  %v2355_v39 = vpop.permute.xlu1 %2354 }
 0x33e   : > { %v3368_v35 = vrot.slane %v3367_v22, 1  ;;  %v3374_v57 = vmax.f32 %v3372_v24, %v3373_v48  ;;  %v3272_v51 = vsel %vm3180_vm0, %v3122_v17, -inf  ;;  %v7563_v7 = vunpack.c.l.b16 %v3631_v49 }
 0x33f   : > { %2398 = vperm.xlu1 %4460, %v4598_v56   ;;  %v3125_v34 = vcombine.high %v3017_v55, %v3017_v55  ;;  %v3307_v30 = vsel %vm3180_vm0, %v3017_v55, -inf  ;;  %v7561_v24 = vpop.permute.xlu0 %2158  ;;  %v3267_v23 = vmax.f32 %v3265_v62, %v3266_v26  ;;  %v3273_v48 = vrot.slane %v3272_v51, 4 }
 0x340   : > { %v3369_v1 = vmax.f32 %v3367_v22, %v3368_v35  ;;  %v3375_v12 = vrot.slane %v3374_v57, 1  ;;  %v3308_v13 = vrot.slane %v3307_v30, 4  ;;  %v2879_v60 = vmax.f32 %v2751_v16, 0.0 }
 0x341   : > { %v3314_v56 = vsel %vm3180_vm0, %v3125_v34, -inf  ;;  %v3268_v59 = vrot.slane %v3267_v23, 2  ;;  %v7566_v55 = vmax.f32 %v3272_v51, %v3273_v48  ;;  %v2928_v10 = vmax.f32 %v2800_v31, 0.0  ;;  %v7570_v62 = vpop.permute.xlu1 %2386 }
 0x342   : > { %v3376_v17 = vmax.f32 %v3374_v57, %v3375_v12  ;;  %v3655_v4 = vpack.c.bf16 %v3369_v1, %v3369_v1  ;;  %v3309_v58 = vmax.f32 %v3307_v30, %v3308_v13  ;;  %v3315_v2 = vrot.slane %v3314_v56, 4  ;;  %v9451_v30 = vld [vmem:[#allocation51_spill] sm:$0xff] }
 0x343   : > { %2426 = vperm.xlu1 %4460, %v4599_v20   ;;  %v2673_v22 = vadd.f32 %v2545_v61, %v6897_v43  ;;  %v7572_v49 = vpop.permute.xlu0 %2186  ;;  %v7576_v34 = vmax.f32 %v3267_v23, %v3268_v59  ;;  %v7579_v57 = vmax.f32 %v7437_v9, %v2879_v60  ;;  %v2495_v31 = vmul.f32 %v6783_v37, %v7507_v8  ;;  %v9452_v23 = vld [vmem:[#allocation77_spill] sm:$0xff] }
 0x344   : > { %v3656_v35 = vpack.c.bf16 %v3376_v17, %v3376_v17  ;;  %v7574_v26 = vunpack.c.l.b16 %v3655_v4  ;;  %v3310_v51 = vrot.slane %v3309_v58, 2  ;;  %v3316_v16 = vmax.f32 %v3314_v56, %v3315_v2 }
 0x345   : > { %v2808_v20 = vadd.f32 %v7554_v32, %v2673_v22  ;;  %v3275_v61 = vrot.slane %v7566_v55, 2  ;;  %v2524_v4 = vmul.f32 %v6783_v37, %v7523_v11  ;;  %v2533_v59 = vmul.f32 %v6783_v37, %v7525_v5  ;;  %v7593_v12 = vpop.permute.xlu1 %2078 }
 0x346   : > { %v7584_v43 = vunpack.c.l.b16 %v3656_v35  ;;  %v3311_v9 = vmax.f32 %v3309_v58, %v3310_v51  ;;  %v3317_v60 = vrot.slane %v3316_v16, 2  ;;  %v2623_v1 = vadd.f32 %v2495_v31, %v9451_v30 }
 0x347   : > { %2454 = vperm.xlu1 %4460, %v7352_v41   ;;  %v2936_v2 = vmax.f32 %v2808_v20, 0.0  ;;  %v7595_v8 = vpop.permute.xlu0 %2338  ;;  %v2652_v48 = vadd.f32 %v2524_v4, %v9452_v23  ;;  %v2661_v13 = vadd.f32 %v2533_v59, %v6829_v14  ;;  %v2531_v11 = vmul.f32 %v6783_v37, %v7542_v33  ;;  %v4600_v20 = vld [vmem:[%s4765_s17 + $0x2b8] sm:$0xff] }
 0x348   : > { %v2541_v41 = vmul.f32 %v6783_v37, %v7544_v3  ;;  %v3312_v5 = vrot.slane %v3311_v9, 1  ;;  %v3318_v56 = vmax.f32 %v3316_v16, %v3317_v60  ;;  %v2758_v58 = vadd.f32 %v7554_v32, %v2623_v1 }
 0x349   : > { %v7603_v17 = vmax.f32 %v2928_v10, %v2936_v2  ;;  %v2787_v22 = vadd.f32 %v7554_v32, %v2652_v48  ;;  %v2796_v35 = vadd.f32 %v7554_v32, %v2661_v13  ;;  %v2659_v51 = vadd.f32 %v2531_v11, %v6813_v27  ;;  %v7612_v10 = vpop.permute.xlu1 %2230  ;;  %v4601_v11 = vld [vmem:[%s4765_s17 + $0x2f0] sm:$0xff] }
 0x34a   : > { %v2669_v14 = vadd.f32 %v2541_v41, %v6873_v42  ;;  %v3313_v33 = vmax.f32 %v3311_v9, %v3312_v5  ;;  %v3319_v31 = vrot.slane %v3318_v56, 1  ;;  %v2886_v4 = vmax.f32 %v2758_v58, 0.0 }
 0x34b   : > { %2302 = vperm.xlu1 %4460, %v4600_v20   ;;  %v2569_v3 = vmul.f32 %v6783_v37, %v2355_v39  ;;  %v3270_v16 = vrot.slane %v7576_v34, 1  ;;  %v2915_v59 = vmax.f32 %v2787_v22, 0.0  ;;  %v2794_v60 = vadd.f32 %v7554_v32, %v2659_v51  ;;  %v7617_v27 = vpop.permute.xlu0 %2370 }
 0x34c   : > { %v2804_v2 = vadd.f32 %v7554_v32, %v2669_v14  ;;  %v3320_v42 = vmax.f32 %v3318_v56, %v3319_v31  ;;  %v3647_v30 = vpack.c.bf16 %v3313_v33, %v3313_v33  ;;  %v2996_v9 = vmax.f32 %v7454_v6, %v2886_v4  ;;  %v9453_v33 = vld [vmem:[#allocation84_spill] sm:$0xff] }
 0x34d   : > { %v2697_v1 = vadd.f32 %v2569_v3, %v7040_v38  ;;  %v2924_v23 = vmax.f32 %v2796_v35, 0.0  ;;  %v2922_v48 = vmax.f32 %v2794_v60, 0.0  ;;  %v2520_v13 = vmul.f32 %v6783_v37, %v7561_v24  ;;  %v2263_v56 = vpop.permute.xlu1 %2262 }
 0x34e   : > { %v2932_v39 = vmax.f32 %v2804_v2, 0.0  ;;  %v3648_v41 = vpack.c.bf16 %v3320_v42, %v3320_v42  ;;  %v3118_v5 = vcombine.high %v2996_v9, %v2996_v9  ;;  %v3209_v58 = vsel %vm3180_vm0, %v2996_v9, -inf  ;;  %v7647_v9 = vld [vmem:[%s4765_s17 + $0x3f8] sm:$0xff] }
 0x34f   : > { %2330 = vperm.xlu1 %4460, %v4601_v11   ;;  %v7626_v22 = vmax.f32 %v7461_v28, %v2915_v59  ;;  %v7628_v51 = vunpack.c.l.b16 %v3647_v30  ;;  %v3210_v6 = vrot.slane %v3209_v58, 4  ;;  %v3032_v38 = vmax.f32 %v7485_v52, %v2922_v48  ;;  %v7633_v14 = vpop.permute.xlu0 %2062 }
 0x350   : > { %v7631_v35 = vmax.f32 %v2924_v23, %v2932_v39  ;;  %v3216_v24 = vsel %vm3180_vm0, %v3118_v5, -inf  ;;  %v2832_v20 = vadd.f32 %v7554_v32, %v2697_v1  ;;  %v2648_v31 = vadd.f32 %v2520_v13, %v9453_v33 }
 0x351   : > { %v2577_v28 = vmul.f32 %v6783_v37, %v7570_v62  ;;  %v3211_v4 = vmax.f32 %v3209_v58, %v3210_v6  ;;  %v3217_v3 = vrot.slane %v3216_v24, 4  ;;  %v3130_v59 = vcombine.high %v3032_v38, %v3032_v38 }
 0x352   : > { %v3377_v60 = vsel %vm3180_vm0, %v3032_v38, -inf  ;;  %v7642_v52 = vunpack.c.l.b16 %v3648_v41  ;;  %v2783_v42 = vadd.f32 %v7554_v32, %v2648_v31  ;;  %v7650_v1 = vpop.permute.xlu1 %2290  ;;  %v2960_v58 = vmax.f32 %v2832_v20, 0.0 }
 0x353   : > { %4462 = vset.pattern.permute.xlu1 %v9368_v53  ;;  %v3378_v2 = vrot.slane %v3377_v60, 4  ;;  %v2705_v30 = vadd.f32 %v2577_v28, %v7079_v21  ;;  %v3212_v62 = vrot.slane %v3211_v4, 2  ;;  %v7652_v23 = vmax.f32 %v3216_v24, %v3217_v3  ;;  %v7657_v39 = vpop.permute.xlu0 %2214 }
 0x354   : > { %1690 = vperm.xlu1 %4462, %v7647_v9   ;;  %v3384_v48 = vsel %vm3180_vm0, %v3130_v59, -inf  ;;  %v2527_v53 = vmul.f32 %v6783_v37, %v7572_v49  ;;  %v2911_v41 = vmax.f32 %v2783_v42, 0.0  ;;  %v2500_v38 = vmul.f32 %v6783_v37, %v7593_v12  ;;  %v4603_v12 = vld [vmem:[%s4765_s17 + $0x398] sm:$0xff] }
 0x355   : > { %v3379_v13 = vmax.f32 %v3377_v60, %v3378_v2  ;;  %v3385_v11 = vrot.slane %v3384_v48, 4  ;;  %v2840_v21 = vadd.f32 %v7554_v32, %v2705_v30  ;;  %v7660_v5 = vmax.f32 %v3211_v4, %v3212_v62  ;;  %v9454_v4 = vld [vmem:[#allocation54_spill] sm:$0xff] }
 0x356   : > { %v2655_v6 = vadd.f32 %v2527_v53, %v6797_v19  ;;  %v3219_v24 = vrot.slane %v7652_v23, 2  ;;  %v7668_v28 = vmax.f32 %v7516_v45, %v2911_v41  ;;  %v2628_v59 = vadd.f32 %v2500_v38, %v9454_v4 }
 0x357   : > { %v3380_v33 = vrot.slane %v3379_v13, 2  ;;  %v3386_v49 = vmax.f32 %v3384_v48, %v3385_v11  ;;  %v2968_v31 = vmax.f32 %v2840_v21, 0.0  ;;  %v2565_v19 = vmul.f32 %v6783_v37, %v7595_v8  ;;  %v7674_v20 = vpop.permute.xlu0 %2246 }
 0x358   : > { %4463 = vset.pattern.permute.xlu1 %v9383_v29  ;;  %v2790_v3 = vadd.f32 %v7554_v32, %v2655_v6  ;;  %v2538_v45 = vmul.f32 %v6783_v37, %v7612_v10  ;;  %v2763_v62 = vadd.f32 %v7554_v32, %v2628_v59  ;;  %v2573_v8 = vmul.f32 %v6783_v37, %v7617_v27 }
 0x359   : > { %2414 = vperm.xlu1 %4463, %v4603_v12   ;;  %v7677_v60 = vpop.permute.xlu1 %1678  ;;  %v3381_v2 = vmax.f32 %v3379_v13, %v3380_v33  ;;  %v3387_v42 = vrot.slane %v3386_v49, 2  ;;  %v7679_v29 = vmax.f32 %v2960_v58, %v2968_v31  ;;  %v2693_v48 = vadd.f32 %v2565_v19, %v7011_v0  ;;  %v4604_v33 = vld [vmem:[%s4765_s17 + $0x3d0] sm:$0xff] }
 0x35a   : > { %v2918_v30 = vmax.f32 %v2790_v3, 0.0  ;;  %v2666_v13 = vadd.f32 %v2538_v45, %v6862_v44  ;;  %v2546_v41 = vmul.f32 %v6783_v37, %v2263_v56  ;;  %v2891_v58 = vmax.f32 %v2763_v62, 0.0 }
 0x35b   : > { %v3382_v53 = vrot.slane %v3381_v2, 1  ;;  %v7687_v11 = vmax.f32 %v3386_v49, %v3387_v42  ;;  %v2828_v10 = vadd.f32 %v7554_v32, %v2693_v48  ;;  %v2701_v6 = vadd.f32 %v2573_v8, %v7061_v18  ;;  %v2275_v38 = vpop.permute.xlu0 %2274 }
 0x35c   : > { %v3020_v21 = vmax.f32 %v7533_v15, %v2918_v30  ;;  %v3214_v0 = vrot.slane %v7660_v5, 1  ;;  %v2801_v49 = vadd.f32 %v7554_v32, %v2666_v13  ;;  %v2674_v31 = vadd.f32 %v2546_v41, %v6900_v50 }
 0x35d   : > { %2442 = vperm.xlu1 %4463, %v4604_v33   ;;  %v3383_v27 = vmax.f32 %v3381_v2, %v3382_v53  ;;  %v3011_v4 = vmax.f32 %v7530_v36, %v2891_v58  ;;  %v2956_v19 = vmax.f32 %v2828_v10, 0.0  ;;  %v2836_v12 = vadd.f32 %v7554_v32, %v2701_v6 }
 0x35e   : > { %v2191_v44 = vpop.permute.xlu1 %2190  ;;  %v3126_v3 = vcombine.high %v3020_v21, %v3020_v21  ;;  %v3321_v15 = vsel %vm3180_vm0, %v3020_v21, -inf  ;;  %v2809_v50 = vadd.f32 %v7554_v32, %v2674_v31  ;;  %v2929_v36 = vmax.f32 %v2801_v49, 0.0  ;;  %v9455_v49 = vld [vmem:[#allocation56_spill] sm:$0xff] }
 0x35f   : > { %v3657_v59 = vpack.c.bf16 %v3383_v27, %v3383_v27  ;;  %v3322_v18 = vrot.slane %v3321_v15, 4  ;;  %v3123_v2 = vcombine.high %v3011_v4, %v3011_v4  ;;  %v3279_v45 = vsel %vm3180_vm0, %v3011_v4, -inf }
 0x360   : > { %v3328_v42 = vsel %vm3180_vm0, %v3126_v3, -inf  ;;  %v2207_v30 = vpop.permute.xlu0 %2206  ;;  %v3280_v8 = vrot.slane %v3279_v45, 4  ;;  %v2964_v41 = vmax.f32 %v2836_v12, 0.0  ;;  %v2937_v21 = vmax.f32 %v2809_v50, 0.0 }
 0x361   : > { %2458 = vperm.xlu1 %4463, %v7499_v46   ;;  %v3323_v62 = vmax.f32 %v3321_v15, %v3322_v18  ;;  %v3329_v48 = vrot.slane %v3328_v42, 4  ;;  %v7707_v13 = vsel %vm3180_vm0, %v3123_v2, -inf  ;;  %v2496_v58 = vmul.f32 %v6783_v37, %v7633_v14  ;;  %v4605_v18 = vld [vmem:[%s4765_s17 + $0x2f8] sm:$0xff] }
 0x362   : > { %v2343_v53 = vpop.permute.xlu1 %2342  ;;  %v7711_v10 = vunpack.c.l.b16 %v3657_v59  ;;  %v7713_v27 = vmax.f32 %v3279_v45, %v3280_v8  ;;  %v7715_v46 = vmax.f32 %v2956_v19, %v2964_v41  ;;  %v7717_v31 = vmax.f32 %v2929_v36, %v2937_v21 }
 0x363   : > { %v3324_v6 = vrot.slane %v3323_v62, 2  ;;  %v3330_v33 = vmax.f32 %v3328_v42, %v3329_v48  ;;  %v2624_v3 = vadd.f32 %v2496_v58, %v9455_v49  ;;  %v2553_v15 = vmul.f32 %v6783_v37, %v7650_v1 }
 0x364   : > { %v2375_v4 = vpop.permute.xlu0 %2374  ;;  %v2534_v42 = vmul.f32 %v6783_v37, %v7657_v39  ;;  %v2542_v50 = vmul.f32 %v6783_v37, %v7674_v20  ;;  %v1821_v1 = vmul.f32 %v6150_v40, %v7677_v60  ;;  %v2549_v36 = vmul.f32 %v6783_v37, %v2275_v38 }
 0x365   : > { %2334 = vperm.xlu1 %4463, %v4605_v18   ;;  %v3325_v12 = vmax.f32 %v3323_v62, %v3324_v6  ;;  %v3331_v14 = vrot.slane %v3330_v33, 2  ;;  %v2759_v19 = vadd.f32 %v7554_v32, %v2624_v3  ;;  %v2681_v45 = vadd.f32 %v2553_v15, %v6949_v25  ;;  %v9456_v6 = vld [vmem:[#allocation16_spill] sm:$0xff] }
 0x366   : > { %v2359_v2 = vpop.permute.xlu1 %2358  ;;  %v3282_v62 = vrot.slane %v7713_v27, 2  ;;  %v2662_v8 = vadd.f32 %v2534_v42, %v6832_v47  ;;  %v2670_v25 = vadd.f32 %v2542_v50, %v6884_v63  ;;  %v7742_v49 = vadd.f32 %v1821_v1, %v9456_v6 }
 0x367   : > { %v3326_v48 = vrot.slane %v3325_v12, 1  ;;  %v7735_v41 = vmax.f32 %v3330_v33, %v3331_v14  ;;  %v2887_v39 = vmax.f32 %v2759_v19, 0.0  ;;  %v2816_v21 = vadd.f32 %v7554_v32, %v2681_v45 }
 0x368   : > { %v2403_v58 = vpop.permute.xlu0 %2402  ;;  %v2797_v60 = vadd.f32 %v7554_v32, %v2662_v8  ;;  %9457 = vst [vmem:[#allocation155_spill] sm:$0xff] %v7742_v49  ;;  %v2677_v47 = vadd.f32 %v2549_v36, %v6919_v54  ;;  %v2805_v15 = vadd.f32 %v7554_v32, %v2670_v25  ;;  %v2528_v18 = vmul.f32 %v6783_v37, %v2191_v44  ;;  %v9458_v8 = vld [vmem:[#allocation82_spill] sm:$0xff] }
 0x369   : > { %2462 = vperm.xlu1 %4463, %v7647_v9   ;;  %v3327_v20 = vmax.f32 %v3325_v12, %v3326_v48  ;;  %v2999_v38 = vmax.f32 %v7579_v57, %v2887_v39  ;;  %v2944_v33 = vmax.f32 %v2816_v21, 0.0  ;;  %v2532_v12 = vmul.f32 %v6783_v37, %v2207_v30  ;;  %v9459_v30 = vld [vmem:[#allocation81_spill] sm:$0xff] }
 0x36a   : > { %v2391_v3 = vpop.permute.xlu1 %2390  ;;  %v2925_v14 = vmax.f32 %v2797_v60, 0.0  ;;  %v2812_v9 = vadd.f32 %v7554_v32, %v2677_v47  ;;  %v2933_v54 = vmax.f32 %v2805_v15, 0.0  ;;  %v2656_v44 = vadd.f32 %v2528_v18, %v9458_v8  ;;  %v9462_v8 = vld [vmem:[#allocation105_spill] sm:$0xff] }
 0x36b   : > { %v3649_v63 = vpack.c.bf16 %v3327_v20, %v3327_v20  ;;  %v3119_v42 = vcombine.high %v2999_v38, %v2999_v38  ;;  %v3223_v19 = vsel %vm3180_vm0, %v2999_v38, -inf  ;;  %v7752_v45 = vmax.f32 %v7603_v17, %v2944_v33  ;;  %v9460_v33 = vld [vmem:[#allocation111_spill] sm:$0xff] }
 0x36c   : > { %v2219_v50 = vpop.permute.xlu0 %2218  ;;  %v3224_v1 = vrot.slane %v3223_v19, 4  ;;  %v2940_v48 = vmax.f32 %v2812_v9, 0.0  ;;  %v7758_v21 = vmax.f32 %v2925_v14, %v2933_v54  ;;  %v2660_v25 = vadd.f32 %v2532_v12, %v9459_v30 }
 0x36d   : > { %v7756_v39 = vunpack.c.l.b16 %v3649_v63  ;;  %v2566_v20 = vmul.f32 %v6783_v37, %v2343_v53  ;;  %v7765_v17 = vsel %vm3180_vm0, %v3119_v42, -inf  ;;  %v2791_v47 = vadd.f32 %v7554_v32, %v2656_v44 }
 0x36e   : > { %v2419_v36 = vpop.permute.xlu1 %2418  ;;  %v7762_v60 = vmax.f32 %v3223_v19, %v3224_v1  ;;  %v7768_v6 = vmax.f32 %v7631_v35, %v2940_v48  ;;  %v2795_v38 = vadd.f32 %v7554_v32, %v2660_v25  ;;  %v2574_v18 = vmul.f32 %v6783_v37, %v2375_v4  ;;  %v9461_v1 = vld [vmem:[#allocation109_spill] sm:$0xff] }
 0x36f   : > { %v2694_v15 = vadd.f32 %v2566_v20, %v9460_v33  ;;  %v2570_v63 = vmul.f32 %v6783_v37, %v2359_v2  ;;  %v2919_v9 = vmax.f32 %v2791_v47, 0.0  ;;  %v2581_v12 = vmul.f32 %v6783_v37, %v2403_v58  ;;  %v9463_v2 = vld [vmem:[#allocation166_spill] sm:$0xff]  ;;  %v9464_v25 = vld [vmem:[#allocation113_spill] sm:$0xff] }
 0x370   : > { %v2251_v14 = vpop.permute.xlu0 %2250  ;;  %v3226_v53 = vrot.slane %v7762_v60, 2  ;;  %v2578_v42 = vmul.f32 %v6783_v37, %v2391_v3  ;;  %v2923_v19 = vmax.f32 %v2795_v38, 0.0  ;;  %v2702_v48 = vadd.f32 %v2574_v18, %v9461_v1 }
 0x371   : > { %v2829_v54 = vadd.f32 %v7554_v32, %v2694_v15  ;;  %v2698_v44 = vadd.f32 %v2570_v63, %v9462_v8  ;;  %v3023_v4 = vmax.f32 %v7668_v28, %v2919_v9  ;;  %v2709_v30 = vadd.f32 %v2581_v12, %v9463_v2 }
 0x372   : > { %v7778_v35 = vpop.permute.xlu1 %2234  ;;  %v2706_v20 = vadd.f32 %v2578_v42, %v9464_v25  ;;  %v2535_v47 = vmul.f32 %v6783_v37, %v2219_v50  ;;  %v3035_v58 = vmax.f32 %v7626_v22, %v2923_v19  ;;  %v2837_v33 = vadd.f32 %v7554_v32, %v2702_v48 }
 0x373   : > { %v2957_v3 = vmax.f32 %v2829_v54, 0.0  ;;  %v2833_v38 = vadd.f32 %v7554_v32, %v2698_v44  ;;  %v3127_v15 = vcombine.high %v3023_v4, %v3023_v4  ;;  %v3335_v18 = vsel %vm3180_vm0, %v3023_v4, -inf }
 0x374   : > { %v2844_v63 = vadd.f32 %v7554_v32, %v2709_v30  ;;  %v2841_v28 = vadd.f32 %v7554_v32, %v2706_v20  ;;  %v3336_v12 = vrot.slane %v3335_v18, 4  ;;  %v3131_v42 = vcombine.high %v3035_v58, %v3035_v58  ;;  %v7796_v22 = vpop.permute.xlu0 %2278 }
 0x375   : > { %v3391_v50 = vsel %vm3180_vm0, %v3035_v58, -inf  ;;  %v2965_v1 = vmax.f32 %v2837_v33, 0.0  ;;  %v3342_v19 = vsel %vm3180_vm0, %v3127_v15, -inf  ;;  %v2961_v48 = vmax.f32 %v2833_v38, 0.0  ;;  %v9466_v15 = vld [vmem:[#allocation87_spill] sm:$0xff] }
 0x376   : > { %v7793_v9 = vpop.permute.xlu1 %2266  ;;  %v3392_v54 = vrot.slane %v3391_v50, 4  ;;  %v2972_v8 = vmax.f32 %v2844_v63, 0.0  ;;  %v3337_v44 = vmax.f32 %v3335_v18, %v3336_v12  ;;  %v3343_v4 = vrot.slane %v3342_v19, 4 }
 0x377   : > { %v3398_v2 = vsel %vm3180_vm0, %v3131_v42, -inf  ;;  %v7800_v30 = vmax.f32 %v2957_v3, %v2965_v1  ;;  %v2969_v58 = vmax.f32 %v2841_v28, 0.0  ;;  %v2663_v38 = vadd.f32 %v2535_v47, %v9466_v15  ;;  %v9468_v1 = vld [vmem:[#allocation123_spill] sm:$0xff] }
 0x378   : > { %v3393_v25 = vmax.f32 %v3391_v50, %v3392_v54  ;;  %v3399_v20 = vrot.slane %v3398_v2, 4  ;;  %v7803_v56 = vmax.f32 %v7715_v46, %v2972_v8  ;;  %v3338_v57 = vrot.slane %v3337_v44, 2  ;;  %v7823_v54 = vpop.permute.xlu0 %2306  ;;  %v9469_v8 = vld [vmem:[#allocation96_spill] sm:$0xff] }
 0x379   : > { %v7807_v59 = vmax.f32 %v3342_v19, %v3343_v4  ;;  %v2585_v18 = vmul.f32 %v6783_v37, %v2419_v36  ;;  %v7813_v3 = vmax.f32 %v2961_v48, %v2969_v58  ;;  %v2543_v42 = vmul.f32 %v6783_v37, %v2251_v14 }
 0x37a   : > { %9465 = vst [vmem:[#allocation156_spill] sm:$0xff] %v7803_v56  ;;  %v7805_v33 = vpop.permute.xlu1 %2294  ;;  %v3394_v63 = vrot.slane %v3393_v25, 2  ;;  %v7811_v12 = vmax.f32 %v3398_v2, %v3399_v20  ;;  %v3231_v46 = vrot.slane %v7765_v17, 4  ;;  %v7817_v50 = vmax.f32 %v3337_v44, %v3338_v57  ;;  %v9470_v20 = vld [vmem:[#allocation153_spill] sm:$0xff] }
 0x37b   : > { %9467 = vst [vmem:[#allocation157_spill] sm:$0xff] %v7813_v3  ;;  %v7820_v28 = vadd.f32 %v7554_v32, %v2663_v38  ;;  %v2713_v19 = vadd.f32 %v2585_v18, %v9468_v1  ;;  %v2671_v4 = vadd.f32 %v2543_v42, %v9469_v8  ;;  %v9471_v58 = vrot.slane %v9470_v20, 1  ;;  %v9472_v8 = vld [vmem:[#allocation130_spill] sm:$0xff] }
 0x37c   : > { %v7826_v47 = vmax.f32 %v3393_v25, %v3394_v63  ;;  %v3215_v25 = vmax.f32 %v7660_v5, %v3214_v0  ;;  %v3220_v18 = vmax.f32 %v7652_v23, %v3219_v24  ;;  %v3227_v63 = vmax.f32 %v7762_v60, %v3226_v53 }
 0x37d   : > { %v2848_v2 = vadd.f32 %v7554_v32, %v2713_v19  ;;  %v3208_v15 = vmax.f32 %v9470_v20, %v9471_v58  ;;  %v7839_v38 = vadd.f32 %v7554_v32, %v2671_v4  ;;  %v3232_v19 = vmax.f32 %v7765_v17, %v3231_v46  ;;  %v7870_v46 = vpop.permute.xlu0 %2362 }
 0x37e   : > { %v7830_v14 = vpop.permute.xlu1 %2322  ;;  %v9473_v4 = vrot.slane %v9472_v8, 1  ;;  %v3221_v58 = vrot.slane %v3220_v18, 1  ;;  %v3228_v48 = vrot.slane %v3227_v63, 1  ;;  %v3271_v5 = vmax.f32 %v7576_v34, %v3270_v16 }
 0x37f   : > { %v2976_v1 = vmax.f32 %v2848_v2, 0.0  ;;  %v3276_v23 = vmax.f32 %v7566_v55, %v3275_v61  ;;  %v3233_v0 = vrot.slane %v3232_v19, 2  ;;  %v3283_v60 = vmax.f32 %v7713_v27, %v3282_v62 }
 0x380   : > { %v3264_v20 = vmax.f32 %v9472_v8, %v9473_v4  ;;  %v9475_v17 = vrot.slane %v7707_v13, 4  ;;  %v3222_v55 = vmax.f32 %v3220_v18, %v3221_v58  ;;  %v3229_v61 = vmax.f32 %v3227_v63, %v3228_v48 }
 0x381   : > { %v7862_v24 = vmax.f32 %v7679_v29, %v2976_v1  ;;  %v3277_v2 = vrot.slane %v3276_v23, 1  ;;  %v3234_v29 = vmax.f32 %v3232_v19, %v3233_v0  ;;  %v3284_v1 = vrot.slane %v3283_v60, 1  ;;  %v2407_v58 = vpop.permute.xlu0 %2406 }
 0x382   : > { %v3288_v53 = vmax.f32 %v7707_v13, %v9475_v17  ;;  %v3632_v4 = vpack.c.bf16 %v3208_v15, %v3208_v15  ;;  %v3633_v57 = vpack.c.bf16 %v3215_v25, %v3215_v25  ;;  %v3634_v27 = vpack.c.bf16 %v3222_v55, %v3222_v55 }
 0x383   : > { %9474 = vst [vmem:[#allocation158_spill] sm:$0xff] %v7862_v24  ;;  %v7872_v34 = vpop.permute.xlu1 %1682  ;;  %v3278_v42 = vmax.f32 %v3276_v23, %v3277_v2  ;;  %v3635_v62 = vpack.c.bf16 %v3229_v61, %v3229_v61  ;;  %v3235_v36 = vrot.slane %v3234_v29, 1  ;;  %v3285_v44 = vmax.f32 %v3283_v60, %v3284_v1  ;;  %v9479_v2 = vld [vmem:[#allocation148_spill] sm:$0xff] }
 0x384   : > { %v3289_v8 = vrot.slane %v3288_v53, 2  ;;  %v3640_v17 = vpack.c.bf16 %v3264_v20, %v3264_v20  ;;  %v3641_v24 = vpack.c.bf16 %v3271_v5, %v3271_v5  ;;  %v3783_v49 = vunpack.c.l.b16 %v3632_v4  ;;  %v9477_v20 = vld [vmem:[#allocation149_spill] sm:$0xff] }
 0x385   : > { %v3642_v3 = vpack.c.bf16 %v3278_v42, %v3278_v42  ;;  %v3784_v56 = vunpack.c.l.b16 %v3633_v57  ;;  %v3236_v48 = vmax.f32 %v3234_v29, %v3235_v36  ;;  %v3643_v63 = vpack.c.bf16 %v3285_v44, %v3285_v44 }
 0x386   : > { %v3290_v13 = vmax.f32 %v3288_v53, %v3289_v8  ;;  %v3785_v19 = vunpack.c.l.b16 %v3634_v27  ;;  %v3786_v15 = vunpack.c.l.b16 %v3635_v62  ;;  %v3791_v23 = vunpack.c.l.b16 %v3640_v17  ;;  %v9476_v53 = vld [vmem:[#allocation129_spill] sm:$0xff]  ;;  %v9480_v27 = vld [vmem:[#allocation154_spill] sm:$0xff] }
 0x387   : > { %v3792_v25 = vunpack.c.l.b16 %v3641_v24  ;;  %v3793_v0 = vunpack.c.l.b16 %v3642_v3  ;;  %v3636_v61 = vpack.c.bf16 %v3236_v48, %v3236_v48  ;;  %v3794_v60 = vunpack.c.l.b16 %v3643_v63  ;;  %v9478_v24 = vld [vmem:[#allocation125_spill] sm:$0xff]  ;;  %v9481_v48 = vld [vmem:[#allocation92_spill] sm:$0xff] }
 0x388   : > { %v7875_v16 = vpop.permute.xlu1 %2346  ;;  %v3291_v18 = vrot.slane %v3290_v13, 1  ;;  %v3845_v42 = vsel %vm3844_vm1, %v9477_v20, %v9476_v53  ;;  %v3858_v29 = vsel %vm3844_vm1, %v9479_v2, %v9478_v24  ;;  %v2539_v1 = vmul.f32 %v6783_v37, %v7778_v35 }
 0x389   : > { %v3787_v44 = vunpack.c.l.b16 %v3636_v61  ;;  %v3847_v5 = vsel %vm3846_vm2, %v7563_v7, %v3845_v42  ;;  %v3859_v62 = vsel %vm3846_vm2, %v9480_v27, %v3858_v29  ;;  %v2550_v7 = vmul.f32 %v6783_v37, %v7796_v22  ;;  %v9482_v61 = vld [vmem:[#allocation95_spill] sm:$0xff]  ;;  %v9483_v42 = vld [vmem:[#allocation90_spill] sm:$0xff] }
 0x38a   : > { %v3292_v55 = vmax.f32 %v3290_v13, %v3291_v18  ;;  %v3849_v3 = vsel %vm3848_vm3, %v3783_v49, %v3847_v5  ;;  %v7895_v13 = vpop.permute.xlu0 %2434  ;;  %v3860_v17 = vsel %vm3848_vm3, %v3791_v23, %v3859_v62  ;;  %v2667_v18 = vadd.f32 %v2539_v1, %v9481_v48 }
 0x38b   : > { %v3851_v4 = vsel %vm3850_vm4, %v3784_v56, %v3849_v3  ;;  %v2547_v35 = vmul.f32 %v6783_v37, %v7793_v9  ;;  %v2678_v53 = vadd.f32 %v2550_v7, %v9482_v61  ;;  %v2557_v22 = vmul.f32 %v6783_v37, %v7823_v54 }
 0x38c   : > { %v7880_v36 = vpop.permute.xlu1 %2378  ;;  %v3644_v57 = vpack.c.bf16 %v3292_v55, %v3292_v55  ;;  %v3853_v49 = vsel %vm3852_vm5, %v3785_v19, %v3851_v4  ;;  %v3861_v55 = vsel %vm3850_vm4, %v3792_v25, %v3860_v17  ;;  %v2802_v20 = vadd.f32 %v7554_v32, %v2667_v18  ;;  %v9485_v4 = vld [vmem:[#allocation99_spill] sm:$0xff] }
 0x38d   : > { %v3855_v56 = vsel %vm3854_vm6, %v3786_v15, %v3853_v49  ;;  %v3862_v23 = vsel %vm3852_vm5, %v3793_v0, %v3861_v55  ;;  %v2813_v5 = vadd.f32 %v7554_v32, %v2678_v53  ;;  %v9484_v15 = vld [vmem:[#allocation103_spill] sm:$0xff]  ;;  %v2554_v25 = vmul.f32 %v6783_v37, %v7805_v33  ;;  %v9486_v33 = vld [vmem:[#allocation110_spill] sm:$0xff] }
 0x38e   : > { %v3795_v8 = vunpack.c.l.b16 %v3644_v57  ;;  %v3857_v19 = vsel %vm3856_vm7, %v3787_v44, %v3855_v56  ;;  %v2675_v57 = vadd.f32 %v2547_v35, %v9483_v42  ;;  %v3863_v9 = vsel %vm3854_vm6, %v3794_v60, %v3862_v23  ;;  %v7926_v62 = vpop.permute.xlu0 %2222 }
 0x38f   : > { %v2685_v3 = vadd.f32 %v2557_v22, %v9484_v15  ;;  %v2930_v54 = vmax.f32 %v2802_v20, 0.0  ;;  %v2571_v0 = vmul.f32 %v6783_v37, %v7870_v46  ;;  %v2941_v1 = vmax.f32 %v2813_v5, 0.0  ;;  %v9490_v22 = vld [vmem:[#allocation118_spill] sm:$0xff] }
 0x390   : > { %v7902_v63 = vpop.permute.xlu1 %2394  ;;  %v3864_v24 = vsel %vm3856_vm7, %v3795_v8, %v3863_v9  ;;  %v2810_v44 = vadd.f32 %v7554_v32, %v2675_v57  ;;  %v2682_v27 = vadd.f32 %v2554_v25, %v9485_v4  ;;  %v2561_v8 = vmul.f32 %v6783_v37, %v7830_v14  ;;  %v9489_v14 = vld [vmem:[#allocation102_spill] sm:$0xff] }
 0x391   : > { %v3907_v29 = vpack.c.b16 %v3864_v24, %v3857_v19  ;;  %v2820_v60 = vadd.f32 %v7554_v32, %v2685_v3  ;;  %v2699_v49 = vadd.f32 %v2571_v0, %v9486_v33  ;;  %v2582_v17 = vmul.f32 %v6783_v37, %v2407_v58 }
 0x392   : > { %v2938_v7 = vmax.f32 %v2810_v44, 0.0  ;;  %v9487_v46 = vmax.f32 %v7839_v38, 0.0  ;;  %v9488_v48 = vmax.f32 %v7820_v28, 0.0  ;;  %v7939_v35 = vmax.f32 %v7758_v21, %v2941_v1  ;;  %v7972_v44 = vpop.permute.xlu0 %2254 }
 0x393   : > { %4376 = vmatprep.mubr.bf16.mxu0 %v3907_v29  ;;  %v2948_v56 = vmax.f32 %v2820_v60, 0.0  ;;  %v2817_v55 = vadd.f32 %v7554_v32, %v2682_v27  ;;  %v7945_v53 = vadd.f32 %v7554_v32, %v2699_v49  ;;  %v2689_v58 = vadd.f32 %v2561_v8, %v9489_v14 }
 0x394   : > { %v7922_v2 = vpop.permute.xlu1 %2422  ;;  %v7936_v18 = vmax.f32 %v9488_v48, %v9487_v46  ;;  %v7942_v61 = vmax.f32 %v2930_v54, %v2938_v7  ;;  %v2710_v38 = vadd.f32 %v2582_v17, %v9490_v22  ;;  %v9491_v21 = vrot.slane %v7735_v41, 1 }
 0x395   : > { %v3038_v28 = vmax.f32 %v7768_v6, %v2948_v56  ;;  %v2945_v23 = vmax.f32 %v2817_v55, 0.0  ;;  %v9492_v42 = vrot.slane %v7807_v59, 2  ;;  %v2824_v9 = vadd.f32 %v7554_v32, %v2689_v58 }
 0x396   : > { %v3334_v20 = vmax.f32 %v7735_v41, %v9491_v21  ;;  %v7960_v5 = vadd.f32 %v7554_v32, %v2710_v38  ;;  %v9493_v15 = vrot.slane %v7817_v50, 1  ;;  %v9494_v6 = vrot.slane %v7687_v11, 1 }
 0x397   : > { %v3346_v57 = vmax.f32 %v7807_v59, %v9492_v42  ;;  %v3132_v24 = vcombine.high %v3038_v28, %v3038_v28  ;;  %v3405_v41 = vsel %vm3180_vm0, %v3038_v28, -inf  ;;  %v7970_v54 = vmax.f32 %v7717_v31, %v2945_v23 }
 0x398   : > { %v7949_v19 = vpop.permute.xlu1 %2450  ;;  %v3341_v3 = vmax.f32 %v7817_v50, %v9493_v15  ;;  %v3390_v25 = vmax.f32 %v7687_v11, %v9494_v6  ;;  %v3406_v0 = vrot.slane %v3405_v41, 4  ;;  %v2962_v32 = vmax.f32 %v7945_v53, 0.0  ;;  %v9513_v53 = vld [vmem:[#allocation157_spill] sm:$0xff] }
 0x399   : > { %v3347_v59 = vrot.slane %v3346_v57, 1  ;;  %v2952_v29 = vmax.f32 %v2824_v9, 0.0  ;;  %v9495_v1 = vrot.slane %v7826_v47, 1  ;;  %v3412_v11 = vsel %vm3180_vm0, %v3132_v24, -inf }
 0x39a   : > { %v9496_v27 = vrot.slane %v7811_v12, 2  ;;  %v3650_v7 = vpack.c.bf16 %v3334_v20, %v3334_v20  ;;  %v3407_v33 = vmax.f32 %v3405_v41, %v3406_v0  ;;  %v3413_v49 = vrot.slane %v3412_v11, 4  ;;  %v7989_v20 = vpop.permute.xlu0 %2282 }
 0x39b   : > { %v3397_v50 = vmax.f32 %v7826_v47, %v9495_v1  ;;  %v3348_v4 = vmax.f32 %v3346_v57, %v3347_v59  ;;  %v3050_v8 = vmax.f32 %v7752_v45, %v2952_v29  ;;  %v2973_v17 = vmax.f32 %v7960_v5, 0.0 }
 0x39c   : > { %v7978_v60 = vpop.permute.xlu1 %2238  ;;  %v3402_v31 = vmax.f32 %v7811_v12, %v9496_v27  ;;  %v3651_v48 = vpack.c.bf16 %v3341_v3, %v3341_v3  ;;  %v3658_v47 = vpack.c.bf16 %v3390_v25, %v3390_v25  ;;  %v3408_v55 = vrot.slane %v3407_v33, 2 }
 0x39d   : > { %v3652_v56 = vpack.c.bf16 %v3348_v4, %v3348_v4  ;;  %v3414_v14 = vmax.f32 %v3412_v11, %v3413_v49  ;;  %v3136_v58 = vcombine.high %v3050_v8, %v3050_v8  ;;  %v3461_v22 = vsel %vm3180_vm0, %v3050_v8, -inf  ;;  %v9497_v11 = vld [vmem:[#allocation151_spill] sm:$0xff]  ;;  %v9498_v4 = vld [vmem:[#allocation152_spill] sm:$0xff]  ;;  %v9499_v49 = vld [vmem:[#allocation150_spill] sm:$0xff] }
 0x39e   : > { %v3403_v46 = vrot.slane %v3402_v31, 1  ;;  %v3462_v28 = vrot.slane %v3461_v22, 4  ;;  %v3659_v23 = vpack.c.bf16 %v3397_v50, %v3397_v50  ;;  %v3801_v21 = vunpack.c.l.b16 %v3650_v7  ;;  %v9500_v8 = vld [vmem:[#allocation135_spill] sm:$0xff] }
 0x39f   : > { %v3409_v45 = vmax.f32 %v3407_v33, %v3408_v55  ;;  %v3415_v42 = vrot.slane %v3414_v14, 2  ;;  %v3468_v57 = vsel %vm3180_vm0, %v3136_v58, -inf  ;;  %v3802_v9 = vunpack.c.l.b16 %v3651_v48  ;;  %v4472_v58 = vld [vmem:[%s8482_s5 + $0x38] sm:$0xff]  }
 0x3a0   : > { %v7987_v38 = vpop.permute.xlu1 %2270  ;;  %v3404_v12 = vmax.f32 %v3402_v31, %v3403_v46  ;;  %v3463_v5 = vmax.f32 %v3461_v22, %v3462_v28  ;;  %v3469_v15 = vrot.slane %v3468_v57, 4  ;;  %v3803_v6 = vunpack.c.l.b16 %v3652_v56  ;;  %4384 = vmatprep.subr.bf16.mxu1 %v4472_v58 }
 0x3a1   : > { %v3410_v25 = vrot.slane %v3409_v45, 1  ;;  %v3416_v24 = vmax.f32 %v3414_v14, %v3415_v42  ;;  %v3809_v41 = vunpack.c.l.b16 %v3658_v47  ;;  %v3810_v59 = vunpack.c.l.b16 %v3659_v23  ;;  %v8006_v14 = vpop.permute.xlu0 %2310  ;;  %4385 = vmatpush3.bf16.msra.mxu1 %v4472_v58 }
 0x3a2   : > { %v3660_v3 = vpack.c.bf16 %v3404_v12, %v3404_v12  ;;  %v3464_v29 = vrot.slane %v3463_v5, 2  ;;  %v3470_v1 = vmax.f32 %v3468_v57, %v3469_v15  ;;  %v3865_v27 = vsel %vm3844_vm1, %v9498_v4, %v9497_v11 }
 0x3a3   : > { %v3411_v31 = vmax.f32 %v3409_v45, %v3410_v25  ;;  %v3417_v7 = vrot.slane %v3416_v24, 1  ;;  %v3866_v33 = vsel %vm3846_vm2, %v7628_v51, %v3865_v27  ;;  %v3872_v46 = vsel %vm3844_vm1, %v9500_v8, %v9499_v49  ;;  %v4473_v51 = vld [vmem:[%s8482_s5 + $0x30] sm:$0xff]   ;;  %v9501_v27 = vld [vmem:[#allocation8_spill] sm:$0xff] }
 0x3a4   : > { %v7992_v0 = vpop.permute.xlu1 %2298  ;;  %v3811_v50 = vunpack.c.l.b16 %v3660_v3  ;;  %v3465_v48 = vmax.f32 %v3463_v5, %v3464_v29  ;;  %v3471_v56 = vrot.slane %v3470_v1, 2  ;;  %v3867_v47 = vsel %vm3848_vm3, %v7642_v52, %v3866_v33  ;;  %4386 = vmatprep.subr.bf16.mxu1 %v4473_v51 }
 0x3a5   : > { %v3873_v55 = vsel %vm3846_vm2, %v7574_v26, %v3872_v46  ;;  %v3418_v22 = vmax.f32 %v3416_v24, %v3417_v7  ;;  %v3661_v28 = vpack.c.bf16 %v3411_v31, %v3411_v31  ;;  %v3868_v12 = vsel %vm3850_vm4, %v7756_v39, %v3867_v47  ;;  %v8042_v11 = vpop.permute.xlu0 %2366  ;;  %4387 = vmatpush3.bf16.msra.mxu1 %v4473_v51 }
 0x3a6   : > { %v3874_v52 = vsel %vm3848_vm3, %v7584_v43, %v3873_v55  ;;  %v3466_v26 = vrot.slane %v3465_v48, 1  ;;  %v3472_v45 = vmax.f32 %v3470_v1, %v3471_v56  ;;  %v3869_v42 = vsel %vm3852_vm5, %v3801_v21, %v3868_v12  ;;  %v9504_v56 = vld [vmem:[#allocation86_spill] sm:$0xff] }
 0x3a7   : > { %v3875_v57 = vsel %vm3850_vm4, %v7711_v10, %v3874_v52  ;;  %v3662_v5 = vpack.c.bf16 %v3418_v22, %v3418_v22  ;;  %v8024_v15 = vmax.f32 %v7800_v30, %v2973_v17  ;;  %v3870_v3 = vsel %vm3854_vm6, %v3802_v9, %v3869_v42  ;;  %v4474_v10 = vld [vmem:[%s8482_s5 + $0x28] sm:$0xff]   ;;  %v9505_v55 = vld [vmem:[#allocation114_spill] sm:$0xff] }
 0x3a8   : > { %v8018_v23 = vpop.permute.xlu1 %2326  ;;  %v3876_v39 = vsel %vm3852_vm5, %v3809_v41, %v3875_v57  ;;  %v3467_v43 = vmax.f32 %v3465_v48, %v3466_v26  ;;  %v3473_v25 = vrot.slane %v3472_v45, 1  ;;  %v3871_v24 = vsel %vm3856_vm7, %v3803_v6, %v3870_v3  ;;  %4388 = vmatprep.subr.bf16.mxu1 %v4474_v10  ;;  %v4475_v48 = vld [vmem:[%s8482_s5 + $0x20] sm:$0xff]   ;;  %v9507_v57 = vld [vmem:[#allocation119_spill] sm:$0xff] }
 0x3a9   : > { %v3877_v29 = vsel %vm3854_vm6, %v3810_v59, %v3876_v39  ;;  %v8033_v21 = vunpack.c.l.b16 %v3661_v28  ;;  %v1822_v17 = vmul.f32 %v6150_v40, %v7872_v34  ;;  %v2589_v9 = vmul.f32 %v6783_v37, %v7895_v13  ;;  %v9506_v28 = vld [vmem:[#allocation85_spill] sm:$0xff]  ;;  %4389 = vmatpush3.bf16.msra.mxu1 %v4474_v10 }
 0x3aa   : > { %v3878_v30 = vsel %vm3856_vm7, %v3811_v50, %v3877_v29  ;;  %v3474_v41 = vmax.f32 %v3472_v45, %v3473_v25  ;;  %v3669_v1 = vpack.c.bf16 %v3467_v43, %v3467_v43  ;;  %v2567_v59 = vmul.f32 %v6783_v37, %v7875_v16  ;;  %v9502_v50 = vld [vmem:[#allocation132_spill] sm:$0xff]  ;;  %v9508_v43 = vld [vmem:[#allocation94_spill] sm:$0xff]  ;;  %v2411_v29 = vpop.permute.xlu0 %2410  ;;  %4390 = vmatprep.subr.bf16.mxu1 %v4475_v48 }
 0x3ab   : > { %v3908_v6 = vpack.c.b16 %v3878_v30, %v3871_v24  ;;  %v8047_v31 = vadd.f32 %v1822_v17, %v9501_v27  ;;  %v2717_v7 = vadd.f32 %v2589_v9, %v9502_v50  ;;  %v2536_v34 = vmul.f32 %v6783_v37, %v7926_v62  ;;  %v9503_v16 = vld [vmem:[#allocation116_spill] sm:$0xff] }
 0x3ac   : > { %v2575_v13 = vmul.f32 %v6783_v37, %v7880_v36  ;;  %v8054_v33 = vunpack.c.l.b16 %v3662_v5  ;;  %v3670_v49 = vpack.c.bf16 %v3474_v41, %v3474_v41  ;;  %v2695_v8 = vadd.f32 %v2567_v59, %v9503_v16  ;;  %v8065_v62 = vld [vmem:[%s8479_s2] ss:$0 sm:$0xff]  ;;  %v9510_v59 = vld [vmem:[#allocation121_spill] sm:$0xff] }
 0x3ad   : > { %v8044_v4 = vpop.permute.xlu1 %1686  ;;  %4377 = vmatmul.mubr.bf16.vlgmr.msra.gmra.mxu0 %v3908_v6  ;;  %v2544_v46 = vmul.f32 %v6783_v37, %v7972_v44  ;;  %v2852_v36 = vadd.f32 %v8065_v62, %v2717_v7  ;;  %v2664_v47 = vadd.f32 %v2536_v34, %v9504_v56  ;;  %v2579_v51 = vmul.f32 %v6783_v37, %v7902_v63  ;;  %v9509_v30 = vld [vmem:[#allocation156_spill] sm:$0xff] }
 0x3ae   : > { %v2703_v58 = vadd.f32 %v2575_v13, %v9505_v55  ;;  %v8072_v44 = vunpack.c.l.b16 %v3669_v1  ;;  %v2830_v22 = vadd.f32 %v8065_v62, %v2695_v8  ;;  %v2551_v52 = vmul.f32 %v6783_v37, %v7989_v20  ;;  %v4476_v20 = vld [vmem:[%s8482_s5 + $0x18] sm:$0xff]   ;;  %4391 = vmatpush3.bf16.msra.mxu1 %v4475_v48  ;;  %v9511_v55 = vld [vmem:[#allocation108_spill] sm:$0xff] }
 0x3af   : > { %v2672_v12 = vadd.f32 %v2544_v46, %v9506_v28  ;;  %v2980_v26 = vmax.f32 %v2852_v36, 0.0  ;;  %v2799_v45 = vadd.f32 %v8065_v62, %v2664_v47  ;;  %v2707_v5 = vadd.f32 %v2579_v51, %v9507_v57  ;;  %4392 = vmatprep.subr.bf16.mxu1 %v4476_v20 }
 0x3b0   : > { %v2838_v42 = vadd.f32 %v8065_v62, %v2703_v58  ;;  %v2958_v63 = vmax.f32 %v2830_v22, 0.0  ;;  %v2679_v25 = vadd.f32 %v2551_v52, %v9508_v43  ;;  %v2586_v24 = vmul.f32 %v6783_v37, %v7922_v2 }
 0x3b1   : > { %v2807_v39 = vadd.f32 %v8065_v62, %v2672_v12  ;;  %v3062_v17 = vmax.f32 %v9509_v30, %v2980_v26  ;;  %v2927_v9 = vmax.f32 %v2799_v45, 0.0  ;;  %v2842_v10 = vadd.f32 %v8065_v62, %v2707_v5  ;;  %v2439_v12 = vpop.permute.xlu0 %2438  ;;  %v9512_v26 = vld [vmem:[#allocation155_spill] sm:$0xff] }
 0x3b2   : > { %v8081_v3 = vpop.permute.xlu1 %2350  ;;  %v2966_v41 = vmax.f32 %v2838_v42, 0.0  ;;  %v2814_v6 = vadd.f32 %v8065_v62, %v2679_v25  ;;  %v2714_v27 = vadd.f32 %v2586_v24, %v9510_v59  ;;  %v2558_v2 = vmul.f32 %v6783_v37, %v8006_v14  ;;  %4393 = vmatpush3.bf16.msra.mxu1 %v4476_v20  ;;  %v9514_v24 = vld [vmem:[#allocation115_spill] sm:$0xff] }
 0x3b3   : > { %v2935_v1 = vmax.f32 %v2807_v39, 0.0  ;;  %v3140_v50 = vcombine.high %v3062_v17, %v3062_v17  ;;  %v3517_v7 = vsel %vm3180_vm0, %v3062_v17, -inf  ;;  %v2970_v13 = vmax.f32 %v2842_v10, 0.0  ;;  %v9515_v17 = vld [vmem:[#allocation91_spill] sm:$0xff] }
 0x3b4   : > { %v8097_v34 = vmax.f32 %v2958_v63, %v2966_v41  ;;  %v8101_v8 = vunpack.c.l.b16 %v3670_v49  ;;  %v3518_v46 = vrot.slane %v3517_v7, 4  ;;  %v2849_v56 = vadd.f32 %v8065_v62, %v2714_v27 }
 0x3b5   : > { %v8103_v36 = vmax.f32 %v2927_v9, %v2935_v1  ;;  %v3524_v47 = vsel %vm3180_vm0, %v3140_v50, -inf  ;;  %v2942_v14 = vmax.f32 %v2814_v6, 0.0  ;;  %v2686_v58 = vadd.f32 %v2558_v2, %v9511_v55 }
 0x3b6   : > { %v8099_v16 = vpop.permute.xlu1 %2382  ;;  %v2593_v51 = vmul.f32 %v6783_v37, %v7949_v19  ;;  %v3519_v22 = vmax.f32 %v3517_v7, %v3518_v46  ;;  %v3525_v28 = vrot.slane %v3524_v47, 4  ;;  %v8112_v49 = vmax.f32 %v2962_v32, %v2970_v13  ;;  %v2287_v46 = vpop.permute.xlu0 %2286 }
 0x3b7   : > { %v2977_v48 = vmax.f32 %v2849_v56, 0.0  ;;  %v2821_v52 = vadd.f32 %v8065_v62, %v2686_v58  ;;  %v2572_v42 = vmul.f32 %v6783_v37, %v8042_v11  ;;  %v2540_v57 = vmul.f32 %v6783_v37, %v7978_v60  ;;  %v9516_v60 = vld [vmem:[#allocation117_spill] sm:$0xff]  ;;  %v9517_v56 = vld [vmem:[#allocation158_spill] sm:$0xff] }
 0x3b8   : > { %v2721_v45 = vadd.f32 %v2593_v51, %v9512_v26  ;;  %v3520_v19 = vrot.slane %v3519_v22, 2  ;;  %v3526_v63 = vmax.f32 %v3524_v47, %v3525_v28  ;;  %v2583_v39 = vmul.f32 %v6783_v37, %v2411_v29 }
 0x3b9   : > { %v8123_v32 = vmax.f32 %v9513_v53, %v2977_v48  ;;  %v2949_v43 = vmax.f32 %v2821_v52, 0.0  ;;  %v2700_v30 = vadd.f32 %v2572_v42, %v9514_v24  ;;  %v2668_v11 = vadd.f32 %v2540_v57, %v9515_v17 }
 0x3ba   : > { %v8120_v5 = vpop.permute.xlu1 %2398  ;;  %v2856_v25 = vadd.f32 %v8065_v62, %v2721_v45  ;;  %v3521_v9 = vmax.f32 %v3519_v22, %v3520_v19  ;;  %v3527_v41 = vrot.slane %v3526_v63, 2  ;;  %v2711_v10 = vadd.f32 %v2583_v39, %v9516_v60 }
 0x3bb   : > { %v2548_v20 = vmul.f32 %v6783_v37, %v7987_v38  ;;  %v8133_v1 = vmax.f32 %v7936_v18, %v2942_v14  ;;  %v3041_v6 = vmax.f32 %v7939_v35, %v2949_v43  ;;  %v8137_v59 = vadd.f32 %v8065_v62, %v2700_v30  ;;  %v9518_v35 = vld [vmem:[#allocation89_spill] sm:$0xff] }
 0x3bc   : > { %v2984_v29 = vmax.f32 %v2856_v25, 0.0  ;;  %v3522_v2 = vrot.slane %v3521_v9, 1  ;;  %v3528_v50 = vmax.f32 %v3526_v63, %v3527_v41  ;;  %v8142_v7 = vadd.f32 %v8065_v62, %v2668_v11 }
 0x3bd   : > { %v2846_v13 = vadd.f32 %v8065_v62, %v2711_v10  ;;  %v3133_v38 = vcombine.high %v3041_v6, %v3041_v6  ;;  %v3419_v18 = vsel %vm3180_vm0, %v3041_v6, -inf  ;;  %v2676_v14 = vadd.f32 %v2548_v20, %v9518_v35  ;;  %v9520_v35 = vld [vmem:[#allocation104_spill] sm:$0xff] }
 0x3be   : > { %v8139_v27 = vpop.permute.xlu1 %2426  ;;  %v3074_v47 = vmax.f32 %v9517_v56, %v2984_v29  ;;  %v3523_v55 = vmax.f32 %v3521_v9, %v3522_v2  ;;  %v3529_v58 = vrot.slane %v3528_v50, 1  ;;  %v3420_v51 = vrot.slane %v3419_v18, 4  ;;  %v2315_v9 = vpop.permute.xlu0 %2314 }
 0x3bf   : > { %v2963_v22 = vmax.f32 %v8137_v59, 0.0  ;;  %v3426_v28 = vsel %vm3180_vm0, %v3133_v38, -inf  ;;  %v2974_v26 = vmax.f32 %v2846_v13, 0.0  ;;  %v2931_v43 = vmax.f32 %v8142_v7, 0.0 }
 0x3c0   : > { %v3144_v48 = vcombine.high %v3074_v47, %v3074_v47  ;;  %v3573_v52 = vsel %vm3180_vm0, %v3074_v47, -inf  ;;  %v3530_v45 = vmax.f32 %v3528_v50, %v3529_v58  ;;  %v3677_v42 = vpack.c.bf16 %v3523_v55, %v3523_v55 }
 0x3c1   : > { %v3421_v57 = vmax.f32 %v3419_v18, %v3420_v51  ;;  %v3427_v19 = vrot.slane %v3426_v28, 4  ;;  %v3574_v53 = vrot.slane %v3573_v52, 4  ;;  %v2811_v25 = vadd.f32 %v8065_v62, %v2676_v14  ;;  %v9519_v18 = vld [vmem:[#allocation126_spill] sm:$0xff] }
 0x3c2   : > { %v8151_v63 = vpop.permute.xlu1 %2454  ;;  %v3580_v39 = vsel %vm3180_vm0, %v3144_v48, -inf  ;;  %v3678_v24 = vpack.c.bf16 %v3530_v45, %v3530_v45  ;;  %v8157_v11 = vmax.f32 %v8097_v34, %v2974_v26  ;;  %v8159_v41 = vunpack.c.l.b16 %v3677_v42  ;;  %v9521_v45 = vld [vmem:[#allocation100_spill] sm:$0xff] }
 0x3c3   : > { %v3422_v30 = vrot.slane %v3421_v57, 2  ;;  %v3428_v17 = vmax.f32 %v3426_v28, %v3427_v19  ;;  %v3575_v60 = vmax.f32 %v3573_v52, %v3574_v53  ;;  %v3581_v10 = vrot.slane %v3580_v39, 4 }
 0x3c4   : > { %v2590_v20 = vmul.f32 %v6783_v37, %v2439_v12  ;;  %v2939_v2 = vmax.f32 %v2811_v25, 0.0  ;;  %v2555_v50 = vmul.f32 %v6783_v37, %v7992_v0  ;;  %v8164_v7 = vunpack.c.l.b16 %v3678_v24 }
 0x3c5   : > { %v3423_v6 = vmax.f32 %v3421_v57, %v3422_v30  ;;  %v3429_v29 = vrot.slane %v3428_v17, 2  ;;  %v3576_v13 = vrot.slane %v3575_v60, 2  ;;  %v3582_v38 = vmax.f32 %v3580_v39, %v3581_v10  ;;  %v2431_v57 = vpop.permute.xlu0 %2430 }
 0x3c6   : > { %v2718_v34 = vadd.f32 %v2590_v20, %v9519_v18  ;;  %v2683_v14 = vadd.f32 %v2555_v50, %v9520_v35  ;;  %v2552_v55 = vmul.f32 %v6783_v37, %v2287_v46  ;;  %v8169_v58 = vpop.permute.xlu1 %2302  ;;  %v2562_v0 = vmul.f32 %v6783_v37, %v8018_v23  ;;  %v9522_v46 = vld [vmem:[#allocation107_spill] sm:$0xff] }
 0x3c7   : > { %v3424_v56 = vrot.slane %v3423_v6, 1  ;;  %v3430_v47 = vmax.f32 %v3428_v17, %v3429_v29  ;;  %v3577_v12 = vmax.f32 %v3575_v60, %v3576_v13  ;;  %v3583_v51 = vrot.slane %v3582_v38, 2 }
 0x3c8   : > { %v2853_v28 = vadd.f32 %v8065_v62, %v2718_v34  ;;  %v2818_v26 = vadd.f32 %v8065_v62, %v2683_v14  ;;  %v2680_v42 = vadd.f32 %v2552_v55, %v9521_v45  ;;  %v2690_v25 = vadd.f32 %v2562_v0, %v9522_v46 }
 0x3c9   : > { %v3425_v48 = vmax.f32 %v3423_v6, %v3424_v56  ;;  %v3431_v52 = vrot.slane %v3430_v47, 1  ;;  %v3578_v19 = vrot.slane %v3577_v12, 1  ;;  %v3584_v53 = vmax.f32 %v3582_v38, %v3583_v51  ;;  %v2319_v51 = vpop.permute.xlu0 %2318 }
 0x3ca   : > { %v2981_v39 = vmax.f32 %v2853_v28, 0.0  ;;  %v2946_v17 = vmax.f32 %v2818_v26, 0.0  ;;  %v2815_v60 = vadd.f32 %v8065_v62, %v2680_v42  ;;  %v2825_v6 = vadd.f32 %v8065_v62, %v2690_v25  ;;  %v8184_v18 = vpop.permute.xlu1 %2330 }
 0x3cb   : > { %v3432_v24 = vmax.f32 %v3430_v47, %v3431_v52  ;;  %v3663_v30 = vpack.c.bf16 %v3425_v48, %v3425_v48  ;;  %v3579_v10 = vmax.f32 %v3577_v12, %v3578_v19  ;;  %v3585_v20 = vrot.slane %v3584_v53, 1  ;;  %v9523_v19 = vld [vmem:[#allocation98_spill] sm:$0xff] }
 0x3cc   : > { %v3065_v23 = vmax.f32 %v8024_v15, %v2981_v39  ;;  %v8182_v13 = vmax.f32 %v2931_v43, %v2939_v2  ;;  %v2943_v38 = vmax.f32 %v2815_v60, 0.0  ;;  %v8190_v15 = vmax.f32 %v7942_v61, %v2946_v17  ;;  %v9524_v17 = vld [vmem:[#allocation127_spill] sm:$0xff] }
 0x3cd   : > { %v3664_v29 = vpack.c.bf16 %v3432_v24, %v3432_v24  ;;  %v8180_v50 = vunpack.c.l.b16 %v3663_v30  ;;  %v3586_v34 = vmax.f32 %v3584_v53, %v3585_v20  ;;  %v3685_v56 = vpack.c.bf16 %v3579_v10, %v3579_v10 }
 0x3ce   : > { %v3141_v47 = vcombine.high %v3065_v23, %v3065_v23  ;;  %v3531_v35 = vsel %vm3180_vm0, %v3065_v23, -inf  ;;  %v2953_v12 = vmax.f32 %v2825_v6, 0.0  ;;  %v3046_v2 = vmax.f32 %v8103_v36, %v2943_v38  ;;  %v9525_v23 = vld [vmem:[#allocation97_spill] sm:$0xff] }
 0x3cf   : > { %v8187_v14 = vunpack.c.l.b16 %v3664_v29  ;;  %v3532_v55 = vrot.slane %v3531_v35, 4  ;;  %v3686_v28 = vpack.c.bf16 %v3586_v34, %v3586_v34  ;;  %v2559_v0 = vmul.f32 %v6783_v37, %v2315_v9  ;;  %v8204_v24 = vpop.permute.xlu1 %1690 }
 0x3d0   : > { %v3538_v43 = vsel %vm3180_vm0, %v3141_v47, -inf  ;;  %v3053_v26 = vmax.f32 %v7970_v54, %v2953_v12  ;;  %v2588_v45 = vmul.f32 %v6783_v37, %v2431_v57  ;;  %v8197_v42 = vunpack.c.l.b16 %v3685_v56  ;;  %v9526_v56 = vld [vmem:[#allocation9_spill] sm:$0xff] }
 0x3d1   : > { %v3533_v48 = vmax.f32 %v3531_v35, %v3532_v55  ;;  %v3539_v52 = vrot.slane %v3538_v43, 4  ;;  %v2687_v61 = vadd.f32 %v2559_v0, %v9523_v19  ;;  %v1823_v53 = vmul.f32 %v6150_v40, %v8044_v4  ;;  %v9527_v19 = vld [vmem:[#allocation106_spill] sm:$0xff] }
 0x3d2   : > { %v2560_v39 = vmul.f32 %v6783_v37, %v2319_v51  ;;  %v3137_v36 = vcombine.high %v3053_v26, %v3053_v26  ;;  %v3475_v9 = vsel %vm3180_vm0, %v3053_v26, -inf  ;;  %v8206_v30 = vunpack.c.l.b16 %v3686_v28 }
 0x3d3   : > { %v3534_v46 = vrot.slane %v3533_v48, 2  ;;  %v3540_v25 = vmax.f32 %v3538_v43, %v3539_v52  ;;  %v3476_v54 = vrot.slane %v3475_v9, 4  ;;  %v2822_v57 = vadd.f32 %v8065_v62, %v2687_v61 }
 0x3d4   : > { %v2716_v60 = vadd.f32 %v2588_v45, %v9524_v17  ;;  %v3482_v4 = vsel %vm3180_vm0, %v3137_v36, -inf  ;;  %v2688_v6 = vadd.f32 %v2560_v39, %v9525_v23  ;;  %v8213_v47 = vadd.f32 %v1823_v53, %v9526_v56  ;;  %v8223_v53 = vpop.permute.xlu1 %2414 }
 0x3d5   : > { %v3535_v10 = vmax.f32 %v3533_v48, %v3534_v46  ;;  %v3541_v20 = vrot.slane %v3540_v25, 2  ;;  %v3477_v29 = vmax.f32 %v3475_v9, %v3476_v54  ;;  %v3483_v38 = vrot.slane %v3482_v4, 4 }
 0x3d6   : > { %v2950_v34 = vmax.f32 %v2822_v57, 0.0  ;;  %v2823_v12 = vadd.f32 %v8065_v62, %v2688_v6  ;;  %v2568_v51 = vmul.f32 %v6783_v37, %v8081_v3  ;;  %v8220_v48 = vadd.f32 %v8065_v62, %v2716_v60 }
 0x3d7   : > { %v3536_v35 = vrot.slane %v3535_v10, 1  ;;  %v3542_v55 = vmax.f32 %v3540_v25, %v3541_v20  ;;  %v3478_v28 = vrot.slane %v3477_v29, 2  ;;  %v3484_v43 = vmax.f32 %v3482_v4, %v3483_v38 }
 0x3d8   : > { %v3044_v0 = vmax.f32 %v8133_v1, %v2950_v34  ;;  %v2951_v45 = vmax.f32 %v2823_v12, 0.0  ;;  %v2696_v61 = vadd.f32 %v2568_v51, %v9527_v19  ;;  %v2447_v51 = vpop.permute.xlu0 %2446 }
 0x3d9   : > { %v3537_v52 = vmax.f32 %v3535_v10, %v3536_v35  ;;  %v3543_v26 = vrot.slane %v3542_v55, 1  ;;  %v3479_v39 = vmax.f32 %v3477_v29, %v3478_v28  ;;  %v3485_v46 = vrot.slane %v3484_v43, 2  ;;  %v2443_v28 = vpop.permute.xlu1 %2442 }
 0x3da   : > { %v3134_v25 = vcombine.high %v3044_v0, %v3044_v0  ;;  %v3433_v36 = vsel %vm3180_vm0, %v3044_v0, -inf  ;;  %v3047_v57 = vmax.f32 %v3046_v2, %v2951_v45  ;;  %v2979_v10 = vmax.f32 %v8220_v48, 0.0 }
 0x3db   : > { %v3544_v3 = vmax.f32 %v3542_v55, %v3543_v26  ;;  %v3679_v9 = vpack.c.bf16 %v3537_v52, %v3537_v52  ;;  %v3434_v54 = vrot.slane %v3433_v36, 4  ;;  %v3480_v1 = vrot.slane %v3479_v39, 1 }
 0x3dc   : > { %v3486_v17 = vmax.f32 %v3484_v43, %v3485_v46  ;;  %v3440_v60 = vsel %vm3180_vm0, %v3134_v25, -inf  ;;  %v2831_v6 = vadd.f32 %v8065_v62, %v2696_v61  ;;  %v3135_v34 = vcombine.high %v3047_v57, %v3047_v57 }
 0x3dd   : > { %v3680_v20 = vpack.c.bf16 %v3544_v3, %v3544_v3  ;;  %v3435_v4 = vmax.f32 %v3433_v36, %v3434_v54  ;;  %v3441_v23 = vrot.slane %v3440_v60, 4  ;;  %v3481_v29 = vmax.f32 %v3479_v39, %v3480_v1 }
 0x3de   : > { %v3487_v38 = vrot.slane %v3486_v17, 1  ;;  %v3447_v56 = vsel %vm3180_vm0, %v3047_v57, -inf  ;;  %v8230_v35 = vunpack.c.l.b16 %v3679_v9  ;;  %v3454_v26 = vsel %vm3180_vm0, %v3135_v34, -inf }
 0x3df   : > { %v3436_v55 = vrot.slane %v3435_v4, 2  ;;  %v3442_v2 = vmax.f32 %v3440_v60, %v3441_v23  ;;  %v3448_v12 = vrot.slane %v3447_v56, 4  ;;  %v8232_v43 = vunpack.c.l.b16 %v3680_v20  ;;  %v9528_v60 = vld [vmem:[#allocation131_spill] sm:$0xff] }
 0x3e0   : > { %v3488_v0 = vmax.f32 %v3486_v17, %v3487_v38  ;;  %v3671_v52 = vpack.c.bf16 %v3481_v29, %v3481_v29  ;;  %v3455_v39 = vrot.slane %v3454_v26, 4  ;;  %v2959_v25 = vmax.f32 %v2831_v6, 0.0 }
 0x3e1   : > { %v3437_v45 = vmax.f32 %v3435_v4, %v3436_v55  ;;  %v3443_v19 = vrot.slane %v3442_v2, 2  ;;  %v3449_v61 = vmax.f32 %v3447_v56, %v3448_v12  ;;  %v2592_v36 = vmul.f32 %v6783_v37, %v2447_v51  ;;  %v9529_v4 = vld [vmem:[#allocation120_spill] sm:$0xff]  ;;  %v2459_v56 = vpop.permute.xlu1 %2458 }
 0x3e2   : > { %v3672_v46 = vpack.c.bf16 %v3488_v0, %v3488_v0  ;;  %v2576_v3 = vmul.f32 %v6783_v37, %v8099_v16  ;;  %v8240_v1 = vmax.f32 %v3454_v26, %v3455_v39  ;;  %v8242_v17 = vunpack.c.l.b16 %v3671_v52  ;;  %v9530_v12 = vld [vmem:[#allocation124_spill] sm:$0xff] }
 0x3e3   : > { %v3438_v9 = vrot.slane %v3437_v45, 1  ;;  %v8238_v54 = vmax.f32 %v3442_v2, %v3443_v19  ;;  %v3450_v57 = vrot.slane %v3449_v61, 2  ;;  %v2720_v20 = vadd.f32 %v2592_v36, %v9528_v60 }
 0x3e4   : > { %v2704_v23 = vadd.f32 %v2576_v3, %v9529_v4  ;;  %v2580_v6 = vmul.f32 %v6783_v37, %v8120_v5  ;;  %v8248_v29 = vunpack.c.l.b16 %v3672_v46  ;;  %v2587_v0 = vmul.f32 %v6783_v37, %v8139_v27  ;;  %v9531_v46 = vld [vmem:[#allocation128_spill] sm:$0xff] }
 0x3e5   : > { %v3439_v38 = vmax.f32 %v3437_v45, %v3438_v9  ;;  %v3445_v16 = vrot.slane %v8238_v54, 1  ;;  %v8251_v34 = vmax.f32 %v3449_v61, %v3450_v57  ;;  %v8254_v55 = vadd.f32 %v8065_v62, %v2720_v20  ;;  %v9532_v9 = vld [vmem:[#allocation93_spill] sm:$0xff] }
 0x3e6   : > { %v2839_v2 = vadd.f32 %v8065_v62, %v2704_v23  ;;  %v2708_v51 = vadd.f32 %v2580_v6, %v9530_v12  ;;  %v3457_v5 = vrot.slane %v8240_v1, 2  ;;  %v2594_v26 = vmul.f32 %v6783_v37, %v8151_v63 }
 0x3e7   : > { %v3665_v52 = vpack.c.bf16 %v3439_v38, %v3439_v38  ;;  %v2556_v45 = vmul.f32 %v6783_v37, %v8169_v58  ;;  %v3452_v19 = vrot.slane %v8251_v34, 1  ;;  %v2715_v36 = vadd.f32 %v2587_v0, %v9531_v46  ;;  %v9533_v38 = vld [vmem:[#allocation101_spill] sm:$0xff] }
 0x3e8   : > { %v2967_v61 = vmax.f32 %v2839_v2, 0.0  ;;  %v2843_v39 = vadd.f32 %v8065_v62, %v2708_v51  ;;  %v2983_v3 = vmax.f32 %v8254_v55, 0.0  ;;  %v2722_v27 = vadd.f32 %v2594_v26, %v8047_v31  ;;  %v2335_v2 = vpop.permute.xlu1 %2334  ;;  %v9534_v26 = vld [vmem:[#allocation122_spill] sm:$0xff] }
 0x3e9   : > { %v2684_v57 = vadd.f32 %v2556_v45, %v9532_v9  ;;  %v2563_v60 = vmul.f32 %v6783_v37, %v8184_v18  ;;  %v8273_v63 = vunpack.c.l.b16 %v3665_v52  ;;  %v2850_v58 = vadd.f32 %v8065_v62, %v2715_v36  ;;  %v9536_v36 = vld [vmem:[#allocation147_spill] sm:$0xff] }
 0x3ea   : > { %v2971_v20 = vmax.f32 %v2843_v39, 0.0  ;;  %v1824_v4 = vmul.f32 %v6150_v40, %v8204_v24  ;;  %v2857_v23 = vadd.f32 %v8065_v62, %v2722_v27  ;;  %v2584_v31 = vmul.f32 %v6783_v37, %v8223_v53  ;;  %v9535_v39 = vld [vmem:[#allocation15_spill] sm:$0xff] }
 0x3eb   : > { %v2819_v6 = vadd.f32 %v8065_v62, %v2684_v57  ;;  %v2691_v55 = vadd.f32 %v2563_v60, %v9533_v38  ;;  %v3069_v12 = vmax.f32 %v2959_v25, %v2967_v61  ;;  %v2978_v51 = vmax.f32 %v2850_v58, 0.0 }
 0x3ec   : > { %v8285_v18 = vmax.f32 %v2963_v22, %v2971_v20  ;;  %v2591_v0 = vmul.f32 %v6783_v37, %v2443_v28  ;;  %v2985_v52 = vmax.f32 %v2857_v23, 0.0  ;;  %v2712_v45 = vadd.f32 %v2584_v31, %v9534_v26  ;;  %v9537_v20 = vld [vmem:[#allocation112_spill] sm:$0xff] }
 0x3ed   : > { %v2947_v40 = vmax.f32 %v2819_v6, 0.0  ;;  %v2826_v24 = vadd.f32 %v8065_v62, %v2691_v55  ;;  %v8291_v46 = vadd.f32 %v1824_v4, %v9535_v39  ;;  %v2595_v25 = vmul.f32 %v6783_v37, %v2459_v56 }
 0x3ee   : > { %v2719_v53 = vadd.f32 %v2591_v0, %v9536_v36  ;;  %v2564_v59 = vmul.f32 %v6783_v37, %v2335_v2  ;;  %v8297_v22 = vmax.f32 %v8112_v49, %v2978_v51  ;;  %v3077_v28 = vmax.f32 %v8123_v32, %v2985_v52 }
 0x3ef   : > { %v2954_v61 = vmax.f32 %v2826_v24, 0.0  ;;  %v2847_v27 = vadd.f32 %v8065_v62, %v2712_v45  ;;  %v8302_v9 = vmax.f32 %v8182_v13, %v2947_v40  ;;  %v2723_v60 = vadd.f32 %v2595_v25, %v8213_v47  ;;  %v4477_v47 = vld [vmem:[%s8482_s5 + $0x10] sm:$0xff]  }
 0x3f0   : > { %v2854_v57 = vadd.f32 %v8065_v62, %v2719_v53  ;;  %v2692_v58 = vadd.f32 %v2564_v59, %v9537_v20  ;;  %v3145_v56 = vcombine.high %v3077_v28, %v3077_v28  ;;  %v3587_v4 = vsel %vm3180_vm0, %v3077_v28, -inf  ;;  %4394 = vmatprep.subr.bf16.mxu1 %v4477_v47 }
 0x3f1   : > { %v3056_v49 = vmax.f32 %v8190_v15, %v2954_v61  ;;  %v2975_v23 = vmax.f32 %v2847_v27, 0.0  ;;  %v3588_v6 = vrot.slane %v3587_v4, 4  ;;  %v8310_v38 = vadd.f32 %v8065_v62, %v2723_v60  ;;  %4395 = vmatpush3.bf16.msra.mxu1 %v4477_v47  ;;  %v2463_v47 = vpop.permute.xlu1 %2462 }
 0x3f2   : > { %v2982_v32 = vmax.f32 %v2854_v57, 0.0  ;;  %v8313_v13 = vadd.f32 %v8065_v62, %v2692_v58  ;;  %v3594_v55 = vsel %vm3180_vm0, %v3145_v56, -inf }
 0x3f3   : > { %v3138_v31 = vcombine.high %v3056_v49, %v3056_v49  ;;  %v3489_v2 = vsel %vm3180_vm0, %v3056_v49, -inf  ;;  %v3070_v51 = vmax.f32 %v3069_v12, %v2975_v23  ;;  %v3589_v15 = vmax.f32 %v3587_v4, %v3588_v6  ;;  %v4478_v12 = vld [vmem:[%s8482_s5 + $0x8] sm:$0xff]  }
 0x3f4   : > { %v3595_v0 = vrot.slane %v3594_v55, 4  ;;  %v3490_v52 = vrot.slane %v3489_v2, 4  ;;  %v3068_v40 = vmax.f32 %v8157_v11, %v2982_v32  ;;  %v2986_v45 = vmax.f32 %v8310_v38, 0.0  ;;  %v4479_v11 = vld [vmem:[%s8482_s5] sm:$0xff]   ;;  %4396 = vmatprep.subr.bf16.mxu1 %v4478_v12 }
 0x3f5   : > { %v3496_v24 = vsel %vm3180_vm0, %v3138_v31, -inf  ;;  %v3071_v26 = vmax.f32 %v3070_v51, %v2983_v3  ;;  %v2955_v39 = vmax.f32 %v8313_v13, 0.0  ;;  %v3590_v36 = vrot.slane %v3589_v15, 2  ;;  %4397 = vmatpush3.bf16.msra.mxu1 %v4478_v12 }
 0x3f6   : > { %v3596_v53 = vmax.f32 %v3594_v55, %v3595_v0  ;;  %v3491_v25 = vmax.f32 %v3489_v2, %v3490_v52  ;;  %v3497_v59 = vrot.slane %v3496_v24, 4  ;;  %v3142_v61 = vcombine.high %v3068_v40, %v3068_v40  ;;  %4398 = vmatprep.subr.bf16.mxu1 %v4479_v11 }
 0x3f7   : > { %v3143_v28 = vcombine.high %v3071_v26, %v3071_v26  ;;  %v3559_v3 = vsel %vm3180_vm0, %v3071_v26, -inf  ;;  %v3545_v27 = vsel %vm3180_vm0, %v3068_v40, -inf  ;;  %v3591_v57 = vmax.f32 %v3589_v15, %v3590_v36 }
 0x3f8   : > { %v3597_v60 = vrot.slane %v3596_v53, 2  ;;  %v3492_v20 = vrot.slane %v3491_v25, 2  ;;  %v3498_v58 = vmax.f32 %v3496_v24, %v3497_v59  ;;  %v3560_v56 = vrot.slane %v3559_v3, 4 }
 0x3f9   : > { %v3566_v4 = vsel %vm3180_vm0, %v3143_v28, -inf  ;;  %v3546_v49 = vrot.slane %v3545_v27, 4  ;;  %v3552_v23 = vsel %vm3180_vm0, %v3142_v61, -inf  ;;  %v3592_v6 = vrot.slane %v3591_v57, 1  ;;  %4399 = vmatpush3.bf16.msra.mxu1 %v4479_v11 }
 0x3fa   : > { %v3598_v32 = vmax.f32 %v3596_v53, %v3597_v60  ;;  %v3493_v38 = vmax.f32 %v3491_v25, %v3492_v20  ;;  %v3499_v13 = vrot.slane %v3498_v58, 2  ;;  %v3561_v55 = vmax.f32 %v3559_v3, %v3560_v56 }
 0x3fb   : > { %v3567_v31 = vrot.slane %v3566_v4, 4  ;;  %v3547_v2 = vmax.f32 %v3545_v27, %v3546_v49  ;;  %v3553_v51 = vrot.slane %v3552_v23, 4  ;;  %v3593_v15 = vmax.f32 %v3591_v57, %v3592_v6 }
 0x3fc   : > { %v3599_v0 = vrot.slane %v3598_v32, 1  ;;  %v3494_v52 = vrot.slane %v3493_v38, 1  ;;  %v3500_v40 = vmax.f32 %v3498_v58, %v3499_v13  ;;  %v3562_v24 = vrot.slane %v3561_v55, 2 }
 0x3fd   : > { %v3548_v26 = vrot.slane %v3547_v2, 2  ;;  %v3554_v36 = vmax.f32 %v3552_v23, %v3553_v51  ;;  %v2596_v59 = vmul.f32 %v6783_v37, %v2463_v47  ;;  %v3687_v53 = vpack.c.bf16 %v3593_v15, %v3593_v15 }
 0x3fe   : > { %v3600_v12 = vmax.f32 %v3598_v32, %v3599_v0  ;;  %v3495_v25 = vmax.f32 %v3493_v38, %v3494_v52  ;;  %v8335_v28 = vmax.f32 %v3566_v4, %v3567_v31  ;;  %v3501_v61 = vrot.slane %v3500_v40, 1 }
 0x3ff   : > { %v3549_v3 = vmax.f32 %v3547_v2, %v3548_v26  ;;  %v3555_v60 = vrot.slane %v3554_v36, 2  ;;  %v3080_v27 = vmax.f32 %v8297_v22, %v2986_v45  ;;  %v8338_v56 = vmax.f32 %v3561_v55, %v3562_v24 }
 0x400   : > { %v3688_v57 = vpack.c.bf16 %v3600_v12, %v3600_v12  ;;  %v3673_v20 = vpack.c.bf16 %v3495_v25, %v3495_v25  ;;  %v3059_v58 = vmax.f32 %v8302_v9, %v2955_v39  ;;  %v8344_v6 = vunpack.c.l.b16 %v3687_v53 }
 0x401   : > { %v3550_v49 = vrot.slane %v3549_v3, 1  ;;  %v8341_v23 = vmax.f32 %v3554_v36, %v3555_v60  ;;  %v3146_v37 = vcombine.high %v3080_v27, %v3080_v27  ;;  %v3601_v11 = vsel %vm3180_vm0, %v3080_v27, -inf }
 0x402   : > { %v8346_v4 = vunpack.c.l.b16 %v3688_v57  ;;  %v3602_v32 = vrot.slane %v3601_v11, 4  ;;  %v3139_v38 = vcombine.high %v3059_v58, %v3059_v58  ;;  %v8348_v13 = vunpack.c.l.b16 %v3673_v20 }
 0x403   : > { %v3551_v22 = vmax.f32 %v3549_v3, %v3550_v49  ;;  %v3608_v45 = vsel %vm3180_vm0, %v3146_v37, -inf  ;;  %v3503_v47 = vsel %vm3180_vm0, %v3059_v58, -inf  ;;  %v3557_v2 = vrot.slane %v8341_v23, 1 }
 0x404   : > { %v3603_v9 = vmax.f32 %v3601_v11, %v3602_v32  ;;  %v3609_v39 = vrot.slane %v3608_v45, 4  ;;  %v3504_v55 = vrot.slane %v3503_v47, 4  ;;  %v3510_v31 = vsel %vm3180_vm0, %v3139_v38, -inf }
 0x405   : > { %v3681_v51 = vpack.c.bf16 %v3551_v22, %v3551_v22  ;;  %v3511_v15 = vrot.slane %v3510_v31, 4  ;;  %v2724_v0 = vadd.f32 %v2596_v59, %v8291_v46  ;;  %v3446_v36 = vmax.f32 %v8238_v54, %v3445_v16 }
 0x406   : > { %v3604_v52 = vrot.slane %v3603_v9, 2  ;;  %v3610_v24 = vmax.f32 %v3608_v45, %v3609_v39  ;;  %v3505_v26 = vmax.f32 %v3503_v47, %v3504_v55  ;;  %v3082_v25 = vmax.f32 %v8285_v18, %v2979_v10 }
 0x407   : > { %v3512_v12 = vmax.f32 %v3510_v31, %v3511_v15  ;;  %v2859_v53 = vadd.f32 %v8065_v62, %v2724_v0  ;;  %v3453_v3 = vmax.f32 %v8251_v34, %v3452_v19  ;;  %v3458_v27 = vmax.f32 %v8240_v1, %v3457_v5 }
 0x408   : > { %v3605_v60 = vmax.f32 %v3603_v9, %v3604_v52  ;;  %v3611_v46 = vrot.slane %v3610_v24, 2  ;;  %v3506_v59 = vrot.slane %v3505_v26, 2  ;;  %v3502_v16 = vmax.f32 %v3500_v40, %v3501_v61 }
 0x409   : > { %v3513_v57 = vrot.slane %v3512_v12, 2  ;;  %v2987_v54 = vmax.f32 %v2859_v53, 0.0  ;;  %v3666_v20 = vpack.c.bf16 %v3446_v36, %v3446_v36  ;;  %v3459_v49 = vrot.slane %v3458_v27, 1 }
 0x40a   : > { %v3606_v62 = vrot.slane %v3605_v60, 1  ;;  %v3612_v58 = vmax.f32 %v3610_v24, %v3611_v46  ;;  %v3507_v48 = vmax.f32 %v3505_v26, %v3506_v59  ;;  %v8368_v10 = vunpack.c.l.b16 %v3681_v51 }
 0x40b   : > { %v3083_v18 = vmax.f32 %v3082_v25, %v2987_v54  ;;  %v3514_v37 = vmax.f32 %v3512_v12, %v3513_v57  ;;  %v3667_v34 = vpack.c.bf16 %v3453_v3, %v3453_v3  ;;  %v3460_v32 = vmax.f32 %v3458_v27, %v3459_v49 }
 0x40c   : > { %v3607_v19 = vmax.f32 %v3605_v60, %v3606_v62  ;;  %v3508_v11 = vrot.slane %v3507_v48, 1  ;;  %v3674_v38 = vpack.c.bf16 %v3502_v16, %v3502_v16  ;;  %v3613_v22 = vrot.slane %v3612_v58, 1 }
 0x40d   : > { %v3147_v45 = vcombine.high %v3083_v18, %v3083_v18  ;;  %v3615_v1 = vsel %vm3180_vm0, %v3083_v18, -inf  ;;  %v3515_v5 = vrot.slane %v3514_v37, 1  ;;  %v3668_v47 = vpack.c.bf16 %v3460_v32, %v3460_v32 }
 0x40e   : > { %v3616_v40 = vrot.slane %v3615_v1, 4  ;;  %v3509_v61 = vmax.f32 %v3507_v48, %v3508_v11  ;;  %v3817_v9 = vunpack.c.l.b16 %v3666_v20  ;;  %v3689_v39 = vpack.c.bf16 %v3607_v19, %v3607_v19 }
 0x40f   : > { %v3622_v55 = vsel %vm3180_vm0, %v3147_v45, -inf  ;;  %v3516_v31 = vmax.f32 %v3514_v37, %v3515_v5  ;;  %v3818_v51 = vunpack.c.l.b16 %v3667_v34  ;;  %v3825_v24 = vunpack.c.l.b16 %v3674_v38 }
 0x410   : > { %v3617_v15 = vmax.f32 %v3615_v1, %v3616_v40  ;;  %v3623_v0 = vrot.slane %v3622_v55, 4  ;;  %v3675_v52 = vpack.c.bf16 %v3509_v61, %v3509_v61  ;;  %v3819_v36 = vunpack.c.l.b16 %v3668_v47 }
 0x411   : > { %v3676_v26 = vpack.c.bf16 %v3516_v31, %v3516_v31  ;;  %v3879_v12 = vsel %vm3844_vm1, %v8054_v33, %v8033_v21  ;;  %v3886_v53 = vsel %vm3844_vm1, %v8101_v8, %v8072_v44  ;;  %v3558_v54 = vmax.f32 %v8341_v23, %v3557_v2 }
 0x412   : > { %v3618_v25 = vrot.slane %v3617_v15, 2  ;;  %v3624_v3 = vmax.f32 %v3622_v55, %v3623_v0  ;;  %v3826_v60 = vunpack.c.l.b16 %v3675_v52  ;;  %v3880_v46 = vsel %vm3846_vm2, %v8180_v50, %v3879_v12 }
 0x413   : > { %v3827_v59 = vunpack.c.l.b16 %v3676_v26  ;;  %v3881_v27 = vsel %vm3848_vm3, %v8187_v14, %v3880_v46  ;;  %v3887_v57 = vsel %vm3846_vm2, %v8242_v17, %v3886_v53  ;;  %v3564_v14 = vrot.slane %v8338_v56, 1 }
 0x414   : > { %v3619_v21 = vmax.f32 %v3617_v15, %v3618_v25  ;;  %v3625_v33 = vrot.slane %v3624_v3, 2  ;;  %v3882_v44 = vsel %vm3850_vm4, %v8273_v63, %v3881_v27  ;;  %v3888_v8 = vsel %vm3848_vm3, %v8248_v29, %v3887_v57 }
 0x415   : > { %v3883_v16 = vsel %vm3852_vm5, %v3817_v9, %v3882_v44  ;;  %v3889_v50 = vsel %vm3850_vm4, %v8348_v13, %v3888_v8  ;;  %v3569_v20 = vrot.slane %v8335_v28, 2  ;;  %v3614_v62 = vmax.f32 %v3612_v58, %v3613_v22 }
 0x416   : > { %v3620_v17 = vrot.slane %v3619_v21, 1  ;;  %v3884_v23 = vsel %vm3854_vm6, %v3818_v51, %v3883_v16  ;;  %v3890_v2 = vsel %vm3852_vm5, %v3825_v24, %v3889_v50  ;;  %v3565_v29 = vmax.f32 %v8338_v56, %v3564_v14 }
 0x417   : > { %v3885_v63 = vsel %vm3856_vm7, %v3819_v36, %v3884_v23  ;;  %v3891_v48 = vsel %vm3854_vm6, %v3826_v60, %v3890_v2  ;;  %v3570_v49 = vmax.f32 %v8335_v28, %v3569_v20  ;;  %v3626_v37 = vmax.f32 %v3624_v3, %v3625_v33 }
 0x418   : > { %v3892_v13 = vsel %vm3856_vm7, %v3827_v59, %v3891_v48  ;;  %v3621_v18 = vmax.f32 %v3619_v21, %v3620_v17  ;;  %v3682_v34 = vpack.c.bf16 %v3558_v54, %v3558_v54  ;;  %v3683_v32 = vpack.c.bf16 %v3565_v29, %v3565_v29 }
 0x419   : > { %v3909_v19 = vpack.c.b16 %v3892_v13, %v3885_v63  ;;  %v3571_v11 = vrot.slane %v3570_v49, 1  ;;  %v3690_v38 = vpack.c.bf16 %v3614_v62, %v3614_v62  ;;  %v3627_v45 = vrot.slane %v3626_v37, 1 }
 0x41a   : > { %v3691_v1 = vpack.c.bf16 %v3621_v18, %v3621_v18  ;;  %v3833_v58 = vunpack.c.l.b16 %v3682_v34  ;;  %v3893_v22 = vsel %vm3844_vm1, %v8164_v7, %v8159_v41  ;;  %v3840_v5 = vunpack.c.l.b16 %v3689_v39 }
 0x41b   : > { %4380 = vmatprep.mubr.bf16.mxu0 %v3909_v19  ;;  %v3572_v56 = vmax.f32 %v3570_v49, %v3571_v11  ;;  %v3834_v28 = vunpack.c.l.b16 %v3683_v32  ;;  %v3894_v40 = vsel %vm3846_vm2, %v8230_v35, %v3893_v22  ;;  %v3628_v61 = vmax.f32 %v3626_v37, %v3627_v45  ;;  %v4323_v19 = vld [vmem:[%s8483_s6] ss:$0 sm:$0xff] }
 0x41c   : > { %v3841_v47 = vunpack.c.l.b16 %v3690_v38  ;;  %v3895_v9 = vsel %vm3848_vm3, %v8232_v43, %v3894_v40  ;;  %v3900_v55 = vsel %vm3844_vm1, %v8206_v30, %v8197_v42  ;;  %v3842_v51 = vunpack.c.l.b16 %v3691_v1 }
 0x41d   : > { %v3684_v31 = vpack.c.bf16 %v3572_v56, %v3572_v56  ;;  %v3896_v41 = vsel %vm3850_vm4, %v8368_v10, %v3895_v9  ;;  %v3901_v7 = vsel %vm3846_vm2, %v8344_v6, %v3900_v55  ;;  %v3692_v39 = vpack.c.bf16 %v3628_v61, %v3628_v61 }
 0x41e   : > { %v3897_v35 = vsel %vm3852_vm5, %v3833_v58, %v3896_v41  ;;  %v3902_v15 = vsel %vm3848_vm3, %v8346_v4, %v3901_v7  ;;  %v4314_v4 = vld [vmem:[%s8481_s4] ss:$0 sm:$0xff] }
 0x41f   : > { %v3898_v43 = vsel %vm3854_vm6, %v3834_v28, %v3897_v35  ;;  %v3903_v0 = vsel %vm3850_vm4, %v3840_v5, %v3902_v15  ;;  %v3835_v52 = vunpack.c.l.b16 %v3684_v31  ;;  %v3843_v42 = vunpack.c.l.b16 %v3692_v39 }
 0x420   : > { %v3904_v30 = vsel %vm3852_vm5, %v3841_v47, %v3903_v0 }
 0x421   : > { %v3905_v24 = vsel %vm3854_vm6, %v3842_v51, %v3904_v30  ;;  %v3899_v10 = vsel %vm3856_vm7, %v3835_v52, %v3898_v43 }
 0x422   : > { %v3906_v6 = vsel %vm3856_vm7, %v3843_v42, %v3905_v24 }
 0x423   : > { %v3910_v26 = vpack.c.b16 %v3906_v6, %v3899_v10 }
 0x425   : > { %4381 = vmatmul.mubr.bf16.gmra.mxu0 %v3910_v26 }
 0x46d   : > { %v4378_v36 = vpop.f32.mrf.mxu0 }
 0x46e   : > { %v4006_v60 = vadd.f32 %v4378_v36, %v4314_v4 }
 0x46f   : > { %v3997_v12 = vpop.f32.mrf.mxu0 }
 0x470   : > { %v3998_v25 = vadd.f32 %v4314_v4, %v3997_v12  ;;  %v4030_v21 = vmax.f32 %v4006_v60, 0.0 }
 0x471   : > { %v4379_v53 = vpop.f32.mrf.mxu0 }
 0x472   : > { %v4009_v3 = vadd.f32 %v4379_v53, %v4314_v4  ;;  %v4028_v57 = vmax.f32 %v3998_v25, 0.0 }
 0x473   : > { %v4000_v46 = vpop.f32.mrf.mxu0 }
 0x474   : > { %v4001_v59 = vadd.f32 %v4314_v4, %v4000_v46  ;;  %v4031_v27 = vmax.f32 %v4009_v3, 0.0 }
 0x476   : > { %v4029_v54 = vmax.f32 %v4001_v59, 0.0  ;;  %v4037_v44 = vpack.c.bf16 %v4031_v27, %v4030_v21 }
 0x478   : > { %v4036_v33 = vpack.c.bf16 %v4029_v54, %v4028_v57 }
 0x47a   : > { %4400 = vmatprep.mubr.bf16.mxu1 %v4036_v33 }
 0x47b   : > { %4401 = vmatmul.mubr.bf16.vlgmr.msra.gmra.mxu1 %v4037_v44 }
 0x4e5   : > { %v4382_v8 = vpop.f32.mrf.mxu0 }
 0x4e6   : > { %v4022_v17 = vadd.f32 %v4382_v8, %v4314_v4 }
 0x4e7   : > { %v4013_v16 = vpop.f32.mrf.mxu0 }
 0x4e8   : > { %v4014_v14 = vadd.f32 %v4314_v4, %v4013_v16  ;;  %v4034_v29 = vmax.f32 %v4022_v17, 0.0 }
 0x4e9   : > { %v4383_v50 = vpop.f32.mrf.mxu0 }
 0x4ea   : > { %v4025_v20 = vadd.f32 %v4383_v50, %v4314_v4  ;;  %v4032_v63 = vmax.f32 %v4014_v14, 0.0 }
 0x4eb   : > { %v4016_v23 = vpop.f32.mrf.mxu0 }
 0x4ec   : > { %v4017_v2 = vadd.f32 %v4314_v4, %v4016_v23  ;;  %v4035_v62 = vmax.f32 %v4025_v20, 0.0 }
 0x4ee   : > { %v4033_v48 = vmax.f32 %v4017_v2, 0.0  ;;  %v4039_v13 = vpack.c.bf16 %v4035_v62, %v4034_v29 }
 0x4f0   : > { %v4038_v49 = vpack.c.bf16 %v4033_v48, %v4032_v63 }
 0x4f2   : > { %4404 = vmatprep.mubr.bf16.mxu1 %v4038_v49 }
 0x4f3   : > { %4405 = vmatmul.mubr.bf16.gmra.mxu1 %v4039_v13 }
 0x53b   : > { %v4402_v18 = vpop.f32.mrf.mxu1 }
 0x53c   : > { %v4154_v32 = vadd.f32 %v4402_v18, %v4323_v19 }
 0x53d   : > { %v4145_v37 = vpop.f32.mrf.mxu1 }
 0x53e   : > { %v4146_v38 = vadd.f32 %v4323_v19, %v4145_v37  ;;  %v4178_v56 = vmax.f32 %v4154_v32, 0.0 }
 0x53f   : > { %v4403_v34 = vpop.f32.mrf.mxu1 }
 0x540   : > { %v4176_v28 = vmax.f32 %v4146_v38, 0.0  ;;  %v4157_v61 = vadd.f32 %v4403_v34, %v4323_v19 }
 0x541   : > { %v4148_v11 = vpop.f32.mrf.mxu1 }
 0x542   : > { %v4149_v47 = vadd.f32 %v4323_v19, %v4148_v11  ;;  %v4179_v35 = vmax.f32 %v4157_v61, 0.0 }
 0x544   : > { %v4177_v15 = vmax.f32 %v4149_v47, 0.0 }
 0x5b3   : > { %v4406_v45 = vpop.f32.mrf.mxu1 }
 0x5b4   : > { %v4170_v1 = vadd.f32 %v4406_v45, %v4323_v19 }
 0x5b5   : > { %v4161_v58 = vpop.f32.mrf.mxu1 }
 0x5b6   : > { %v4182_v22 = vmax.f32 %v4170_v1, 0.0  ;;  %v4162_v5 = vadd.f32 %v4323_v19, %v4161_v58 }
 0x5b7   : > { %v4407_v40 = vpop.f32.mrf.mxu1 }
 0x5b8   : > { %v4180_v9 = vmax.f32 %v4162_v5, 0.0  ;;  %v4173_v55 = vadd.f32 %v4407_v40, %v4323_v19  ;;  %v4185_v51 = vmax.f32 %v4178_v56, %v4182_v22 }
 0x5b9   : > { %v4164_v31 = vpop.f32.mrf.mxu1 }
 0x5ba   : > { %v4184_v41 = vmax.f32 %v4176_v28, %v4180_v9  ;;  %v4183_v7 = vmax.f32 %v4173_v55, 0.0  ;;  %v4165_v39 = vadd.f32 %v4323_v19, %v4164_v31 }
 0x5bc   : > { %v4186_v43 = vmax.f32 %v4184_v41, %v4185_v51  ;;  %v4181_v0 = vmax.f32 %v4165_v39, 0.0  ;;  %v4188_v30 = vmax.f32 %v4179_v35, %v4183_v7 }
 0x5be   : > { %v4192_v52 = vcombine.high %v4186_v43, %v4186_v43  ;;  %v4196_v42 = vsel %vm3180_vm0, %v4186_v43, -inf  ;;  %v4187_v24 = vmax.f32 %v4177_v15, %v4181_v0 }
 0x5bf   : > { %v4197_v10 = vrot.slane %v4196_v42, 4 }
 0x5c0   : > { %v4203_v6 = vsel %vm3180_vm0, %v4192_v52, -inf  ;;  %v4189_v26 = vmax.f32 %v4187_v24, %v4188_v30 }
 0x5c1   : > { %v4198_v36 = vmax.f32 %v4196_v42, %v4197_v10  ;;  %v4204_v12 = vrot.slane %v4203_v6, 4 }
 0x5c2   : > { %v4193_v4 = vcombine.high %v4189_v26, %v4189_v26  ;;  %v4210_v53 = vsel %vm3180_vm0, %v4189_v26, -inf }
 0x5c3   : > { %v4199_v25 = vrot.slane %v4198_v36, 2  ;;  %v4205_v3 = vmax.f32 %v4203_v6, %v4204_v12  ;;  %v4211_v60 = vrot.slane %v4210_v53, 4 }
 0x5c4   : > { %v4217_v46 = vsel %vm3180_vm0, %v4193_v4, -inf }
 0x5c5   : > { %v4200_v59 = vmax.f32 %v4198_v36, %v4199_v25  ;;  %v4206_v27 = vrot.slane %v4205_v3, 2  ;;  %v4212_v57 = vmax.f32 %v4210_v53, %v4211_v60  ;;  %v4218_v54 = vrot.slane %v4217_v46, 4 }
 0x5c7   : > { %v4201_v21 = vrot.slane %v4200_v59, 1  ;;  %v4207_v33 = vmax.f32 %v4205_v3, %v4206_v27  ;;  %v4213_v44 = vrot.slane %v4212_v57, 2  ;;  %v4219_v8 = vmax.f32 %v4217_v46, %v4218_v54 }
 0x5c9   : > { %v4208_v16 = vrot.slane %v4207_v33, 1  ;;  %v4214_v50 = vmax.f32 %v4212_v57, %v4213_v44  ;;  %v4220_v14 = vrot.slane %v4219_v8, 2  ;;  %v4202_v20 = vmax.f32 %v4200_v59, %v4201_v21 }
 0x5cb   : > { %v4215_v17 = vrot.slane %v4214_v50, 1  ;;  %v4209_v23 = vmax.f32 %v4207_v33, %v4208_v16  ;;  %v4221_v2 = vmax.f32 %v4219_v8, %v4220_v14 }
 0x5cd   : > { %v4216_v62 = vmax.f32 %v4214_v50, %v4215_v17  ;;  %v4222_v63 = vrot.slane %v4221_v2, 1  ;;  %v4228_v48 = vsel %vm3844_vm1, %v4209_v23, %v4202_v20 }
 0x5cf   : > { %v4223_v29 = vmax.f32 %v4221_v2, %v4222_v63  ;;  %v4229_v49 = vsel %vm3846_vm2, %v4216_v62, %v4228_v48 }
 0x5d1   : > { %v4230_v13 = vsel %vm3848_vm3, %v4223_v29, %v4229_v49 }
 0x5d2   : > { %4232 = vst [vmem:[%s272_s29] sm:$0xf] %v4230_v13 }
 0x5d3   : > { %4620 = shalt.err (!%p4617_p3)
}
 0x5d4   : > { %s4621_s19 = scalar_lea.hbm %s8441_s13, 64  ;;  %s4625_s22 = scalar_lea.hbm %s8484_s7, 256 }
 0x5d5   : > { %p4622_p4 = scmp.ne.s32.totalorder %s8441_s13, %s4621_s19  ;;  %p4626_p9 = scmp.lt.s32.totalorder %s8441_s13, %s8484_s7 }
 0x5d6   : > { %p4627_p10 = scmp.lt.s32.totalorder %s4625_s22, %s4621_s19 }
 0x5d7   : > { %p4623_p7 = pnand %p4622_p4, %p4751_p5 }
 0x5d8   : > { %p4628_p11 = por %p4627_p10, %p4626_p9 }
 0x5d9   : > { %p4624_p8 = pneg %p4623_p7 }
 0x5db   : > { %p4629_p12 = pnand %p4628_p11, %p4624_p8 }
 0x5dd   : > { %4632 = shalt.err (!%p4629_p12)
}
 0x5de   : > { %4408 = dma.vmem_to_hbm [thread:$0]  (%p4751_p5), %s4248_s8, 64, %s8441_s13, %s4234_s14  }
 0x5df PF: > { %p4414_p13 = scmp.ge.s32.totalorder %s4667_s27, 2  ;;  %s4259_s9 = sand.u32 1, %s4655_s24  }
 0x5e0   : > { %s4260_s17 = scalar_lea.sflag [#allocation3], %s4259_s9 }
 0x5e1   : > { %p4411_p0 = pnand %p4414_p13, %p4755_p6 }
 0x5e3   : > { %p4412_p1 = pneg %p4411_p0 }
 0x5e5   : > { %4650 = dma.done.wait (%p4412_p1), %s4260_s17, 64  }
 0x5e6   : > { %4652 = vsyncadd (%p4412_p1), %s4260_s17, 4294967232  ;;  %p17_p2 = scmp.ge.s32.totalorder %s4738_s30, 6   ;;  %s9538_s24 = smov %s4659_s25 }
 0x5e7   : > { %s9539_s25 = smov %s4663_s26  ;;  %s9540_s26 = smov %s4749_s10 }
 0x5e8   : > { %s9541_s27 = smov %s4738_s30  ;;  %19 = sbr.rel (!%p17_p2) target bundleno = 3 (0x3), region = 83 }
 0x5ed   :  { %4265 = vsyncpa [#allocation3], 1 }
 0x5ee   :  { %4267 = vsyncpa [#allocation3 + $0x1], 1 }

</bundles_post_ra>
